<compile_context>
chip_gen: v7x
topology: tpu7x:2x2x1
jax: 0.10.0
libtpu: 0.0.40
codegen_flags: <defaults>
</compile_context>

<pallas_src>
import functools

import jax
import jax.numpy as jnp
from jax.experimental import pallas as pl
from jax.experimental.pallas import tpu as pltpu


# ----------------------------------------------------------------------------
# Pallas kernel: one grid step == `bt` batch elements x `num_dirs` directions.
# ----------------------------------------------------------------------------
def _attn_kernel(x_ref, w_ref, b_ref, *out_refs, attn_dim, num_dirs, inv_n,
                 matmul_dtype):
    """x_ref : (bt, C_tot, N)            channels-first features (N on lanes)
       w_ref : (3*num_dirs*A, C_tot)     block-diagonal fused projection weights
                                         (1/sqrt(A) already folded into q rows)
       b_ref : (3*num_dirs*A, 1)         fused projection bias
       out_refs: num_dirs ctx refs (bt,1,A) then num_dirs amap refs (bt,1,N)."""
    a = attn_dim
    ctx_refs = out_refs[:num_dirs]
    amap_refs = out_refs[num_dirs:]
    w = w_ref[...]
    bias = b_ref[...]
    bt = x_ref.shape[0]

    def attend(q, k, v):
        # Scores: contract the A axis of both (A, N) operands -> (N_q, N_k).
        # No explicit q^T intermediate; bf16 operands, f32 accumulation.
        s = jax.lax.dot_general(
            q.astype(matmul_dtype), k.astype(matmul_dtype),
            (((0,), (0,)), ((), ())), preferred_element_type=jnp.float32)
        # Numerically-stable softmax statistics; normalization is deferred.
        s = s - jnp.max(s, axis=-1, keepdims=True)
        e = jnp.exp(s)
        rs_t = jnp.sum(e, axis=-1, keepdims=True).T      # (1, N_q) row sums
        r_t = 1.0 / rs_t                                 # exact O(N) reciprocals
        # Column-mean of the *normalized* weights without materializing them:
        #   colw[m] = sum_n e[n,m] / rowsum[n]  ->  (1,N)@(N,N) matvec on MXU.
        # Kept in f32: nearly free, avoids an (N,N) bf16 copy of e (v5e store slot).
        colw = jnp.dot(r_t, e, preferred_element_type=jnp.float32)   # (1, N_k)
        # context = mean_n softmax(s)[n,:] @ v^T = (colw @ v^T) / N  -> (1, A)
        ctx = jax.lax.dot_general(
            colw, v, (((1,), (1,)), ((), ())),
            preferred_element_type=jnp.float32) * inv_n
        # attn_map[n] = mean_m softmax(s)[n,m] = rowsum[n]*(1/rowsum[n])/N.
        # (~1/N by construction; kept as explicit O(N) compute to stay faithful
        #  to the PyTorch `attn_weights.mean(dim=2)` semantics.)
        amap = rs_t * r_t * inv_n                        # (1, N_q)
        return ctx, amap

    def body(i, carry):
        x = x_ref[i]                                     # (C_tot, N)
        # Single fused block-diagonal projection: all q/k/v of all directions.
        proj = jnp.dot(w, x, preferred_element_type=jnp.float32) + bias
        for d in range(num_dirs):                        # static, <= 2
            base = 3 * a * d
            ctx, amap = attend(proj[base:base + a],
                               proj[base + a:base + 2 * a],
                               proj[base + 2 * a:base + 3 * a])
            ctx_refs[d][i] = ctx                         # (1, A) slab
            amap_refs[d][i] = amap                       # (1, N) slab
        return carry

    # fori_loop (NOT a static Python unroll) so only one batch element's (N,N)
    # score/exp temporaries are live at a time.
    jax.lax.fori_loop(0, bt, body, 0)


# ----------------------------------------------------------------------------
# VMEM budget / batch-fold selection (generation aware).
# ----------------------------------------------------------------------------
def _vmem_budget_bytes():
    try:
        cap = int(pltpu.get_tpu_info().vmem_capacity_bytes)
    except Exception:
        return 48 << 20                       # unknown generation: v7x-safe cap
    if cap <= (64 << 20):                     # v7x-class: 64 MiB per TensorCore
        return 48 << 20
    return int(min(cap - (28 << 20), 100 << 20))   # v5e/v6e: 128 MiB physical


def _pick_batch_block(batch, per_batch_bytes, fixed_bytes, vmem_budget):
    """Fold batch elements per grid step to amortize the ~0.35us/step overhead,
    keeping >= 2 parallel grid steps (megacore / both v7x TCs) and staying
    inside the generation's VMEM budget.  The (N,N) temporaries are NOT
    multiplied by bt (fori_loop bounds their live range); only the per-batch
    input/output blocks scale with bt."""
    if batch <= 2:
        return 1
    for cand in range(min(batch // 2, 8), 0, -1):
        if batch % cand != 0:
            continue
        if fixed_bytes + cand * per_batch_bytes <= vmem_budget:
            return cand
    return 1


# ----------------------------------------------------------------------------
# pallas_call wrapper shared by the fused-dual and single-direction paths.
# ----------------------------------------------------------------------------
def _attention_pallas(x_cat, w, bias, attn_dim, num_dirs,
                      matmul_dtype=jnp.bfloat16):
    """x_cat: (B, C_tot, N); w: (3*num_dirs*A, C_tot); bias: (3*num_dirs*A, 1).
    Returns num_dirs context arrays (B,1,A) followed by num_dirs attention-map
    arrays (B,1,N)."""
    B, c_tot, N = x_cat.shape
    A = attn_dim
    rows = 3 * num_dirs * A
    inv_n = 1.0 / float(N)

    budget = _vmem_budget_bytes()
    # (N,N) f32 score + exp temporaries per direction, plus slack for the bf16
    # operand copies, proj, weights and compiler temporaries.
    fixed = ((2 * num_dirs + 1) * N * N * 4
             + 4 * rows * (c_tot + 1 + N)
             + (4 << 20))
    per_batch = 4 * (2 * c_tot * N + 2 * num_dirs * (A + N))   # double-buffered
    bt = _pick_batch_block(B, per_batch, fixed, budget)

    # TODO(synk): for feature maps where the full (N,N) score matrix no longer
    # fits the budget (N >~ 1.2k on v7x, ~2k on v5e/v6e) switch to a key-tiled
    # online-softmax (flash-style) variant instead of materializing (N, N).
    est = fixed + bt * per_batch
    vmem_bytes = int(min(max(est, 16 << 20), budget))

    kern = functools.partial(_attn_kernel, attn_dim=A, num_dirs=num_dirs,
                             inv_n=inv_n, matmul_dtype=matmul_dtype)

    out_shape = tuple(
        [jax.ShapeDtypeStruct((B, 1, A), jnp.float32)] * num_dirs
        + [jax.ShapeDtypeStruct((B, 1, N), jnp.float32)] * num_dirs)
    out_specs = tuple(
        [pl.BlockSpec((bt, 1, A), lambda b: (b, 0, 0))] * num_dirs
        + [pl.BlockSpec((bt, 1, N), lambda b: (b, 0, 0))] * num_dirs)

    return pl.pallas_call(
        kern,
        out_shape=out_shape,
        grid=(B // bt,),
        in_specs=[
            pl.BlockSpec((bt, c_tot, N), lambda b: (b, 0, 0)),   # features
            pl.BlockSpec((rows, c_tot), lambda b: (0, 0)),       # fused weights
            pl.BlockSpec((rows, 1), lambda b: (0, 0)),           # fused bias
        ],
        out_specs=out_specs,
        compiler_params=pltpu.CompilerParams(
            dimension_semantics=("parallel",),
            vmem_limit_bytes=vmem_bytes),
    )(x_cat, w, bias)


# ----------------------------------------------------------------------------
# Weight prep: Conv2d(k=1) -> block-diagonal matmul weights; 1/sqrt(A) folded
# into the query rows (one-time host-side op, saves A*N VPU muls per batch).
# ----------------------------------------------------------------------------
def _single_direction_weights(p, attn_dim, c_tot, q_off, c_q, kv_off, c_kv):
    A = attn_dim
    inv_scale = 1.0 / (float(A) ** 0.5)
    w = jnp.zeros((3 * A, c_tot), jnp.float32)
    w = w.at[0:A, q_off:q_off + c_q].set(jnp.transpose(p['Wq']) * inv_scale)
    w = w.at[A:2 * A, kv_off:kv_off + c_kv].set(jnp.transpose(p['Wk']))
    w = w.at[2 * A:3 * A, kv_off:kv_off + c_kv].set(jnp.transpose(p['Wv']))
    b = jnp.concatenate([p['bq'].reshape(-1) * inv_scale,
                         p['bk'].reshape(-1),
                         p['bv'].reshape(-1)]).reshape(3 * A, 1)
    return w, b


# ----------------------------------------------------------------------------
# Glue: optional resample path (plain JAX), matching CrossAttention.forward.
# ----------------------------------------------------------------------------
def _prepare_kv_feats(enc1, enc2, p):
    B, _, H1, W1 = enc1.shape
    _, C2, H2, W2 = enc2.shape
    if (H1, W1) != (H2, W2):
        # resample_conv (1x1 conv) then adaptive_avg_pool2d.
        x2 = jnp.einsum('bchw,co->bohw', enc2, p['Wr']) + p['br'][None, :, None, None]
        # TODO(synk): only the divisible adaptive_avg_pool2d case is implemented;
        #             the bilinear-interpolate fallback is not.
        kh, kw = H2 // H1, W2 // W1
        x2 = x2.reshape(B, C2, H1, kh, W1, kw).mean(axis=(3, 5))
    else:
        x2 = enc2  # adaptive_avg_pool2d to the identical size is the identity
    return x2


def cross_attention_forward(enc1, enc2, p, matmul_dtype=jnp.bfloat16):
    """Single-direction CrossAttention.forward (query=enc1, key/value=enc2)."""
    B, C1, H1, W1 = enc1.shape
    C2 = enc2.shape[1]
    x2 = _prepare_kv_feats(enc1, enc2, p)
    N = H1 * W1
    A = p['Wq'].shape[1]
    c_tot = C1 + C2
    x_cat = jnp.concatenate([enc1.reshape(B, C1, N), x2.reshape(B, C2, N)], axis=1)
    w, b = _single_direction_weights(p, A, c_tot, 0, C1, C1, C2)
    ctx, amap = _attention_pallas(x_cat, w, b, A, num_dirs=1,
                                  matmul_dtype=matmul_dtype)
    return ctx.reshape(B, A), amap.reshape(B, H1, W1)


def dual_cross_attention(feat_pme, feat_hme, params, matmul_dtype=jnp.bfloat16):
    """DualCrossAttention.forward: (ctx_p2h, ctx_h2p, amap_p2h, amap_h2p)."""
    B, Cp, Hp, Wp = feat_pme.shape
    _, Ch, Hh, Wh = feat_hme.shape
    A = params['pme_to_hme']['Wq'].shape[1]
    if (Hp, Wp) == (Hh, Wh):
        # Fused path: both directions share the same two feature tensors with
        # roles swapped -> one pallas_call, one concatenated input, one fused
        # block-diagonal projection.
        N = Hp * Wp
        c_tot = Cp + Ch
        x_cat = jnp.concatenate([feat_pme.reshape(B, Cp, N),
                                 feat_hme.reshape(B, Ch, N)], axis=1)
        wa, ba = _single_direction_weights(params['pme_to_hme'], A, c_tot,
                                           0, Cp, Cp, Ch)   # q from pme, kv from hme
        wb, bb = _single_direction_weights(params['hme_to_pme'], A, c_tot,
                                           Cp, Ch, 0, Cp)   # q from hme, kv from pme
        w = jnp.concatenate([wa, wb], axis=0)                # (6A, Cp+Ch)
        bias = jnp.concatenate([ba, bb], axis=0)             # (6A, 1)
        ctx_a, ctx_b, amap_a, amap_b = _attention_pallas(
            x_cat, w, bias, A, num_dirs=2, matmul_dtype=matmul_dtype)
        return (ctx_a.reshape(B, A), ctx_b.reshape(B, A),
                amap_a.reshape(B, Hp, Wp), amap_b.reshape(B, Hh, Wh))
    # Unequal spatial sizes: per-direction resample glue, two kernel launches.
    ctx_a, amap_a = cross_attention_forward(feat_pme, feat_hme,
                                            params['pme_to_hme'], matmul_dtype)
    ctx_b, amap_b = cross_attention_forward(feat_hme, feat_pme,
                                            params['hme_to_pme'], matmul_dtype)
    return ctx_a, ctx_b, amap_a, amap_b


# ----------------------------------------------------------------------------
# Pure-JAX reference (same glue, jnp compute) for correctness sanity checks.
# ----------------------------------------------------------------------------
def _cross_attention_ref(enc1, enc2, p):
    B, C1, H1, W1 = enc1.shape
    x2 = _prepare_kv_feats(enc1, enc2, p)
    N = H1 * W1
    x1_flat = enc1.reshape(B, C1, N).transpose(0, 2, 1)
    x2_flat = x2.reshape(B, x2.shape[1], N).transpose(0, 2, 1)
    A = p['Wq'].shape[1]
    q = x1_flat @ p['Wq'] + p['bq'][None]
    k = x2_flat @ p['Wk'] + p['bk'][None]
    v = x2_flat @ p['Wv'] + p['bv'][None]
    s = jnp.einsum('bna,bma->bnm', q, k) / (float(A) ** 0.5)
    wgt = jax.nn.softmax(s, axis=-1)
    ctx = jnp.einsum('bnm,bma->bna', wgt, v).mean(axis=1)
    amap = wgt.mean(axis=2).reshape(B, H1, W1)
    return ctx, amap


def _dual_cross_attention_ref(feat_pme, feat_hme, params):
    c1, a1 = _cross_attention_ref(feat_pme, feat_hme, params['pme_to_hme'])
    c2, a2 = _cross_attention_ref(feat_hme, feat_pme, params['hme_to_pme'])
    return c1, c2, a1, a2


# ----------------------------------------------------------------------------
# Deterministic parameter init (Conv2d(k=1) -> (C_in, C_out) matmul weights).
# ----------------------------------------------------------------------------
def init_cross_attention_params(key, enc1_dim, enc2_dim, attn_dim):
    ks = jax.random.split(key, 8)

    def u(k, shape, fan_in):
        bound = 1.0 / (fan_in ** 0.5)
        return jax.random.uniform(k, shape, jnp.float32, -bound, bound)

    return dict(
        Wq=u(ks[0], (enc1_dim, attn_dim), enc1_dim),
        bq=u(ks[1], (1, attn_dim), enc1_dim),
        Wk=u(ks[2], (enc2_dim, attn_dim), enc2_dim),
        bk=u(ks[3], (1, attn_dim), enc2_dim),
        Wv=u(ks[4], (enc2_dim, attn_dim), enc2_dim),
        bv=u(ks[5], (1, attn_dim), enc2_dim),
        Wr=u(ks[6], (enc2_dim, enc2_dim), enc2_dim),   # resample_conv weight
        br=u(ks[7], (enc2_dim,), enc2_dim),            # resample_conv bias
    )


if __name__ == "__main__":
    key = jax.random.PRNGKey(0)
    B, Cp, Ch, H, W, A = 4, 4, 6, 16, 16, 32
    k1, k2, k3, k4, k5 = jax.random.split(key, 5)

    feat_pme = jax.random.normal(k1, (B, Cp, H, W), jnp.float32)
    feat_hme = jax.random.normal(k2, (B, Ch, H, W), jnp.float32)

    params = {
        'pme_to_hme': init_cross_attention_params(k3, Cp, Ch, A),
        'hme_to_pme': init_cross_attention_params(k4, Ch, Cp, A),
    }

    refs = _dual_cross_attention_ref(feat_pme, feat_hme, params)

    # 1) Default path: bf16 operands on the score matmul (f32 accumulation,
    #    f32 softmax statistics / context matvecs).  Fused dual kernel.
    outs = jax.block_until_ready(dual_cross_attention(feat_pme, feat_hme, params))
    for o, r in zip(outs, refs):
        assert o.shape == r.shape
        assert jnp.allclose(o, r, atol=5e-2, rtol=5e-2)

    # 2) f32 MXU path: tight parity with the pure-JAX reference.
    outs_f32 = jax.block_until_ready(
        dual_cross_attention(feat_pme, feat_hme, params,
                             matmul_dtype=jnp.float32))
    for o, r in zip(outs_f32, refs):
        assert o.shape == r.shape
        assert jnp.allclose(o, r, atol=1e-4, rtol=1e-4)

    # 3) Resample path (kv source spatially larger, divisible): exercises the
    #    resample_conv + adaptive_avg_pool2d glue and the single-direction kernel.
    feat_hme_big = jax.random.normal(k5, (B, Ch, 2 * H, 2 * W), jnp.float32)
    ctx_r, amap_r = jax.block_until_ready(
        cross_attention_forward(feat_pme, feat_hme_big, params['pme_to_hme'],
                                matmul_dtype=jnp.float32))
    ctx_ref_r, amap_ref_r = _cross_attention_ref(feat_pme, feat_hme_big,
                                                 params['pme_to_hme'])
    assert jnp.allclose(ctx_r, ctx_ref_r, atol=1e-4, rtol=1e-4)
    assert jnp.allclose(amap_r, amap_ref_r, atol=1e-4, rtol=1e-4)

    print("KERNEL_OK")
</pallas_src>

<mosaic_0001>
module attributes {stable_mosaic.version = 11 : i64} {
  func.func @_attn_kernel(%arg0: i32, %arg1: memref<2x10x256xf32, #tpu.memory_space<vmem>>, %arg2: memref<192x10xf32, #tpu.memory_space<vmem>>, %arg3: memref<192x1xf32, #tpu.memory_space<vmem>>, %arg4: memref<2x1x32xf32, #tpu.memory_space<vmem>>, %arg5: memref<2x1x32xf32, #tpu.memory_space<vmem>>, %arg6: memref<2x1x256xf32, #tpu.memory_space<vmem>>, %arg7: memref<2x1x256xf32, #tpu.memory_space<vmem>>) attributes {dimension_semantics = [#tpu.dimension_semantics<parallel>], iteration_bounds = array<i64: 2>, scalar_prefetch = 0 : i64, scratch_operands = 0 : i64, tpu.core_type = #tpu.core_type<tc>, window_params = [{transform_indices = @transform_0, window_bounds = array<i64: 2, 10, 256>}, {pipeline_mode = #tpu.pipeline_mode<synchronous>, transform_indices = @transform_1, window_bounds = array<i64: 192, 10>}, {pipeline_mode = #tpu.pipeline_mode<synchronous>, transform_indices = @transform_2, window_bounds = array<i64: 192, 1>}, {transform_indices = @transform_3, window_bounds = array<i64: 2, 1, 32>}, {transform_indices = @transform_4, window_bounds = array<i64: 2, 1, 32>}, {transform_indices = @transform_5, window_bounds = array<i64: 2, 1, 256>}, {transform_indices = @transform_6, window_bounds = array<i64: 2, 1, 256>}]} {
    %c0 = arith.constant 0 : index
    %c0_0 = arith.constant 0 : index
    %0 = vector.load %arg2[%c0, %c0_0] : memref<192x10xf32, #tpu.memory_space<vmem>>, vector<192x10xf32>
    %c0_1 = arith.constant 0 : index
    %c0_2 = arith.constant 0 : index
    %1 = vector.load %arg3[%c0_1, %c0_2] : memref<192x1xf32, #tpu.memory_space<vmem>>, vector<192x1xf32>
    %c0_i32 = arith.constant 0 : i32
    %c2_i32 = arith.constant 2 : i32
    %2 = arith.addi %c0_i32, %c2_i32 : i32
    %c1_i32 = arith.constant 1 : i32
    scf.for %arg8 = %c0_i32 to %2 step %c1_i32  : i32 {
      %3 = arith.index_cast %arg8 : i32 to index
      %c0_4 = arith.constant 0 : index
      %c0_5 = arith.constant 0 : index
      %4 = vector.load %arg1[%3, %c0_4, %c0_5] : memref<2x10x256xf32, #tpu.memory_space<vmem>>, vector<1x10x256xf32>
      %5 = vector.shape_cast %4 : vector<1x10x256xf32> to vector<10x256xf32>
      %cst = arith.constant dense<0.000000e+00> : vector<192x256xf32>
      %6 = tpu.matmul %0, %5, %cst {dimension_numbers = #tpu.dot_dimension_numbers<[1], [0], [0], [1], [0, 0, 1, 1], [], []>} : vector<192x10xf32>, vector<10x256xf32>, vector<192x256xf32> -> vector<192x256xf32>
      %7 = vector.broadcast %1 : vector<192x1xf32> to vector<192x256xf32>
      %8 = arith.addf %6, %7 : vector<192x256xf32>
      %9 = vector.extract_strided_slice %8 {offsets = [0, 0], sizes = [32, 256], strides = [1, 1]} : vector<192x256xf32> to vector<32x256xf32>
      %10 = vector.extract_strided_slice %8 {offsets = [32, 0], sizes = [32, 256], strides = [1, 1]} : vector<192x256xf32> to vector<32x256xf32>
      %11 = vector.extract_strided_slice %8 {offsets = [64, 0], sizes = [32, 256], strides = [1, 1]} : vector<192x256xf32> to vector<32x256xf32>
      %12 = arith.truncf %9 : vector<32x256xf32> to vector<32x256xbf16>
      %13 = arith.truncf %10 : vector<32x256xf32> to vector<32x256xbf16>
      %cst_6 = arith.constant dense<0.000000e+00> : vector<256x256xf32>
      %14 = tpu.matmul %12, %13, %cst_6 {dimension_numbers = #tpu.dot_dimension_numbers<[0], [0], [1], [1], [0, 1, 1, 1], [], []>} : vector<32x256xbf16>, vector<32x256xbf16>, vector<256x256xf32> -> vector<256x256xf32>
      %cst_7 = arith.constant dense<0xFF800000> : vector<256xf32>
      %15 = vector.multi_reduction <maximumf>, %14, %cst_7 [1] : vector<256x256xf32> to vector<256xf32>
      %16 = vector.shape_cast %15 : vector<256xf32> to vector<256x1xf32>
      %17 = vector.broadcast %16 : vector<256x1xf32> to vector<256x256xf32>
      %18 = arith.subf %14, %17 : vector<256x256xf32>
      %19 = math.exp %18 : vector<256x256xf32>
      %cst_8 = arith.constant dense<0.000000e+00> : vector<256xf32>
      %20 = vector.multi_reduction <add>, %19, %cst_8 [1] : vector<256x256xf32> to vector<256xf32>
      %21 = vector.shape_cast %20 : vector<256xf32> to vector<256x1xf32>
      %22 = tpu.transpose %21, [1, 0] : vector<256x1xf32> -> vector<1x256xf32>
      %cst_9 = arith.constant 1.000000e+00 : f32
      %23 = vector.broadcast %cst_9 : f32 to vector<1x256xf32>
      %24 = arith.divf %23, %22 : vector<1x256xf32>
      %cst_10 = arith.constant dense<0.000000e+00> : vector<1x256xf32>
      %25 = tpu.matmul %24, %19, %cst_10 {dimension_numbers = #tpu.dot_dimension_numbers<[1], [0], [0], [1], [0, 0, 1, 1], [], []>} : vector<1x256xf32>, vector<256x256xf32>, vector<1x256xf32> -> vector<1x256xf32>
      %cst_11 = arith.constant dense<0.000000e+00> : vector<1x32xf32>
      %26 = tpu.matmul %25, %11, %cst_11 {dimension_numbers = #tpu.dot_dimension_numbers<[1], [1], [0], [0], [0, 0, 1, 0], [], []>} : vector<1x256xf32>, vector<32x256xf32>, vector<1x32xf32> -> vector<1x32xf32>
      %cst_12 = arith.constant 3.906250e-03 : f32
      %27 = vector.broadcast %cst_12 : f32 to vector<1x32xf32>
      %28 = arith.mulf %26, %27 : vector<1x32xf32>
      %29 = arith.mulf %22, %24 : vector<1x256xf32>
      %cst_13 = arith.constant 3.906250e-03 : f32
      %30 = vector.broadcast %cst_13 : f32 to vector<1x256xf32>
      %31 = arith.mulf %29, %30 : vector<1x256xf32>
      %32 = arith.index_cast %arg8 : i32 to index
      %c0_14 = arith.constant 0 : index
      %c0_15 = arith.constant 0 : index
      %33 = vector.load %arg4[%32, %c0_14, %c0_15] : memref<2x1x32xf32, #tpu.memory_space<vmem>>, vector<1x1x32xf32>
      %34 = vector.shape_cast %33 : vector<1x1x32xf32> to vector<1x32xf32>
      %35 = vector.shape_cast %28 : vector<1x32xf32> to vector<1x1x32xf32>
      tpu.vector_store %arg4[%32, %c0_14, %c0_15], %35 {strides = array<i32>} : memref<2x1x32xf32, #tpu.memory_space<vmem>>, vector<1x1x32xf32>,
      %36 = arith.index_cast %arg8 : i32 to index
      %c0_16 = arith.constant 0 : index
      %c0_17 = arith.constant 0 : index
      %37 = vector.load %arg6[%36, %c0_16, %c0_17] : memref<2x1x256xf32, #tpu.memory_space<vmem>>, vector<1x1x256xf32>
      %38 = vector.shape_cast %37 : vector<1x1x256xf32> to vector<1x256xf32>
      %39 = vector.shape_cast %31 : vector<1x256xf32> to vector<1x1x256xf32>
      tpu.vector_store %arg6[%36, %c0_16, %c0_17], %39 {strides = array<i32>} : memref<2x1x256xf32, #tpu.memory_space<vmem>>, vector<1x1x256xf32>,
      %40 = vector.extract_strided_slice %8 {offsets = [96, 0], sizes = [32, 256], strides = [1, 1]} : vector<192x256xf32> to vector<32x256xf32>
      %41 = vector.extract_strided_slice %8 {offsets = [128, 0], sizes = [32, 256], strides = [1, 1]} : vector<192x256xf32> to vector<32x256xf32>
      %42 = vector.extract_strided_slice %8 {offsets = [160, 0], sizes = [32, 256], strides = [1, 1]} : vector<192x256xf32> to vector<32x256xf32>
      %43 = arith.truncf %40 : vector<32x256xf32> to vector<32x256xbf16>
      %44 = arith.truncf %41 : vector<32x256xf32> to vector<32x256xbf16>
      %cst_18 = arith.constant dense<0.000000e+00> : vector<256x256xf32>
      %45 = tpu.matmul %43, %44, %cst_18 {dimension_numbers = #tpu.dot_dimension_numbers<[0], [0], [1], [1], [0, 1, 1, 1], [], []>} : vector<32x256xbf16>, vector<32x256xbf16>, vector<256x256xf32> -> vector<256x256xf32>
      %cst_19 = arith.constant dense<0xFF800000> : vector<256xf32>
      %46 = vector.multi_reduction <maximumf>, %45, %cst_19 [1] : vector<256x256xf32> to vector<256xf32>
      %47 = vector.shape_cast %46 : vector<256xf32> to vector<256x1xf32>
      %48 = vector.broadcast %47 : vector<256x1xf32> to vector<256x256xf32>
      %49 = arith.subf %45, %48 : vector<256x256xf32>
      %50 = math.exp %49 : vector<256x256xf32>
      %cst_20 = arith.constant dense<0.000000e+00> : vector<256xf32>
      %51 = vector.multi_reduction <add>, %50, %cst_20 [1] : vector<256x256xf32> to vector<256xf32>
      %52 = vector.shape_cast %51 : vector<256xf32> to vector<256x1xf32>
      %53 = tpu.transpose %52, [1, 0] : vector<256x1xf32> -> vector<1x256xf32>
      %cst_21 = arith.constant 1.000000e+00 : f32
      %54 = vector.broadcast %cst_21 : f32 to vector<1x256xf32>
      %55 = arith.divf %54, %53 : vector<1x256xf32>
      %cst_22 = arith.constant dense<0.000000e+00> : vector<1x256xf32>
      %56 = tpu.matmul %55, %50, %cst_22 {dimension_numbers = #tpu.dot_dimension_numbers<[1], [0], [0], [1], [0, 0, 1, 1], [], []>} : vector<1x256xf32>, vector<256x256xf32>, vector<1x256xf32> -> vector<1x256xf32>
      %cst_23 = arith.constant dense<0.000000e+00> : vector<1x32xf32>
      %57 = tpu.matmul %56, %42, %cst_23 {dimension_numbers = #tpu.dot_dimension_numbers<[1], [1], [0], [0], [0, 0, 1, 0], [], []>} : vector<1x256xf32>, vector<32x256xf32>, vector<1x32xf32> -> vector<1x32xf32>
      %cst_24 = arith.constant 3.906250e-03 : f32
      %58 = vector.broadcast %cst_24 : f32 to vector<1x32xf32>
      %59 = arith.mulf %57, %58 : vector<1x32xf32>
      %60 = arith.mulf %53, %55 : vector<1x256xf32>
      %cst_25 = arith.constant 3.906250e-03 : f32
      %61 = vector.broadcast %cst_25 : f32 to vector<1x256xf32>
      %62 = arith.mulf %60, %61 : vector<1x256xf32>
      %63 = arith.index_cast %arg8 : i32 to index
      %c0_26 = arith.constant 0 : index
      %c0_27 = arith.constant 0 : index
      %64 = vector.load %arg5[%63, %c0_26, %c0_27] : memref<2x1x32xf32, #tpu.memory_space<vmem>>, vector<1x1x32xf32>
      %65 = vector.shape_cast %64 : vector<1x1x32xf32> to vector<1x32xf32>
      %66 = vector.shape_cast %59 : vector<1x32xf32> to vector<1x1x32xf32>
      tpu.vector_store %arg5[%63, %c0_26, %c0_27], %66 {strides = array<i32>} : memref<2x1x32xf32, #tpu.memory_space<vmem>>, vector<1x1x32xf32>,
      %67 = arith.index_cast %arg8 : i32 to index
      %c0_28 = arith.constant 0 : index
      %c0_29 = arith.constant 0 : index
      %68 = vector.load %arg7[%67, %c0_28, %c0_29] : memref<2x1x256xf32, #tpu.memory_space<vmem>>, vector<1x1x256xf32>
      %69 = vector.shape_cast %68 : vector<1x1x256xf32> to vector<1x256xf32>
      %70 = vector.shape_cast %62 : vector<1x256xf32> to vector<1x1x256xf32>
      tpu.vector_store %arg7[%67, %c0_28, %c0_29], %70 {strides = array<i32>} : memref<2x1x256xf32, #tpu.memory_space<vmem>>, vector<1x1x256xf32>,
    }
    %c2_i32_3 = arith.constant 2 : i32
    return
  }
  func.func @transform_0(%arg0: i32) -> (i32, i32, i32) {
    %c0_i32 = arith.constant 0 : i32
    %c0_i32_0 = arith.constant 0 : i32
    %c0_i32_1 = arith.constant 0 : i32
    return %arg0, %c0_i32, %c0_i32_0 : i32, i32, i32
  }
  func.func @transform_1(%arg0: i32) -> (i32, i32) {
    %c0_i32 = arith.constant 0 : i32
    %c0_i32_0 = arith.constant 0 : i32
    %c0_i32_1 = arith.constant 0 : i32
    return %c0_i32, %c0_i32_0 : i32, i32
  }
  func.func @transform_2(%arg0: i32) -> (i32, i32) {
    %c0_i32 = arith.constant 0 : i32
    %c0_i32_0 = arith.constant 0 : i32
    %c0_i32_1 = arith.constant 0 : i32
    return %c0_i32, %c0_i32_0 : i32, i32
  }
  func.func @transform_3(%arg0: i32) -> (i32, i32, i32) {
    %c0_i32 = arith.constant 0 : i32
    %c0_i32_0 = arith.constant 0 : i32
    %c0_i32_1 = arith.constant 0 : i32
    return %arg0, %c0_i32, %c0_i32_0 : i32, i32, i32
  }
  func.func @transform_4(%arg0: i32) -> (i32, i32, i32) {
    %c0_i32 = arith.constant 0 : i32
    %c0_i32_0 = arith.constant 0 : i32
    %c0_i32_1 = arith.constant 0 : i32
    return %arg0, %c0_i32, %c0_i32_0 : i32, i32, i32
  }
  func.func @transform_5(%arg0: i32) -> (i32, i32, i32) {
    %c0_i32 = arith.constant 0 : i32
    %c0_i32_0 = arith.constant 0 : i32
    %c0_i32_1 = arith.constant 0 : i32
    return %arg0, %c0_i32, %c0_i32_0 : i32, i32, i32
  }
  func.func @transform_6(%arg0: i32) -> (i32, i32, i32) {
    %c0_i32 = arith.constant 0 : i32
    %c0_i32_0 = arith.constant 0 : i32
    %c0_i32_1 = arith.constant 0 : i32
    return %arg0, %c0_i32, %c0_i32_0 : i32, i32, i32
  }
}

</mosaic_0001>

<bundles_post_ra>
// kernel: tpu_custom_call.1
= control target key start
LH: loop header
LB: loop body
LE: loop exit
PB: predicated region body
PF: predicated region fallthrough
CT: control target
= control target key end

     0   :  { %s5065_s0 = inlined_call_operand.vmem [shape: f32[4,10,256], index: 0, kind: input, shape index: {}]   ;;  %s5066_s1 = inlined_call_operand.vmem [shape: f32[192,10], index: 1, kind: input, shape index: {}]   ;;  %s5067_s2 = inlined_call_operand.vmem [shape: f32[192,1], index: 2, kind: input, shape index: {}]   ;;  %s5068_s3 = inlined_call_operand.hbm [shape: f32[4,1,32], index: 3, kind: output, shape index: {0}]   ;;  %s5069_s4 = inlined_call_operand.hbm [shape: f32[4,1,32], index: 4, kind: output, shape index: {1}]   ;;  %s5070_s5 = inlined_call_operand.hbm [shape: f32[4,1,256], index: 5, kind: output, shape index: {2}]   ;;  %s5071_s6 = inlined_call_operand.hbm [shape: f32[4,1,256], index: 6, kind: output, shape index: {3}]  }
   0x1   :  { %5106 = sst [smem:[#allocation89_spill]] %s5065_s0 }
   0x2   :  { %5107 = sst [smem:[#allocation90_spill]] %s5066_s1 }
   0x3   :  { %12 = vsyncpa [#allocation3], 0 }
   0x4   :  { %14 = vsyncpa [#allocation3 + $0x1], 0 }
   0x5   :  { %15 = vsyncpa [#allocation5], 0 }
   0x6   :  { %17 = vsyncpa [#allocation5 + $0x1], 0 }
   0x7   :  { %18 = vsyncpa [#allocation8], 0 }
   0x8   :  { %20 = vsyncpa [#allocation8 + $0x1], 0  ;;  %s3609_s21 = smov 0   ;;  %s3611_s22 = smov 0  }
   0x9   :  { %s3613_s23 = smov 0   ;;  %s3615_s24 = smov 0  }
   0xa LB: > { %s3630_s25 = sadd.s32 4294967295, %s3556_s24   ;;  %s5072_s26 = sadd.s32 4294967294, %s3556_s24   ;;  %s3556_s24 = sphi %s3615_s24, %s5306_s24   ;;  %s3552_s23 = sphi %s3613_s23, %s5305_s23   ;;  %s3548_s22 = sphi %s3611_s22, %s5304_s22   ;;  %s3544_s21 = sphi %s3609_s21, %s5303_s21  }
   0xb   : > { %s3634_s27 = sadd.s32 1, %s3556_s24   ;;  %s101_s28 = sadd.s32 1, %s3552_s23 }
   0xc   : > { %s98_s29 = ssub.s32 %s3556_s24, %s3634_s27  ;;  %p111_p0 = scmp.ne.s32.totalorder %s3552_s23, %s3548_s22 }
   0xd   : > { %p99_p1 = scmp.eq.s32.totalorder %s98_s29, 0  ;;  %p112_p2 = scmp.eq.s32.totalorder %s3630_s25, 1 }
   0xe   : > { %p117_p3 = scmp.ne.s32.totalorder %s3548_s22, %s3544_s21  ;;  %p118_p4 = scmp.eq.s32.totalorder %s5072_s26, 1 }
   0xf   : > { %s3647_s30 = scalar_select %p99_p1, %s3552_s23, %s101_s28  }
  0x10   : > { %p3649_p5 = por %p112_p2, %p111_p0  ;;  %p3653_p6 = por %p118_p4, %p117_p3 }
  0x11   : > { %p2817_p7 = scmp.ge.s32.totalorder %s3556_s24, 1  ;;  %p230_p8 = scmp.lt.s32.totalorder %s3556_s24, 3 }
  0x13   : > { %p231_p9 = pnand %p2817_p7, %p230_p8 }
  0x15   : > { %234 = sbr.rel (%p231_p9) target bundleno = 2571 (0xa0b), region = 32 }
  0x1c   : > { %s3660_s9 = sand.u32 1, %s3548_s22   ;;  %s2822_s10 = sshll.u32 %s3630_s25, 1  ;;  %v3788_v24 = vld [vmem:[%s5067_s2] sm:$0xff]  ;;  %v3793_v25 = vld [vmem:[%s5067_s2 + $0x8] sm:$0xff]  ;;  %v3798_v26 = vld [vmem:[%s5067_s2 + $0x10] sm:$0xff] }
  0x1d   : > { %s5110_s1 = sld [smem:[#allocation90_spill]]  ;;  %s2818_s17 = sshll.u32 %s3660_s9, 1  ;;  %5135 = vst [vmem:[#allocation36_spill] sm:$0xff] %v3788_v24  ;;  %5136 = vst [vmem:[#allocation37_spill] sm:$0xff] %v3793_v25  ;;  %v3808_v27 = vld [vmem:[%s5067_s2 + $0x18] sm:$0xff]  ;;  %v3813_v28 = vld [vmem:[%s5067_s2 + $0x20] sm:$0xff] }
  0x1e   : > { %s2820_s18 = sshll.u32 %s3660_s9, 2  ;;  %p277_p10 = scmp.lt.s32.totalorder %s2822_s10, 3  ;;  %5137 = vst [vmem:[#allocation38_spill] sm:$0xff] %v3798_v26  ;;  %5139 = vst [vmem:[#allocation39_spill] sm:$0xff] %v3808_v27  ;;  %v3818_v29 = vld [vmem:[%s5067_s2 + $0x28] sm:$0xff]  ;;  %v3823_v30 = vld [vmem:[%s5067_s2 + $0x30] sm:$0xff] }
  0x1f   : > { %s5138_s0 = sld [smem:[#allocation89_spill]]  ;;  %5140 = vst [vmem:[#allocation40_spill] sm:$0xff] %v3813_v28  ;;  %5141 = vst [vmem:[#allocation41_spill] sm:$0xff] %v3818_v29  ;;  %v3828_v31 = vld [vmem:[%s5067_s2 + $0x38] sm:$0xff]  ;;  %v3833_v32 = vld [vmem:[%s5067_s2 + $0x40] sm:$0xff]  ;;  %s3912_s16 = scalar_lea.vmem [#allocation2], %s2818_s17 }
  0x20   : > { %s5308_s10 = smov (!%p277_p10, %s2822_s10), 3  ;;  %5142 = vst [vmem:[#allocation42_spill] sm:$0xff] %v3823_v30  ;;  %5143 = vst [vmem:[#allocation43_spill] sm:$0xff] %v3828_v31  ;;  %v3838_v33 = vld [vmem:[%s5067_s2 + $0x48] sm:$0xff]  ;;  %v3843_v34 = vld [vmem:[%s5067_s2 + $0x50] sm:$0xff]  ;;  %s3916_s26 = scalar_lea.vmem [#allocation4], %s2818_s17 }
  0x21   : > { %s2902_s28 = sshll.u32 %s5308_s10, 5  ;;  %5144 = vst [vmem:[#allocation44_spill] sm:$0xff] %v3833_v32  ;;  %5145 = vst [vmem:[#allocation45_spill] sm:$0xff] %v3838_v33  ;;  %v3848_v35 = vld [vmem:[%s5067_s2 + $0x58] sm:$0xff]  ;;  %v3853_v36 = vld [vmem:[%s5067_s2 + $0x60] sm:$0xff]  ;;  %s3920_s19 = scalar_lea.vmem [#allocation6], %s2820_s18 }
  0x22   : > { %5146 = vst [vmem:[#allocation46_spill] sm:$0xff] %v3843_v34  ;;  %5147 = vst [vmem:[#allocation47_spill] sm:$0xff] %v3848_v35  ;;  %v3858_v37 = vld [vmem:[%s5067_s2 + $0x68] sm:$0xff]  ;;  %v3863_v38 = vld [vmem:[%s5067_s2 + $0x70] sm:$0xff]  ;;  %s3924_s10 = scalar_lea.vmem [#allocation7], %s2820_s18  ;;  %s3926_s29 = smov 0  }
  0x23   : > { %v3666_v0 = vld [vmem:[%s5110_s1] sm:$0xff]  ;;  %v3671_v1 = vld [vmem:[%s5110_s1 + $0x8] sm:$0xff]  ;;  %v3676_v2 = vld [vmem:[%s5110_s1 + $0x10] sm:$0xff]  ;;  %5148 = vst [vmem:[#allocation48_spill] sm:$0xff] %v3853_v36 }
  0x24   : > { %5111 = vst [vmem:[#allocation12_spill] sm:$0xff] %v3666_v0  ;;  %5112 = vst [vmem:[#allocation13_spill] sm:$0xff] %v3671_v1  ;;  %v3683_v3 = vld [vmem:[%s5110_s1 + $0x18] sm:$0xff]  ;;  %v3688_v4 = vld [vmem:[%s5110_s1 + $0x20] sm:$0xff] }
  0x25   : > { %5113 = vst [vmem:[#allocation14_spill] sm:$0xff] %v3676_v2  ;;  %5114 = vst [vmem:[#allocation15_spill] sm:$0xff] %v3683_v3  ;;  %v3693_v5 = vld [vmem:[%s5110_s1 + $0x28] sm:$0xff]  ;;  %v3698_v6 = vld [vmem:[%s5110_s1 + $0x30] sm:$0xff]  ;;  %s3803_s20 = scalar_lea.vmem %s5138_s0, %s2902_s28 }
  0x26   : > { %5115 = vst [vmem:[#allocation16_spill] sm:$0xff] %v3688_v4  ;;  %5116 = vst [vmem:[#allocation17_spill] sm:$0xff] %v3693_v5  ;;  %v3703_v7 = vld [vmem:[%s5110_s1 + $0x38] sm:$0xff]  ;;  %v3708_v8 = vld [vmem:[%s5110_s1 + $0x40] sm:$0xff] }
  0x27   : > { %5117 = vst [vmem:[#allocation18_spill] sm:$0xff] %v3698_v6  ;;  %5118 = vst [vmem:[#allocation19_spill] sm:$0xff] %v3703_v7  ;;  %v3713_v9 = vld [vmem:[%s5110_s1 + $0x48] sm:$0xff]  ;;  %v3718_v10 = vld [vmem:[%s5110_s1 + $0x50] sm:$0xff] }
  0x28   : > { %5119 = vst [vmem:[#allocation20_spill] sm:$0xff] %v3708_v8  ;;  %5120 = vst [vmem:[#allocation21_spill] sm:$0xff] %v3713_v9  ;;  %v3723_v11 = vld [vmem:[%s5110_s1 + $0x58] sm:$0xff]  ;;  %v3728_v12 = vld [vmem:[%s5110_s1 + $0x60] sm:$0xff] }
  0x29   : > { %5121 = vst [vmem:[#allocation22_spill] sm:$0xff] %v3718_v10  ;;  %5122 = vst [vmem:[#allocation23_spill] sm:$0xff] %v3723_v11  ;;  %v3733_v13 = vld [vmem:[%s5110_s1 + $0x68] sm:$0xff]  ;;  %v3738_v14 = vld [vmem:[%s5110_s1 + $0x70] sm:$0xff] }
  0x2a   : > { %5123 = vst [vmem:[#allocation24_spill] sm:$0xff] %v3728_v12  ;;  %5124 = vst [vmem:[#allocation25_spill] sm:$0xff] %v3733_v13  ;;  %v3743_v15 = vld [vmem:[%s5110_s1 + $0x78] sm:$0xff]  ;;  %v3748_v16 = vld [vmem:[%s5110_s1 + $0x80] sm:$0xff] }
  0x2b   : > { %5125 = vst [vmem:[#allocation26_spill] sm:$0xff] %v3738_v14  ;;  %5126 = vst [vmem:[#allocation27_spill] sm:$0xff] %v3743_v15  ;;  %v3753_v17 = vld [vmem:[%s5110_s1 + $0x88] sm:$0xff]  ;;  %v3758_v18 = vld [vmem:[%s5110_s1 + $0x90] sm:$0xff] }
  0x2c   : > { %5127 = vst [vmem:[#allocation28_spill] sm:$0xff] %v3748_v16  ;;  %5128 = vst [vmem:[#allocation29_spill] sm:$0xff] %v3753_v17  ;;  %v3763_v19 = vld [vmem:[%s5110_s1 + $0x98] sm:$0xff]  ;;  %v3768_v20 = vld [vmem:[%s5110_s1 + $0xa0] sm:$0xff] }
  0x2d   : > { %5129 = vst [vmem:[#allocation30_spill] sm:$0xff] %v3758_v18  ;;  %5130 = vst [vmem:[#allocation31_spill] sm:$0xff] %v3763_v19  ;;  %v3773_v21 = vld [vmem:[%s5110_s1 + $0xa8] sm:$0xff]  ;;  %v3778_v22 = vld [vmem:[%s5110_s1 + $0xb0] sm:$0xff] }
  0x2e   : > { %5131 = vst [vmem:[#allocation32_spill] sm:$0xff] %v3768_v20  ;;  %5132 = vst [vmem:[#allocation33_spill] sm:$0xff] %v3773_v21  ;;  %v3783_v23 = vld [vmem:[%s5110_s1 + $0xb8] sm:$0xff]  ;;  %v3873_v40 = vld [vmem:[%s5067_s2 + $0x80] sm:$0xff] }
  0x2f   : > { %5133 = vst [vmem:[#allocation34_spill] sm:$0xff] %v3778_v22  ;;  %5134 = vst [vmem:[#allocation35_spill] sm:$0xff] %v3783_v23  ;;  %v3868_v39 = vld [vmem:[%s5067_s2 + $0x78] sm:$0xff]  ;;  %v3878_v41 = vld [vmem:[%s5067_s2 + $0x88] sm:$0xff] }
  0x30   : > { %5149 = vst [vmem:[#allocation49_spill] sm:$0xff] %v3858_v37  ;;  %5150 = vst [vmem:[#allocation50_spill] sm:$0xff] %v3863_v38  ;;  %v3883_v42 = vld [vmem:[%s5067_s2 + $0x90] sm:$0xff]  ;;  %v3888_v43 = vld [vmem:[%s5067_s2 + $0x98] sm:$0xff] }
  0x31   : > { %5151 = vst [vmem:[#allocation51_spill] sm:$0xff] %v3868_v39  ;;  %5152 = vst [vmem:[#allocation52_spill] sm:$0xff] %v3873_v40  ;;  %v3893_v44 = vld [vmem:[%s5067_s2 + $0xa0] sm:$0xff]  ;;  %v3898_v45 = vld [vmem:[%s5067_s2 + $0xa8] sm:$0xff] }
  0x32   : > { %5153 = vst [vmem:[#allocation53_spill] sm:$0xff] %v3878_v41  ;;  %5154 = vst [vmem:[#allocation54_spill] sm:$0xff] %v3883_v42  ;;  %v3903_v46 = vld [vmem:[%s5067_s2 + $0xb0] sm:$0xff]  ;;  %v3908_v47 = vld [vmem:[%s5067_s2 + $0xb8] sm:$0xff] }
  0x33   : > { %5155 = vst [vmem:[#allocation55_spill] sm:$0xff] %v3888_v43  ;;  %5156 = vst [vmem:[#allocation56_spill] sm:$0xff] %v3893_v44 }
  0x34   : > { %5157 = vst [vmem:[#allocation57_spill] sm:$0xff] %v3898_v45  ;;  %5158 = vst [vmem:[#allocation58_spill] sm:$0xff] %v3903_v46 }
  0x35   : > { %5159 = vst [vmem:[#allocation59_spill] sm:$0xff] %v3908_v47 }
  0x36 LB: >> { %vm542_vm0 = vcmask 1041408   ;;  %v3562_v48 = vmov 0.0   ;;  %s2903_s17 = sshll.u32 %s3560_s29, 5  ;;  %v5073_v49 = vmov 0   ;;  %vm3564_vm1 = vmmov 1   ;;  %v5160_v24 = vld [vmem:[#allocation36_spill] sm:$0xff]  ;;  %s1638_s13 = scalar_lea.vmem %s3912_s16, %s3560_s29 [#allocation2]  ;;  %s3560_s29 = sphi %s3926_s29, %s341_s29  }
  0x37   : >> { %613 = vmatprep.mubr.f32.mxu0 %v3562_v48  ;;  %709 = vmatprep.mubr.f32.mxu1 %v3562_v48  ;;  %s344_s18 = scalar_lea.vmem %s3803_s20, %s2903_s17  ;;  %vm2911_vm2 = vmpackc.low %vm542_vm0, %vm3564_vm1  ;;  %v5161_v26 = vld [vmem:[#allocation38_spill] sm:$0xff]  ;;  %v5162_v25 = vld [vmem:[#allocation37_spill] sm:$0xff]  ;;  %vm469_vm3 = vcmask 80896   ;;  %vm798_vm4 = vcmask 261120   ;;  %s2869_s11 = sshll.u32 %s3560_s29, 1  ;;  %vm1639_vm6 = vcmask 253952  }
  0x38   : >> { %3132 = vset.pattern.permute.xlu0 %v5073_v49  ;;  %3133 = vset.pattern.permute.xlu1 %v5073_v49  ;;  %v346_v50 = vld [vmem:[%s344_s18 + $0x8] sm:$0xff]  ;;  %v348_v51 = vld [vmem:[%s344_s18 + $0x18] sm:$0x3]  ;;  %v345_v52 = vld [vmem:[%s344_s18] sm:$0xff]  ;;  %s1660_s12 = scalar_lea.vmem %s3920_s19, %s2869_s11 [#allocation6]  ;;  %s2565_s14 = scalar_lea.vmem %s3924_s10, %s2869_s11 [#allocation7] }
  0x39   : >> { %351 = vperm.xlu0 %3132, %v5160_v24   ;;  %361 = vperm.xlu1 %3133, %v5161_v26   ;;  %v2910_v53 = vpack.c.bf16 %v348_v51, %v346_v50  ;;  %v347_v54 = vld [vmem:[%s344_s18 + $0x10] sm:$0x3]  ;;  %v5164_v0 = vld [vmem:[#allocation12_spill] sm:$0xff]  ;;  %v5166_v29 = vld [vmem:[#allocation41_spill] sm:$0xff]  ;;  %s2545_s15 = scalar_lea.vmem %s3916_s26, %s3560_s29 [#allocation4]  ;;  %s341_s29 = sadd.s32 1, %s3560_s29  }
  0x3a   : >> { %v2913_v55 = vpack.c.bf16 %v347_v54, %v345_v52  ;;  %v5163_v27 = vld [vmem:[#allocation39_spill] sm:$0xff]  ;;  %v5165_v28 = vld [vmem:[#allocation40_spill] sm:$0xff]  ;;  %v5168_v1 = vld [vmem:[#allocation13_spill] sm:$0xff]  ;;  %p338_p11 = scmp.ge.s32.totalorder %s341_s29, 2  }
  0x3b   : >> { %2912 = vmatprep.subr.msk.bf16.mxu0 %vm2911_vm2, %v2910_v53  ;;  %3060 = vmatprep.subr.msk.bf16.mxu1 %vm2911_vm2, %v2910_v53  ;;  %v5167_v16 = vld [vmem:[#allocation28_spill] sm:$0xff]  ;;  %v5169_v30 = vld [vmem:[#allocation42_spill] sm:$0xff]  ;;  %v5170_v31 = vld [vmem:[#allocation43_spill] sm:$0xff]  ;;  %s2572_s28 = sand.u32 (%p338_p11), 1, %s3630_s25   ;;  %s2904_s17 = sshll.u32 (%p338_p11), %s3630_s25, 5 }
  0x3c   : >> { %2915 = vmatpush1.bf16.msk.msra.mxu0 %vm2911_vm2, %v2913_v55  ;;  %3061 = vmatpush1.bf16.msk.msra.mxu1 %vm2911_vm2, %v2913_v55  ;;  %v5171_v17 = vld [vmem:[#allocation29_spill] sm:$0xff]  ;;  %v5172_v2 = vld [vmem:[#allocation14_spill] sm:$0xff]  ;;  %v5174_v3 = vld [vmem:[#allocation15_spill] sm:$0xff]  ;;  %s4914_s20 = scalar_lea.hbm (%p338_p11), %s5068_s3, %s2904_s17  ;;  %s4916_s29 = scalar_lea.sflag (%p338_p11), [#allocation5], %s2572_s28 }
  0x3d   : >> { %356 = vperm.xlu0 %3132, %v5162_v25   ;;  %366 = vperm.xlu1 %3133, %v5163_v27   ;;  %v5173_v18 = vld [vmem:[#allocation30_spill] sm:$0xff]  ;;  %v5175_v19 = vld [vmem:[#allocation31_spill] sm:$0xff]  ;;  %v5176_v4 = vld [vmem:[#allocation16_spill] sm:$0xff]  ;;  %s3566_s18 = smov (%p338_p11), [#allocation4]  }
  0x3e   : >> { %v5177_v20 = vld [vmem:[#allocation32_spill] sm:$0xff]  ;;  %v5178_v5 = vld [vmem:[#allocation17_spill] sm:$0xff]  ;;  %v5180_v6 = vld [vmem:[#allocation18_spill] sm:$0xff]  ;;  %s3402_s11 = sshll.u32 (%p338_p11), %s3566_s18, 4  ;;  %s3403_s11 = int_to_ptr.vmem [resolvable:$false] %s3402_s11 }
  0x3f   : >> { %2829 = vmatmul.mubr.msk.f32.vlgmr.msra.gmra.mrb[0].mxu0 %vm469_vm3, %v5164_v0  ;;  %2845 = vmatmul.mubr.msk.f32.vlgmr.msra.gmra.mrb[0].mxu1 %vm469_vm3, %v5167_v16  ;;  %v5179_v21 = vld [vmem:[#allocation33_spill] sm:$0xff]  ;;  %v5181_v22 = vld [vmem:[#allocation34_spill] sm:$0xff]  ;;  %v5182_v7 = vld [vmem:[#allocation19_spill] sm:$0xff] }
  0x40   : >> { %619 = vmatprep.mubr.f32.mxu0 %v3562_v48  ;;  %715 = vmatprep.mubr.f32.mxu1 %v3562_v48  ;;  %v5183_v23 = vld [vmem:[#allocation35_spill] sm:$0xff]  ;;  %v5184_v8 = vld [vmem:[#allocation20_spill] sm:$0xff]  ;;  %v5185_v9 = vld [vmem:[#allocation21_spill] sm:$0xff] }
  0x41   : >> { %371 = vperm.xlu0 %3132, %v5165_v28   ;;  %376 = vperm.xlu1 %3133, %v5166_v29   ;;  %v5186_v10 = vld [vmem:[#allocation22_spill] sm:$0xff]  ;;  %v5187_v11 = vld [vmem:[#allocation23_spill] sm:$0xff]  ;;  %v5188_v12 = vld [vmem:[#allocation24_spill] sm:$0xff] }
  0x42   : >> { %v5189_v13 = vld [vmem:[#allocation25_spill] sm:$0xff]  ;;  %v5190_v14 = vld [vmem:[#allocation26_spill] sm:$0xff]  ;;  %v5191_v15 = vld [vmem:[#allocation27_spill] sm:$0xff] }
  0x43   : >> { %2830 = vmatmul.mubr.msk.f32.gmra.mrb[2].mxu0 %vm469_vm3, %v5168_v1  ;;  %2846 = vmatmul.mubr.msk.f32.gmra.mrb[2].mxu1 %vm469_vm3, %v5171_v17 }
  0x44   : >> { %625 = vmatprep.mubr.f32.mxu0 %v3562_v48  ;;  %721 = vmatprep.mubr.f32.mxu1 %v3562_v48 }
  0x45   : >> { %381 = vperm.xlu0 %3132, %v5169_v30   ;;  %386 = vperm.xlu1 %3133, %v5170_v31  }
  0x47   : >> { %2831 = vmatmul.mubr.msk.f32.gmra.mrb[4].mxu0 %vm469_vm3, %v5172_v2  ;;  %2847 = vmatmul.mubr.msk.f32.gmra.mrb[4].mxu1 %vm469_vm3, %v5173_v18 }
  0x48   : >> { %631 = vmatprep.mubr.f32.mxu0 %v3562_v48  ;;  %727 = vmatprep.mubr.f32.mxu1 %v3562_v48 }
  0x4b   : >> { %2832 = vmatmul.mubr.msk.f32.gmra.mrb[6].mxu0 %vm469_vm3, %v5174_v3  ;;  %2848 = vmatmul.mubr.msk.f32.gmra.mrb[6].mxu1 %vm469_vm3, %v5175_v19 }
  0x4c   : >> { %637 = vmatprep.mubr.f32.mxu0 %v3562_v48  ;;  %733 = vmatprep.mubr.f32.mxu1 %v3562_v48 }
  0x4f   : >> { %2833 = vmatmul.mubr.msk.f32.gmra.mrb[8].mxu0 %vm469_vm3, %v5176_v4  ;;  %2849 = vmatmul.mubr.msk.f32.gmra.mrb[8].mxu1 %vm469_vm3, %v5177_v20 }
  0x50   : >> { %643 = vmatprep.mubr.f32.mxu0 %v3562_v48  ;;  %739 = vmatprep.mubr.f32.mxu1 %v3562_v48 }
  0x53   : >> { %2834 = vmatmul.mubr.msk.f32.gmra.mrb[10].mxu0 %vm469_vm3, %v5178_v5  ;;  %2850 = vmatmul.mubr.msk.f32.gmra.mrb[10].mxu1 %vm469_vm3, %v5179_v21 }
  0x54   : >> { %649 = vmatprep.mubr.f32.mxu0 %v3562_v48  ;;  %745 = vmatprep.mubr.f32.mxu1 %v3562_v48 }
  0x57   : >> { %2835 = vmatmul.mubr.msk.f32.gmra.mrb[12].mxu0 %vm469_vm3, %v5180_v6  ;;  %2851 = vmatmul.mubr.msk.f32.gmra.mrb[12].mxu1 %vm469_vm3, %v5181_v22 }
  0x58   : >> { %655 = vmatprep.mubr.f32.mxu0 %v3562_v48  ;;  %751 = vmatprep.mubr.f32.mxu1 %v3562_v48 }
  0x5b   : >> { %2836 = vmatmul.mubr.msk.f32.gmra.mrb[14].mxu0 %vm469_vm3, %v5182_v7  ;;  %2852 = vmatmul.mubr.msk.f32.gmra.mrb[14].mxu1 %vm469_vm3, %v5183_v23 }
  0x5c   : >> { %661 = vmatprep.mubr.f32.mxu0 %v3562_v48  ;;  %879 = vmatprep.mubr.bf16.mxu1 %v5073_v49 }
  0x5f   : >> { %2837 = vmatmul.mubr.msk.f32.gmra.mrb[16].mxu0 %vm469_vm3, %v5184_v8 }
  0x60   : >> { %667 = vmatprep.mubr.f32.mxu0 %v3562_v48 }
  0x63   : >> { %2838 = vmatmul.mubr.msk.f32.gmra.mrb[18].mxu0 %vm469_vm3, %v5185_v9 }
  0x64   : >> { %673 = vmatprep.mubr.f32.mxu0 %v3562_v48 }
  0x67   : >> { %2839 = vmatmul.mubr.msk.f32.gmra.mrb[20].mxu0 %vm469_vm3, %v5186_v10 }
  0x68   : >> { %679 = vmatprep.mubr.f32.mxu0 %v3562_v48 }
  0x6b   : >> { %2840 = vmatmul.mubr.msk.f32.gmra.mrb[22].mxu0 %vm469_vm3, %v5187_v11 }
  0x6c   : >> { %685 = vmatprep.mubr.f32.mxu0 %v3562_v48 }
  0x6f   : >> { %2841 = vmatmul.mubr.msk.f32.gmra.mrb[24].mxu0 %vm469_vm3, %v5188_v12 }
  0x70   : >> { %691 = vmatprep.mubr.f32.mxu0 %v3562_v48 }
  0x73   : >> { %2842 = vmatmul.mubr.msk.f32.gmra.mrb[26].mxu0 %vm469_vm3, %v5189_v13 }
  0x74   : >> { %697 = vmatprep.mubr.f32.mxu0 %v3562_v48 }
  0x77   : >> { %2843 = vmatmul.mubr.msk.f32.gmra.mrb[28].mxu0 %vm469_vm3, %v5190_v14 }
  0x78   : >> { %703 = vmatprep.mubr.f32.mxu0 %v3562_v48 }
  0x7b   : >> { %2844 = vmatmul.mubr.msk.f32.gmra.mrb[30].mxu0 %vm469_vm3, %v5191_v15 }
  0xb8   : >> { %v352_v56 = vpop.permute.xlu0 %351  ;;  %v362_v50 = vpop.permute.xlu1 %361 }
  0xbc   : >> { %v357_v59 = vpop.permute.xlu0 %356  ;;  %v367_v48 = vpop.permute.xlu1 %366 }
 0x112   : >> { %v615_v57 = vpop.f32.mrb[0].mxu0 }
 0x113   : >> { %v617_v58 = vpop.f32.mrb[1].mxu0  ;;  %v616_v61 = vadd.f32 %v615_v57, %v352_v56 }
 0x114   : >> { %v618_v51 = vadd.f32 %v617_v58, %v352_v56  ;;  %v372_v56 = vpop.permute.xlu0 %371  ;;  %v377_v58 = vpop.permute.xlu1 %376 }
 0x116   : >> { %v621_v60 = vpop.f32.mrb[2].mxu0 }
 0x117   : >> { %v622_v62 = vadd.f32 %v621_v60, %v357_v59  ;;  %v623_v63 = vpop.f32.mrb[3].mxu0 }
 0x118   : >> { %v624_v52 = vadd.f32 %v623_v63, %v357_v59 }
 0x119   : >> { %v758_v53 = vpack.c.bf16 %v622_v62, %v616_v61 }
 0x11a   : >> { %v759_v54 = vpack.c.bf16 %v624_v52, %v618_v51  ;;  %v627_v55 = vpop.f32.mrb[4].mxu0 }
 0x11b   : >> { %v629_v49 = vpop.f32.mrb[5].mxu0  ;;  %766 = vxpose.xlu0.c.b16.start [1/2] (short) %v758_v53, 128  ;;  %v628_v1 = vadd.f32 %v627_v55, %v362_v50 }
 0x11c   : >> { %782 = vxpose.xlu1.c.b16.start [1/2] (short) %v759_v54, 128  ;;  %v630_v4 = vadd.f32 %v629_v49, %v362_v50 }
 0x11e   : >> { %v633_v0 = vpop.f32.mrb[6].mxu0 }
 0x11f   : >> { %v634_v2 = vadd.f32 %v633_v0, %v367_v48  ;;  %v635_v3 = vpop.f32.mrb[7].mxu0 }
 0x120   : >> { %v636_v5 = vadd.f32 %v635_v3, %v367_v48  ;;  %v382_v3 = vpop.permute.xlu0 %381 }
 0x121   : >> { %v760_v6 = vpack.c.bf16 %v634_v2, %v628_v1  ;;  %v387_v1 = vpop.permute.xlu1 %386 }
 0x122   : >> { %v761_v57 = vpack.c.bf16 %v636_v5, %v630_v4  ;;  %v639_v60 = vpop.f32.mrb[8].mxu0 }
 0x123   : >> { %v641_v7 = vpop.f32.mrb[9].mxu0  ;;  %767 = vxpose.xlu0.c.b16.end [2/2] (short) %v760_v6, 128  ;;  %v640_v61 = vadd.f32 %v639_v60, %v372_v56 }
 0x124   : >> { %783 = vxpose.xlu1.c.b16.end [2/2] (short) %v761_v57, 128  ;;  %v642_v51 = vadd.f32 %v641_v7, %v372_v56  ;;  %v4016_v7 = vpop.f32.mrb[0].mxu1 }
 0x125   : >> { %5192 = vst [vmem:[#allocation60_spill] sm:$0xff] %v4016_v7  ;;  %v4018_v60 = vpop.f32.mrb[1].mxu1 }
 0x126   : >> { %v645_v59 = vpop.f32.mrb[10].mxu0  ;;  %5193 = vst [vmem:[#allocation61_spill] sm:$0xff] %v4018_v60  ;;  %v4020_v56 = vpop.f32.mrb[2].mxu1 }
 0x127   : >> { %v646_v62 = vadd.f32 %v645_v59, %v377_v58  ;;  %v647_v63 = vpop.f32.mrb[11].mxu0  ;;  %5194 = vst [vmem:[#allocation62_spill] sm:$0xff] %v4020_v56 }
 0x128   : >> { %v648_v52 = vadd.f32 %v647_v63, %v377_v58  ;;  %v4022_v58 = vpop.f32.mrb[3].mxu1 }
 0x129   : >> { %v762_v53 = vpack.c.bf16 %v646_v62, %v640_v61  ;;  %5195 = vst [vmem:[#allocation63_spill] sm:$0xff] %v4022_v58  ;;  %v4024_v59 = vpop.f32.mrb[4].mxu1 }
 0x12a   : >> { %v763_v54 = vpack.c.bf16 %v648_v52, %v642_v51  ;;  %v651_v0 = vpop.f32.mrb[12].mxu0  ;;  %5196 = vst [vmem:[#allocation64_spill] sm:$0xff] %v4024_v59  ;;  %v4026_v61 = vpop.f32.mrb[5].mxu1 }
 0x12b   : >> { %v653_v55 = vpop.f32.mrb[13].mxu0  ;;  %v652_v4 = vadd.f32 %v651_v0, %v382_v3  ;;  %5197 = vst [vmem:[#allocation65_spill] sm:$0xff] %v4026_v61  ;;  %v4028_v62 = vpop.f32.mrb[6].mxu1 }
 0x12c   : >> { %847 = vmatprep.subr.bf16.mxu1 %v763_v54  ;;  %v654_v49 = vadd.f32 %v653_v55, %v382_v3  ;;  %5198 = vst [vmem:[#allocation66_spill] sm:$0xff] %v4028_v62  ;;  %v4030_v51 = vpop.f32.mrb[7].mxu1 }
 0x12d   : >> { %848 = vmatpush1.bf16.msra.mxu1 %v762_v53  ;;  %5199 = vst [vmem:[#allocation67_spill] sm:$0xff] %v4030_v51  ;;  %v4033_v52 = vpop.f32.mrb[8].mxu1  ;;  %v5201_v53 = vmov 0  }
 0x12e   : >> { %v657_v2 = vpop.f32.mrb[14].mxu0  ;;  %5200 = vst [vmem:[#allocation68_spill] sm:$0xff] %v4033_v52  ;;  %v4036_v54 = vpop.f32.mrb[9].mxu1 }
 0x12f   : >> { %v658_v5 = vadd.f32 %v657_v2, %v387_v1  ;;  %v659_v6 = vpop.f32.mrb[15].mxu0  ;;  %5202 = vst [vmem:[#allocation69_spill] sm:$0xff] %v4036_v54  ;;  %v4038_v0 = vpop.f32.mrb[10].mxu1 }
 0x130   : >> { %v660_v50 = vadd.f32 %v659_v6, %v387_v1  ;;  %5203 = vst [vmem:[#allocation70_spill] sm:$0xff] %v4038_v0  ;;  %v4040_v55 = vpop.f32.mrb[11].mxu1 }
 0x131   : >> { %v764_v48 = vpack.c.bf16 %v658_v5, %v652_v4  ;;  %5204 = vst [vmem:[#allocation71_spill] sm:$0xff] %v4040_v55  ;;  %v4042_v3 = vpop.f32.mrb[12].mxu1 }
 0x132   : >> { %v765_v57 = vpack.c.bf16 %v660_v50, %v654_v49  ;;  %5205 = vst [vmem:[#allocation72_spill] sm:$0xff] %v4042_v3  ;;  %v4044_v2 = vpop.f32.mrb[13].mxu1 }
 0x133   : >> { %5206 = vst [vmem:[#allocation73_spill] sm:$0xff] %v4044_v2  ;;  %v4046_v4 = vpop.f32.mrb[14].mxu1 }
 0x134   : >> { %849 = vmatprep.subr.bf16.mxu1 %v765_v57  ;;  %5207 = vst [vmem:[#allocation74_spill] sm:$0xff] %v4046_v4  ;;  %v4048_v5 = vpop.f32.mrb[15].mxu1 }
 0x135   : >> { %850 = vmatpush1.bf16.msra.mxu1 %v764_v48  ;;  %5208 = vst [vmem:[#allocation75_spill] sm:$0xff] %v4048_v5 }
 0x185   : >> { %v774_v63 = vpop.trf.xlu0 }
 0x186   : >> { %2853 = vmatmul.mubr.msk.bf16.vlgmr.msra.gmra.mrb[16].mxu1 %vm798_vm4, %v774_v63 }
 0x187   : >> { %889 = vmatprep.mubr.bf16.mxu1 %v5201_v53 }
 0x189   : >> { %v775_v1 = vpop.trf.xlu0 }
 0x18d   : >> { %v776_v6 = vpop.trf.xlu0 }
 0x18e   : >> { %2854 = vmatmul.mubr.msk.bf16.gmra.mrb[20].mxu1 %vm798_vm4, %v775_v1  ;;  %v790_v1 = vpop.trf.xlu1 }
 0x18f   : >> { %899 = vmatprep.mubr.bf16.mxu1 %v5201_v53 }
 0x191   : >> { %v777_v49 = vpop.trf.xlu0 }
 0x195   : >> { %v778_v50 = vpop.trf.xlu0 }
 0x196   : >> { %2855 = vmatmul.mubr.msk.bf16.gmra.mrb[24].mxu1 %vm798_vm4, %v776_v6  ;;  %v791_v6 = vpop.trf.xlu1 }
 0x197   : >> { %909 = vmatprep.mubr.bf16.mxu1 %v5201_v53 }
 0x199   : >> { %v779_v48 = vpop.trf.xlu0 }
 0x19d   : >> { %v780_v57 = vpop.trf.xlu0 }
 0x19e   : >> { %2856 = vmatmul.mubr.msk.bf16.gmra.mrb[28].mxu1 %vm798_vm4, %v777_v49  ;;  %v792_v49 = vpop.trf.xlu1 }
 0x19f   : >> { %919 = vmatprep.mubr.bf16.mxu1 %v5201_v53 }
 0x1a1   : >> { %v781_v63 = vpop.trf.xlu0 }
 0x1a6   : >> { %2857 = vmatmul.mubr.msk.bf16.gmra.mrb[32].mxu1 %vm798_vm4, %v778_v50  ;;  %v793_v50 = vpop.trf.xlu1 }
 0x1a7   : >> { %929 = vmatprep.mubr.bf16.mxu1 %v5201_v53 }
 0x1ae   : >> { %2858 = vmatmul.mubr.msk.bf16.gmra.mrb[36].mxu1 %vm798_vm4, %v779_v48  ;;  %v794_v48 = vpop.trf.xlu1 }
 0x1af   : >> { %939 = vmatprep.mubr.bf16.mxu1 %v5201_v53 }
 0x1b6   : >> { %2859 = vmatmul.mubr.msk.bf16.gmra.mrb[40].mxu1 %vm798_vm4, %v780_v57  ;;  %v795_v57 = vpop.trf.xlu1 }
 0x1b7   : >> { %949 = vmatprep.mubr.bf16.mxu1 %v5201_v53 }
 0x1be   : >> { %2860 = vmatmul.mubr.msk.bf16.gmra.mrb[44].mxu1 %vm798_vm4, %v781_v63  ;;  %v796_v63 = vpop.trf.xlu1 }
 0x1bf   : >> { %959 = vmatprep.mubr.bf16.mxu1 %v5201_v53 }
 0x1c6   : >> { %2861 = vmatmul.mubr.msk.bf16.gmra.mrb[48].mxu1 %vm798_vm4, %v790_v1  ;;  %v797_v1 = vpop.trf.xlu1 }
 0x1c7   : >> { %969 = vmatprep.mubr.bf16.mxu1 %v5201_v53 }
 0x1ce   : >> { %2862 = vmatmul.mubr.msk.bf16.gmra.mrb[52].mxu1 %vm798_vm4, %v791_v6 }
 0x1cf   : >> { %979 = vmatprep.mubr.bf16.mxu1 %v5201_v53 }
 0x1d6   : >> { %2863 = vmatmul.mubr.msk.bf16.gmra.mrb[56].mxu1 %vm798_vm4, %v792_v49 }
 0x1d7   : >> { %989 = vmatprep.mubr.bf16.mxu1 %v5201_v53 }
 0x1de   : >> { %2864 = vmatmul.mubr.msk.bf16.gmra.mrb[60].mxu1 %vm798_vm4, %v793_v50 }
 0x1df   : >> { %999 = vmatprep.mubr.bf16.mxu1 %v5201_v53 }
 0x1e6   : >> { %2865 = vmatmul.mubr.msk.bf16.gmra.mrb[64].mxu1 %vm798_vm4, %v794_v48 }
 0x1e7   : >> { %1009 = vmatprep.mubr.bf16.mxu1 %v5201_v53 }
 0x1ee   : >> { %2866 = vmatmul.mubr.msk.bf16.gmra.mrb[68].mxu1 %vm798_vm4, %v795_v57 }
 0x1ef   : >> { %1019 = vmatprep.mubr.bf16.mxu1 %v5201_v53 }
 0x1f6   : >> { %2867 = vmatmul.mubr.msk.bf16.gmra.mrb[72].mxu1 %vm798_vm4, %v796_v63 }
 0x1f7   : >> { %1029 = vmatprep.mubr.bf16.mxu1 %v5201_v53 }
 0x1fe   : >> { %2868 = vmatmul.mubr.msk.bf16.gmra.mrb[76].mxu1 %vm798_vm4, %v797_v1 }
 0x259   : >> { %v4079_v6 = vpop.f32.mrb[16].mxu1 }
 0x25a   : >> { %v4081_v49 = vpop.f32.mrb[17].mxu1 }
 0x25b   : >> { %v4083_v50 = vpop.f32.mrb[18].mxu1  ;;  %v1040_v48 = vmax.f32 %v4079_v6, %v4081_v49 }
 0x25c   : >> { %v4087_v57 = vpop.f32.mrb[19].mxu1 }
 0x25d   : >> { %1041 = vmax.xlane.f32.xlu1 %v1040_v48  ;;  %v1043_v63 = vmax.f32 %v4083_v50, %v4087_v57 }
 0x25f   : >> { %1044 = vmax.xlane.f32.xlu0 %v1043_v63 }
 0x261   : >> { %v4091_v8 = vpop.f32.mrb[20].mxu1 }
 0x262   : >> { %v4093_v9 = vpop.f32.mrb[21].mxu1 }
 0x263   : >> { %v4095_v1 = vpop.f32.mrb[22].mxu1  ;;  %v1046_v10 = vmax.f32 %v4091_v8, %v4093_v9 }
 0x264   : >> { %v4099_v11 = vpop.f32.mrb[23].mxu1 }
 0x265   : >> { %1047 = vmax.xlane.f32.xlu0 %v1046_v10  ;;  %v1049_v12 = vmax.f32 %v4095_v1, %v4099_v11 }
 0x269   : >> { %1050 = vmax.xlane.f32.xlu0 %v1049_v12  ;;  %v4103_v48 = vpop.f32.mrb[24].mxu1 }
 0x26a   : >> { %v4105_v13 = vpop.f32.mrb[25].mxu1 }
 0x26b   : >> { %v4107_v63 = vpop.f32.mrb[26].mxu1  ;;  %v1052_v14 = vmax.f32 %v4103_v48, %v4105_v13 }
 0x26c   : >> { %v4111_v15 = vpop.f32.mrb[27].mxu1 }
 0x26d   : >> { %1053 = vmax.xlane.f32.xlu0 %v1052_v14  ;;  %v1055_v16 = vmax.f32 %v4107_v63, %v4111_v15 }
 0x271   : >> { %1056 = vmax.xlane.f32.xlu0 %v1055_v16  ;;  %v4115_v10 = vpop.f32.mrb[28].mxu1 }
 0x272   : >> { %v4117_v17 = vpop.f32.mrb[29].mxu1 }
 0x273   : >> { %v4119_v12 = vpop.f32.mrb[30].mxu1  ;;  %v1058_v18 = vmax.f32 %v4115_v10, %v4117_v17 }
 0x274   : >> { %v4123_v19 = vpop.f32.mrb[31].mxu1 }
 0x275   : >> { %1059 = vmax.xlane.f32.xlu0 %v1058_v18  ;;  %v1061_v20 = vmax.f32 %v4119_v12, %v4123_v19 }
 0x279   : >> { %1062 = vmax.xlane.f32.xlu0 %v1061_v20  ;;  %v4127_v14 = vpop.f32.mrb[32].mxu1 }
 0x27a   : >> { %v4129_v21 = vpop.f32.mrb[33].mxu1 }
 0x27b   : >> { %v4131_v16 = vpop.f32.mrb[34].mxu1  ;;  %v1064_v22 = vmax.f32 %v4127_v14, %v4129_v21 }
 0x27c   : >> { %v4135_v23 = vpop.f32.mrb[35].mxu1 }
 0x27d   : >> { %1065 = vmax.xlane.f32.xlu0 %v1064_v22  ;;  %v1067_v24 = vmax.f32 %v4131_v16, %v4135_v23 }
 0x281   : >> { %1068 = vmax.xlane.f32.xlu0 %v1067_v24  ;;  %v4139_v18 = vpop.f32.mrb[36].mxu1 }
 0x282   : >> { %v4141_v25 = vpop.f32.mrb[37].mxu1 }
 0x283   : >> { %v4143_v20 = vpop.f32.mrb[38].mxu1  ;;  %v1070_v26 = vmax.f32 %v4139_v18, %v4141_v25 }
 0x284   : >> { %v4147_v27 = vpop.f32.mrb[39].mxu1 }
 0x285   : >> { %v1073_v28 = vmax.f32 %v4143_v20, %v4147_v27 }
 0x289   : >> { %v4151_v29 = vpop.f32.mrb[40].mxu1 }
 0x28a   : >> { %v4153_v22 = vpop.f32.mrb[41].mxu1 }
 0x28b   : >> { %v4155_v30 = vpop.f32.mrb[42].mxu1  ;;  %v1076_v24 = vmax.f32 %v4151_v29, %v4153_v22 }
 0x28c   : >> { %v4159_v31 = vpop.f32.mrb[43].mxu1 }
 0x28d   : >> { %v1079_v5 = vmax.f32 %v4155_v30, %v4159_v31 }
 0x291   : >> { %v4163_v4 = vpop.f32.mrb[44].mxu1 }
 0x292   : >> { %v4165_v2 = vpop.f32.mrb[45].mxu1 }
 0x293   : >> { %v4167_v3 = vpop.f32.mrb[46].mxu1  ;;  %v1082_v55 = vmax.f32 %v4163_v4, %v4165_v2 }
 0x294   : >> { %v4171_v0 = vpop.f32.mrb[47].mxu1 }
 0x295   : >> { %v1085_v54 = vmax.f32 %v4167_v3, %v4171_v0 }
 0x299   : >> { %v4175_v52 = vpop.f32.mrb[48].mxu1 }
 0x29a   : >> { %v4177_v47 = vpop.f32.mrb[49].mxu1 }
 0x29b   : >> { %v4179_v46 = vpop.f32.mrb[50].mxu1  ;;  %v1088_v45 = vmax.f32 %v4175_v52, %v4177_v47 }
 0x29c   : >> { %v4183_v44 = vpop.f32.mrb[51].mxu1 }
 0x29d   : >> { %1089 = vmax.xlane.f32.xlu0 %v1088_v45  ;;  %v1091_v53 = vmax.f32 %v4179_v46, %v4183_v44 }
 0x2a1   : >> { %1092 = vmax.xlane.f32.xlu0 %v1091_v53  ;;  %v4187_v51 = vpop.f32.mrb[52].mxu1 }
 0x2a2   : >> { %v4189_v62 = vpop.f32.mrb[53].mxu1 }
 0x2a3   : >> { %v4191_v61 = vpop.f32.mrb[54].mxu1  ;;  %v1094_v59 = vmax.f32 %v4187_v51, %v4189_v62 }
 0x2a4   : >> { %v4195_v58 = vpop.f32.mrb[55].mxu1 }
 0x2a5   : >> { %1071 = vmax.xlane.f32.xlu0 %v1070_v26  ;;  %1095 = vmax.xlane.f32.xlu1 %v1094_v59  ;;  %v1097_v45 = vmax.f32 %v4191_v61, %v4195_v58 }
 0x2a9   : >> { %1074 = vmax.xlane.f32.xlu0 %v1073_v28  ;;  %1098 = vmax.xlane.f32.xlu1 %v1097_v45  ;;  %v4199_v56 = vpop.f32.mrb[56].mxu1 }
 0x2aa   : >> { %v4201_v53 = vpop.f32.mrb[57].mxu1 }
 0x2ab   : >> { %v4203_v60 = vpop.f32.mrb[58].mxu1  ;;  %v1100_v7 = vmax.f32 %v4199_v56, %v4201_v53 }
 0x2ac   : >> { %v4207_v43 = vpop.f32.mrb[59].mxu1 }
 0x2ad   : >> { %1077 = vmax.xlane.f32.xlu0 %v1076_v24  ;;  %1101 = vmax.xlane.f32.xlu1 %v1100_v7  ;;  %v1103_v26 = vmax.f32 %v4203_v60, %v4207_v43 }
 0x2b1   : >> { %1080 = vmax.xlane.f32.xlu0 %v1079_v5  ;;  %1104 = vmax.xlane.f32.xlu1 %v1103_v26  ;;  %v4211_v28 = vpop.f32.mrb[60].mxu1 }
 0x2b2   : >> { %v4213_v59 = vpop.f32.mrb[61].mxu1 }
 0x2b3   : >> { %v4215_v45 = vpop.f32.mrb[62].mxu1  ;;  %v1106_v41 = vmax.f32 %v4211_v28, %v4213_v59 }
 0x2b4   : >> { %v4219_v35 = vpop.f32.mrb[63].mxu1 }
 0x2b5   : >> { %1083 = vmax.xlane.f32.xlu0 %v1082_v55  ;;  %1107 = vmax.xlane.f32.xlu1 %v1106_v41  ;;  %v1109_v7 = vmax.f32 %v4215_v45, %v4219_v35 }
 0x2b9   : >> { %1086 = vmax.xlane.f32.xlu0 %v1085_v54  ;;  %1110 = vmax.xlane.f32.xlu1 %v1109_v7  ;;  %v4223_v5 = vpop.f32.mrb[64].mxu1 }
 0x2ba   : >> { %v4225_v24 = vpop.f32.mrb[65].mxu1 }
 0x2bb   : >> { %v4227_v26 = vpop.f32.mrb[66].mxu1  ;;  %v1112_v33 = vmax.f32 %v4223_v5, %v4225_v24 }
 0x2bc   : >> { %5209 = vst [vmem:[#allocation76_spill] sm:$0xff] %v4227_v26  ;;  %v4231_v39 = vpop.f32.mrb[67].mxu1 }
 0x2bd   : >> { %5210 = vst [vmem:[#allocation77_spill] sm:$0xff] %v4231_v39  ;;  %1113 = vmax.xlane.f32.xlu1 %v1112_v33  ;;  %v1115_v41 = vmax.f32 %v4227_v26, %v4231_v39 }
 0x2c1   : >> { %1116 = vmax.xlane.f32.xlu1 %v1115_v41  ;;  %v4235_v55 = vpop.f32.mrb[68].mxu1 }
 0x2c2   : >> { %5211 = vst [vmem:[#allocation78_spill] sm:$0xff] %v4235_v55  ;;  %v4237_v54 = vpop.f32.mrb[69].mxu1 }
 0x2c3   : >> { %5212 = vst [vmem:[#allocation79_spill] sm:$0xff] %v4237_v54  ;;  %v4239_v7 = vpop.f32.mrb[70].mxu1  ;;  %v1118_v38 = vmax.f32 %v4235_v55, %v4237_v54 }
 0x2c4   : >> { %5213 = vst [vmem:[#allocation80_spill] sm:$0xff] %v4239_v7  ;;  %v4243_v37 = vpop.f32.mrb[71].mxu1 }
 0x2c5   : >> { %5214 = vst [vmem:[#allocation81_spill] sm:$0xff] %v4243_v37  ;;  %1119 = vmax.xlane.f32.xlu1 %v1118_v38  ;;  %v1121_v42 = vmax.f32 %v4239_v7, %v4243_v37 }
 0x2c9   : >> { %1122 = vmax.xlane.f32.xlu1 %v1121_v42  ;;  %v4247_v33 = vpop.f32.mrb[72].mxu1 }
 0x2ca   : >> { %5215 = vst [vmem:[#allocation82_spill] sm:$0xff] %v4247_v33  ;;  %v4249_v40 = vpop.f32.mrb[73].mxu1 }
 0x2cb   : >> { %5216 = vst [vmem:[#allocation83_spill] sm:$0xff] %v4249_v40  ;;  %v4251_v41 = vpop.f32.mrb[74].mxu1  ;;  %v1124_v34 = vmax.f32 %v4247_v33, %v4249_v40 }
 0x2cc   : >> { %5217 = vst [vmem:[#allocation84_spill] sm:$0xff] %v4251_v41  ;;  %v4255_v32 = vpop.f32.mrb[75].mxu1 }
 0x2cd   : >> { %5218 = vst [vmem:[#allocation85_spill] sm:$0xff] %v4255_v32  ;;  %1125 = vmax.xlane.f32.xlu1 %v1124_v34  ;;  %v1127_v36 = vmax.f32 %v4251_v41, %v4255_v32 }
 0x2d1   : >> { %1128 = vmax.xlane.f32.xlu1 %v1127_v36  ;;  %v4259_v38 = vpop.f32.mrb[76].mxu1 }
 0x2d2   : >> { %5219 = vst [vmem:[#allocation86_spill] sm:$0xff] %v4259_v38  ;;  %v4261_v37 = vpop.f32.mrb[77].mxu1 }
 0x2d3   : >> { %5220 = vst [vmem:[#allocation87_spill] sm:$0xff] %v4261_v37  ;;  %v4263_v42 = vpop.f32.mrb[78].mxu1  ;;  %v1130_v7 = vmax.f32 %v4259_v38, %v4261_v37 }
 0x2d4   : >> { %v4267_v54 = vpop.f32.mrb[79].mxu1 }
 0x2d5   : >> { %5221 = vst [vmem:[#allocation88_spill] sm:$0xff] %v4267_v54  ;;  %1131 = vmax.xlane.f32.xlu1 %v1130_v7  ;;  %v1133_v40 = vmax.f32 %v4263_v42, %v4267_v54 }
 0x2d9   : >> { %1134 = vmax.xlane.f32.xlu1 %v1133_v40 }
 0x2ea   : >> { %v1042_v34 = vpop.xlane.xlu1 %1041 }
 0x2eb   : >> { %v1136_v32 = vsub.f32 %v4079_v6, %v1042_v34  ;;  %v1137_v36 = vsub.f32 %v4081_v49, %v1042_v34 }
 0x2ec   : >> { %v1045_v41 = vpop.xlane.xlu0 %1044 }
 0x2ed   : >> { %v1200_v33 = vmul.f32 1.442695, %v1136_v32  ;;  %v1202_v55 = vmul.f32 1.442695, %v1137_v36  ;;  %v1138_v39 = vsub.f32 %v4083_v50, %v1045_v41  ;;  %v1139_v26 = vsub.f32 %v4087_v57, %v1045_v41 }
 0x2ef   : >> { %3134 = vpow2.f32 %v1200_v33  ;;  %v1204_v37 = vmul.f32 1.442695, %v1138_v39  ;;  %v1206_v38 = vmul.f32 1.442695, %v1139_v26 }
 0x2f0   : >> { %3136 = vpow2.f32 %v1202_v55 }
 0x2f1   : >> { %3138 = vpow2.f32 %v1204_v37 }
 0x2f2   : >> { %3140 = vpow2.f32 %v1206_v38  ;;  %v1048_v7 = vpop.xlane.xlu0 %1047 }
 0x2f3   : >> { %v1140_v40 = vsub.f32 %v4091_v8, %v1048_v7  ;;  %v1141_v6 = vsub.f32 %v4093_v9, %v1048_v7 }
 0x2f5   : >> { %v1208_v54 = vmul.f32 1.442695, %v1140_v40  ;;  %v1210_v49 = vmul.f32 1.442695, %v1141_v6 }
 0x2f6   : >> { %v1051_v34 = vpop.xlane.xlu0 %1050 }
 0x2f7   : >> { %3142 = vpow2.f32 %v1208_v54  ;;  %v1142_v32 = vsub.f32 %v4095_v1, %v1051_v34  ;;  %v1143_v50 = vsub.f32 %v4099_v11, %v1051_v34 }
 0x2f8   : >> { %3144 = vpow2.f32 %v1210_v49 }
 0x2f9   : >> { %v3135_v57 = vpop.eup %3134  ;;  %v1212_v39 = vmul.f32 1.442695, %v1142_v32  ;;  %v1214_v26 = vmul.f32 1.442695, %v1143_v50 }
 0x2fa   : >> { %v3137_v55 = vpop.eup %3136  ;;  %v1054_v37 = vpop.xlane.xlu0 %1053 }
 0x2fb   : >> { %v3139_v33 = vpop.eup %3138  ;;  %3146 = vpow2.f32 %v1212_v39  ;;  %v1144_v8 = vsub.f32 %v4103_v48, %v1054_v37  ;;  %v1145_v9 = vsub.f32 %v4105_v13, %v1054_v37  ;;  %v1328_v41 = vadd.f32 %v3137_v55, %v3135_v57 }
 0x2fc   : >> { %v3141_v38 = vpop.eup %3140  ;;  %3148 = vpow2.f32 %v1214_v26  ;;  %v2918_v54 = vpack.c.bf16 %v3139_v33, %v3135_v57 }
 0x2fd   : >> { %v1216_v36 = vmul.f32 1.442695, %v1144_v8  ;;  %v1218_v1 = vmul.f32 1.442695, %v1145_v9  ;;  %1329 = vadd.xlane.f32.xlu0 %v1328_v41  ;;  %v2916_v11 = vpack.c.bf16 %v3141_v38, %v3137_v55  ;;  %v1331_v7 = vadd.f32 %v3141_v38, %v3139_v33 }
 0x2fe   : >> { %v1057_v40 = vpop.xlane.xlu0 %1056 }
 0x2ff   : >> { %3150 = vpow2.f32 %v1216_v36  ;;  %2917 = vmatprep.subr.bf16.mxu0 %v2916_v11  ;;  %v1146_v6 = vsub.f32 %v4107_v63, %v1057_v40  ;;  %v1147_v49 = vsub.f32 %v4111_v15, %v1057_v40 }
 0x300   : >> { %3152 = vpow2.f32 %v1218_v1  ;;  %2919 = vmatpush1.bf16.msra.mxu0 %v2918_v54 }
 0x301   : >> { %v3143_v48 = vpop.eup %3142  ;;  %v1220_v13 = vmul.f32 1.442695, %v1146_v6  ;;  %v1222_v34 = vmul.f32 1.442695, %v1147_v49  ;;  %1332 = vadd.xlane.f32.xlu0 %v1331_v7 }
 0x302   : >> { %v3145_v32 = vpop.eup %3144  ;;  %v1060_v50 = vpop.xlane.xlu0 %1059 }
 0x303   : >> { %3154 = vpow2.f32 %v1220_v13  ;;  %v1148_v57 = vsub.f32 %v4115_v10, %v1060_v50  ;;  %v1149_v39 = vsub.f32 %v4117_v17, %v1060_v50  ;;  %v1334_v26 = vadd.f32 %v3145_v32, %v3143_v48 }
 0x304   : >> { %3156 = vpow2.f32 %v1222_v34 }
 0x305   : >> { %v3147_v55 = vpop.eup %3146  ;;  %v1224_v37 = vmul.f32 1.442695, %v1148_v57  ;;  %v1226_v63 = vmul.f32 1.442695, %v1149_v39  ;;  %1335 = vadd.xlane.f32.xlu0 %v1334_v26 }
 0x306   : >> { %v3149_v15 = vpop.eup %3148  ;;  %v1063_v33 = vpop.xlane.xlu0 %1062  ;;  %v2922_v8 = vpack.c.bf16 %v3147_v55, %v3143_v48 }
 0x307   : >> { %3158 = vpow2.f32 %v1224_v37  ;;  %v1150_v9 = vsub.f32 %v4119_v12, %v1063_v33  ;;  %v1151_v41 = vsub.f32 %v4123_v19, %v1063_v33  ;;  %v2920_v38 = vpack.c.bf16 %v3149_v15, %v3145_v32 }
 0x308   : >> { %3160 = vpow2.f32 %v1226_v63  ;;  %v1337_v54 = vadd.f32 %v3149_v15, %v3147_v55 }
 0x309   : >> { %v3151_v10 = vpop.eup %3150  ;;  %v1228_v36 = vmul.f32 1.442695, %v1150_v9  ;;  %v1230_v17 = vmul.f32 1.442695, %v1151_v41  ;;  %2921 = vmatprep.subr.bf16.mxu0 %v2920_v38 }
 0x30a   : >> { %v3153_v1 = vpop.eup %3152  ;;  %1338 = vadd.xlane.f32.xlu0 %v1337_v54  ;;  %2923 = vmatpush1.bf16.msra.mxu0 %v2922_v8  ;;  %v1066_v11 = vpop.xlane.xlu0 %1065 }
 0x30b   : >> { %3162 = vpow2.f32 %v1228_v36  ;;  %v1152_v7 = vsub.f32 %v4127_v14, %v1066_v11  ;;  %v1153_v40 = vsub.f32 %v4129_v21, %v1066_v11  ;;  %v1340_v6 = vadd.f32 %v3153_v1, %v3151_v10 }
 0x30c   : >> { %3164 = vpow2.f32 %v1230_v17 }
 0x30d   : >> { %v3155_v12 = vpop.eup %3154  ;;  %v1232_v19 = vmul.f32 1.442695, %v1152_v7  ;;  %v1234_v49 = vmul.f32 1.442695, %v1153_v40 }
 0x30e   : >> { %v3157_v48 = vpop.eup %3156  ;;  %1341 = vadd.xlane.f32.xlu0 %v1340_v6  ;;  %v1069_v13 = vpop.xlane.xlu0 %1068  ;;  %v2926_v34 = vpack.c.bf16 %v3155_v12, %v3151_v10 }
 0x30f   : >> { %3166 = vpow2.f32 %v1232_v19  ;;  %v1154_v32 = vsub.f32 %v4131_v16, %v1069_v13  ;;  %v1155_v50 = vsub.f32 %v4135_v23, %v1069_v13  ;;  %v2924_v57 = vpack.c.bf16 %v3157_v48, %v3153_v1 }
 0x310   : >> { %3168 = vpow2.f32 %v1234_v49  ;;  %v1343_v39 = vadd.f32 %v3157_v48, %v3155_v12 }
 0x311   : >> { %v3159_v14 = vpop.eup %3158  ;;  %v1236_v26 = vmul.f32 1.442695, %v1154_v32  ;;  %v1238_v21 = vmul.f32 1.442695, %v1155_v50  ;;  %2925 = vmatprep.subr.bf16.mxu0 %v2924_v57 }
 0x312   : >> { %v3161_v55 = vpop.eup %3160  ;;  %1344 = vadd.xlane.f32.xlu0 %v1343_v39  ;;  %2927 = vmatpush1.bf16.msra.mxu0 %v2926_v34 }
 0x313   : >> { %3170 = vpow2.f32 %v1236_v26  ;;  %v1346_v37 = vadd.f32 %v3161_v55, %v3159_v14 }
 0x314   : >> { %3172 = vpow2.f32 %v1238_v21 }
 0x315   : >> { %v3163_v63 = vpop.eup %3162 }
 0x316   : >> { %v3165_v15 = vpop.eup %3164  ;;  %1347 = vadd.xlane.f32.xlu0 %v1346_v37  ;;  %v2930_v33 = vpack.c.bf16 %v3163_v63, %v3159_v14 }
 0x317   : >> { %v2928_v16 = vpack.c.bf16 %v3165_v15, %v3161_v55  ;;  %v1349_v8 = vadd.f32 %v3165_v15, %v3163_v63 }
 0x319   : >> { %v3167_v23 = vpop.eup %3166  ;;  %2929 = vmatprep.subr.bf16.mxu0 %v2928_v16 }
 0x31a   : >> { %v3169_v9 = vpop.eup %3168  ;;  %1350 = vadd.xlane.f32.xlu0 %v1349_v8  ;;  %2931 = vmatpush1.bf16.msra.mxu0 %v2930_v33 }
 0x31b   : >> { %v1352_v41 = vadd.f32 %v3169_v9, %v3167_v23 }
 0x31d   : >> { %v3171_v38 = vpop.eup %3170 }
 0x31e   : >> { %v3173_v54 = vpop.eup %3172  ;;  %1353 = vadd.xlane.f32.xlu0 %v1352_v41  ;;  %v2934_v10 = vpack.c.bf16 %v3171_v38, %v3167_v23 }
 0x31f   : >> { %v2932_v36 = vpack.c.bf16 %v3173_v54, %v3169_v9  ;;  %v1355_v17 = vadd.f32 %v3173_v54, %v3171_v38 }
 0x321   : >> { %2933 = vmatprep.subr.bf16.mxu0 %v2932_v36 }
 0x322   : >> { %1356 = vadd.xlane.f32.xlu0 %v1355_v17  ;;  %2935 = vmatpush1.bf16.msra.mxu0 %v2934_v10 }
 0x32a   : >> { %v1090_v1 = vpop.xlane.xlu0 %1089 }
 0x32b   : >> { %v1168_v11 = vsub.f32 %v4175_v52, %v1090_v1  ;;  %v1169_v7 = vsub.f32 %v4177_v47, %v1090_v1 }
 0x32d   : >> { %v1264_v40 = vmul.f32 1.442695, %v1168_v11  ;;  %v1266_v6 = vmul.f32 1.442695, %v1169_v7 }
 0x32e   : >> { %v1093_v12 = vpop.xlane.xlu0 %1092 }
 0x32f   : >> { %3174 = vpow2.f32 %v1264_v40  ;;  %v1170_v19 = vsub.f32 %v4179_v46, %v1093_v12  ;;  %v1171_v49 = vsub.f32 %v4183_v44, %v1093_v12 }
 0x330   : >> { %3176 = vpow2.f32 %v1266_v6 }
 0x331   : >> { %v1268_v48 = vmul.f32 1.442695, %v1170_v19  ;;  %v1270_v13 = vmul.f32 1.442695, %v1171_v49 }
 0x332   : >> { %v1096_v34 = vpop.xlane.xlu1 %1095  ;;  %v1072_v32 = vpop.xlane.xlu0 %1071 }
 0x333   : >> { %3178 = vpow2.f32 %v1268_v48  ;;  %v1172_v50 = vsub.f32 %v4187_v51, %v1096_v34  ;;  %v1173_v52 = vsub.f32 %v4189_v62, %v1096_v34  ;;  %v1156_v47 = vsub.f32 %v4139_v18, %v1072_v32 }
 0x334   : >> { %3180 = vpow2.f32 %v1270_v13  ;;  %v1157_v57 = vsub.f32 %v4141_v25, %v1072_v32 }
 0x335   : >> { %v1272_v39 = vmul.f32 1.442695, %v1172_v50  ;;  %v1274_v14 = vmul.f32 1.442695, %v1173_v52  ;;  %v1240_v46 = vmul.f32 1.442695, %v1156_v47 }
 0x336   : >> { %v1242_v26 = vmul.f32 1.442695, %v1157_v57  ;;  %v1099_v44 = vpop.xlane.xlu1 %1098  ;;  %v1075_v21 = vpop.xlane.xlu0 %1074 }
 0x337   : >> { %3182 = vpow2.f32 %v1272_v39  ;;  %v1174_v55 = vsub.f32 %v4191_v61, %v1099_v44  ;;  %v1175_v37 = vsub.f32 %v4195_v58, %v1099_v44  ;;  %v1158_v51 = vsub.f32 %v4143_v20, %v1075_v21 }
 0x338   : >> { %3184 = vpow2.f32 %v1274_v14  ;;  %v1159_v62 = vsub.f32 %v4147_v27, %v1075_v21 }
 0x339   : >> { %v4303_v18 = vpop.eup %3174  ;;  %3186 = vpow2.f32 %v1240_v46  ;;  %v1276_v25 = vmul.f32 1.442695, %v1174_v55  ;;  %v1278_v63 = vmul.f32 1.442695, %v1175_v37  ;;  %v1244_v15 = vmul.f32 1.442695, %v1158_v51 }
 0x33a   : >> { %v4305_v33 = vpop.eup %3176  ;;  %3188 = vpow2.f32 %v1242_v26  ;;  %v1246_v16 = vmul.f32 1.442695, %v1159_v62  ;;  %v1102_v8 = vpop.xlane.xlu1 %1101 }
 0x33b   : >> { %v1078_v23 = vpop.xlane.xlu0 %1077  ;;  %3190 = vpow2.f32 %v1276_v25  ;;  %v1176_v58 = vsub.f32 %v4199_v56, %v1102_v8  ;;  %v1177_v61 = vsub.f32 %v4201_v53, %v1102_v8  ;;  %v1376_v9 = vadd.f32 %v4305_v33, %v4303_v18 }
 0x33c   : >> { %v1160_v20 = vsub.f32 %v4151_v29, %v1078_v23  ;;  %3192 = vpow2.f32 %v1278_v63  ;;  %v1161_v27 = vsub.f32 %v4153_v22, %v1078_v23 }
 0x33d   : >> { %v4313_v41 = vpop.eup %3178  ;;  %3194 = vpow2.f32 %v1244_v15  ;;  %v1280_v38 = vmul.f32 1.442695, %v1176_v58  ;;  %v1282_v54 = vmul.f32 1.442695, %v1177_v61  ;;  %1377 = vadd.xlane.f32.xlu1 %v1376_v9 }
 0x33e   : >> { %v1248_v10 = vmul.f32 1.442695, %v1160_v20  ;;  %v4315_v36 = vpop.eup %3180  ;;  %3196 = vpow2.f32 %v1246_v16  ;;  %v1250_v56 = vmul.f32 1.442695, %v1161_v27  ;;  %v1105_v53 = vpop.xlane.xlu1 %1104  ;;  %v2950_v29 = vpack.c.bf16 %v4313_v41, %v4303_v18 }
 0x33f   : >> { %v1081_v17 = vpop.xlane.xlu0 %1080  ;;  %3198 = vpow2.f32 %v1280_v38  ;;  %v1178_v22 = vsub.f32 %v4203_v60, %v1105_v53  ;;  %v1179_v1 = vsub.f32 %v4207_v43, %v1105_v53  ;;  %v1379_v40 = vadd.f32 %v4315_v36, %v4313_v41 }
 0x340   : >> { %v1162_v11 = vsub.f32 %v4155_v30, %v1081_v17  ;;  %3200 = vpow2.f32 %v1282_v54  ;;  %v1163_v7 = vsub.f32 %v4159_v31, %v1081_v17  ;;  %v2948_v6 = vpack.c.bf16 %v4315_v36, %v4305_v33 }
 0x341   : >> { %v4327_v12 = vpop.eup %3182  ;;  %3202 = vpow2.f32 %v1248_v10  ;;  %v1284_v19 = vmul.f32 1.442695, %v1178_v22  ;;  %v1286_v49 = vmul.f32 1.442695, %v1179_v1  ;;  %1380 = vadd.xlane.f32.xlu1 %v1379_v40  ;;  %v5222_v40 = vld [vmem:[#allocation76_spill] sm:$0xff] }
 0x342   : >> { %v1252_v48 = vmul.f32 1.442695, %v1162_v11  ;;  %v4329_v60 = vpop.eup %3184  ;;  %3204 = vpow2.f32 %v1250_v56  ;;  %v1254_v43 = vmul.f32 1.442695, %v1163_v7  ;;  %v1108_v30 = vpop.xlane.xlu1 %1107 }
 0x343   : >> { %v1084_v13 = vpop.xlane.xlu0 %1083  ;;  %v3187_v31 = vpop.eup %3186  ;;  %3206 = vpow2.f32 %v1284_v19  ;;  %v1180_v34 = vsub.f32 %v4211_v28, %v1108_v30  ;;  %v1181_v32 = vsub.f32 %v4213_v59, %v1108_v30  ;;  %v1382_v57 = vadd.f32 %v4329_v60, %v4327_v12 }
 0x344   : >> { %v1164_v50 = vsub.f32 %v4163_v4, %v1084_v13  ;;  %v3189_v52 = vpop.eup %3188  ;;  %3208 = vpow2.f32 %v1286_v49  ;;  %v1165_v47 = vsub.f32 %v4165_v2, %v1084_v13  ;;  %v5223_v49 = vld [vmem:[#allocation77_spill] sm:$0xff] }
 0x345   : >> { %v4337_v39 = vpop.eup %3190  ;;  %3210 = vpow2.f32 %v1252_v48  ;;  %v1288_v14 = vmul.f32 1.442695, %v1180_v34  ;;  %v1290_v46 = vmul.f32 1.442695, %v1181_v32  ;;  %1383 = vadd.xlane.f32.xlu1 %v1382_v57  ;;  %v1358_v59 = vadd.f32 %v3189_v52, %v3187_v31 }
 0x346   : >> { %v1256_v26 = vmul.f32 1.442695, %v1164_v50  ;;  %v4339_v44 = vpop.eup %3192  ;;  %3212 = vpow2.f32 %v1254_v43  ;;  %v1258_v28 = vmul.f32 1.442695, %v1165_v47  ;;  %v1111_v4 = vpop.xlane.xlu1 %1110  ;;  %v2954_v2 = vpack.c.bf16 %v4337_v39, %v4327_v12 }
 0x347   : >> { %v1087_v21 = vpop.xlane.xlu0 %1086  ;;  %v3195_v55 = vpop.eup %3194  ;;  %3214 = vpow2.f32 %v1288_v14  ;;  %v1182_v37 = vsub.f32 %v4215_v45, %v1111_v4  ;;  %v1183_v51 = vsub.f32 %v4219_v35, %v1111_v4  ;;  %1359 = vadd.xlane.f32.xlu0 %v1358_v59  ;;  %v1385_v15 = vadd.f32 %v4339_v44, %v4337_v39  ;;  %v5225_v59 = vld [vmem:[#allocation79_spill] sm:$0xff] }
 0x348   : >> { %v1166_v62 = vsub.f32 %v4167_v3, %v1087_v21  ;;  %v3197_v25 = vpop.eup %3196  ;;  %3216 = vpow2.f32 %v1290_v46  ;;  %v1167_v63 = vsub.f32 %v4171_v0, %v1087_v21  ;;  %v2938_v16 = vpack.c.bf16 %v3195_v55, %v3187_v31 }
 0x349   : >> { %v4349_v8 = vpop.eup %3198  ;;  %3218 = vpow2.f32 %v1256_v26  ;;  %v1292_v23 = vmul.f32 1.442695, %v1182_v37  ;;  %v1294_v58 = vmul.f32 1.442695, %v1183_v51  ;;  %1386 = vadd.xlane.f32.xlu1 %v1385_v15  ;;  %v2936_v3 = vpack.c.bf16 %v3197_v25, %v3189_v52  ;;  %v5224_v26 = vld [vmem:[#allocation78_spill] sm:$0xff] }
 0x34a   : >> { %v1260_v61 = vmul.f32 1.442695, %v1166_v62  ;;  %v4351_v45 = vpop.eup %3200  ;;  %3220 = vpow2.f32 %v1258_v28  ;;  %v1262_v35 = vmul.f32 1.442695, %v1167_v63  ;;  %v1361_v20 = vadd.f32 %v3197_v25, %v3195_v55  ;;  %v1114_v27 = vpop.xlane.xlu1 %1113 }
 0x34b   : >> { %v3203_v9 = vpop.eup %3202  ;;  %3222 = vpow2.f32 %v1292_v23  ;;  %v1184_v0 = vsub.f32 %v4223_v5, %v1114_v27  ;;  %v1185_v38 = vsub.f32 %v4225_v24, %v1114_v27  ;;  %v1388_v54 = vadd.f32 %v4351_v45, %v4349_v8  ;;  %2937 = vmatprep.subr.bf16.mxu0 %v2936_v3 }
 0x34c   : >> { %v3205_v10 = vpop.eup %3204  ;;  %3224 = vpow2.f32 %v1294_v58  ;;  %1362 = vadd.xlane.f32.xlu0 %v1361_v20  ;;  %v2952_v56 = vpack.c.bf16 %v4339_v44, %v4329_v60  ;;  %2939 = vmatpush1.bf16.msra.mxu0 %v2938_v16  ;;  %v5226_v58 = vld [vmem:[#allocation80_spill] sm:$0xff] }
 0x34d   : >> { %v4359_v53 = vpop.eup %3206  ;;  %3226 = vpow2.f32 %v1260_v61  ;;  %v1296_v17 = vmul.f32 1.442695, %v1184_v0  ;;  %v1298_v22 = vmul.f32 1.442695, %v1185_v38  ;;  %v1364_v1 = vadd.f32 %v3205_v10, %v3203_v9  ;;  %1389 = vadd.xlane.f32.xlu1 %v1388_v54 }
 0x34e   : >> { %v4361_v5 = vpop.eup %3208  ;;  %3228 = vpow2.f32 %v1262_v35  ;;  %v1117_v24 = vpop.xlane.xlu1 %1116  ;;  %v2958_v11 = vpack.c.bf16 %v4359_v53, %v4349_v8  ;;  %v5227_v35 = vld [vmem:[#allocation81_spill] sm:$0xff] }
 0x34f   : >> { %v3211_v7 = vpop.eup %3210  ;;  %3230 = vpow2.f32 %v1296_v17  ;;  %v1186_v19 = vsub.f32 %v5222_v40, %v1117_v24  ;;  %v1187_v48 = vsub.f32 %v5223_v49, %v1117_v24  ;;  %v1391_v43 = vadd.f32 %v4361_v5, %v4359_v53 }
 0x350   : >> { %v3213_v30 = vpop.eup %3212  ;;  %3232 = vpow2.f32 %v1298_v22  ;;  %1365 = vadd.xlane.f32.xlu0 %v1364_v1  ;;  %v2942_v13 = vpack.c.bf16 %v3211_v7, %v3203_v9  ;;  %v2956_v31 = vpack.c.bf16 %v4361_v5, %v4351_v45 }
 0x351   : >> { %v4371_v34 = vpop.eup %3214  ;;  %v1300_v32 = vmul.f32 1.442695, %v1186_v19  ;;  %v1302_v50 = vmul.f32 1.442695, %v1187_v48  ;;  %v2940_v52 = vpack.c.bf16 %v3213_v30, %v3205_v10  ;;  %v1367_v47 = vadd.f32 %v3213_v30, %v3211_v7  ;;  %1392 = vadd.xlane.f32.xlu1 %v1391_v43  ;;  %v5228_v7 = vld [vmem:[#allocation82_spill] sm:$0xff]  ;;  %v5229_v19 = vld [vmem:[#allocation83_spill] sm:$0xff] }
 0x352   : >> { %v4373_v57 = vpop.eup %3216  ;;  %v1120_v14 = vpop.xlane.xlu1 %1119 }
 0x353   : >> { %v3219_v46 = vpop.eup %3218  ;;  %3234 = vpow2.f32 %v1300_v32  ;;  %2941 = vmatprep.subr.bf16.mxu0 %v2940_v52  ;;  %v1188_v28 = vsub.f32 %v5224_v26, %v1120_v14  ;;  %v1189_v4 = vsub.f32 %v5225_v59, %v1120_v14  ;;  %v1394_v21 = vadd.f32 %v4373_v57, %v4371_v34  ;;  %v5231_v14 = vld [vmem:[#allocation85_spill] sm:$0xff] }
 0x354   : >> { %v3221_v55 = vpop.eup %3220  ;;  %3236 = vpow2.f32 %v1302_v50  ;;  %1368 = vadd.xlane.f32.xlu0 %v1367_v47  ;;  %2943 = vmatpush1.bf16.msra.mxu0 %v2942_v13  ;;  %v5230_v47 = vld [vmem:[#allocation84_spill] sm:$0xff] }
 0x355   : >> { %v4379_v37 = vpop.eup %3222  ;;  %v1304_v51 = vmul.f32 1.442695, %v1188_v28  ;;  %v1306_v62 = vmul.f32 1.442695, %v1189_v4  ;;  %v1370_v25 = vadd.f32 %v3221_v55, %v3219_v46  ;;  %1395 = vadd.xlane.f32.xlu1 %v1394_v21  ;;  %v5232_v21 = vld [vmem:[#allocation86_spill] sm:$0xff] }
 0x356   : >> { %v4381_v63 = vpop.eup %3224  ;;  %v1123_v15 = vpop.xlane.xlu1 %1122  ;;  %v2962_v16 = vpack.c.bf16 %v4379_v37, %v4371_v34 }
 0x357   : >> { %v3227_v23 = vpop.eup %3226  ;;  %3238 = vpow2.f32 %v1304_v51  ;;  %v1190_v61 = vsub.f32 %v5226_v58, %v1123_v15  ;;  %v1191_v3 = vsub.f32 %v5227_v35, %v1123_v15  ;;  %v1397_v20 = vadd.f32 %v4381_v63, %v4379_v37  ;;  %v5233_v51 = vld [vmem:[#allocation87_spill] sm:$0xff]  ;;  %v5234_v15 = vld [vmem:[#allocation88_spill] sm:$0xff] }
 0x358   : >> { %v3229_v27 = vpop.eup %3228  ;;  %3240 = vpow2.f32 %v1306_v62  ;;  %1371 = vadd.xlane.f32.xlu0 %v1370_v25  ;;  %v2946_v9 = vpack.c.bf16 %v3227_v23, %v3219_v46  ;;  %v2960_v0 = vpack.c.bf16 %v4381_v63, %v4373_v57 }
 0x359   : >> { %v4391_v38 = vpop.eup %3230  ;;  %v1308_v54 = vmul.f32 1.442695, %v1190_v61  ;;  %v1310_v10 = vmul.f32 1.442695, %v1191_v3  ;;  %v2944_v17 = vpack.c.bf16 %v3229_v27, %v3221_v55  ;;  %v1373_v22 = vadd.f32 %v3229_v27, %v3227_v23  ;;  %1398 = vadd.xlane.f32.xlu1 %v1397_v20 }
 0x35a   : >> { %v4393_v1 = vpop.eup %3232  ;;  %v1126_v24 = vpop.xlane.xlu1 %1125 }
 0x35b   : >> { %3242 = vpow2.f32 %v1308_v54  ;;  %2945 = vmatprep.subr.bf16.mxu0 %v2944_v17  ;;  %v1192_v40 = vsub.f32 %v5228_v7, %v1126_v24  ;;  %v1193_v49 = vsub.f32 %v5229_v19, %v1126_v24  ;;  %v1400_v48 = vadd.f32 %v4393_v1, %v4391_v38 }
 0x35c   : >> { %3244 = vpow2.f32 %v1310_v10  ;;  %1374 = vadd.xlane.f32.xlu0 %v1373_v22  ;;  %2947 = vmatpush1.bf16.msra.mxu0 %v2946_v9 }
 0x35d   : >> { %v3235_v43 = vpop.eup %3234  ;;  %v1312_v30 = vmul.f32 1.442695, %v1192_v40  ;;  %v1314_v13 = vmul.f32 1.442695, %v1193_v49  ;;  %2949 = vmatprep.subr.bf16.mxu0 %v2948_v6  ;;  %1401 = vadd.xlane.f32.xlu1 %v1400_v48 }
 0x35e   : >> { %v3237_v32 = vpop.eup %3236  ;;  %v1129_v50 = vpop.xlane.xlu1 %1128  ;;  %v2966_v52 = vpack.c.bf16 %v3235_v43, %v4391_v38 }
 0x35f   : >> { %3246 = vpow2.f32 %v1312_v30  ;;  %v1194_v57 = vsub.f32 %v5230_v47, %v1129_v50  ;;  %v1195_v46 = vsub.f32 %v5231_v14, %v1129_v50  ;;  %v1403_v26 = vadd.f32 %v3237_v32, %v3235_v43 }
 0x360   : >> { %3248 = vpow2.f32 %v1314_v13  ;;  %2951 = vmatpush1.bf16.msra.mxu0 %v2950_v29  ;;  %v2964_v28 = vpack.c.bf16 %v3237_v32, %v4393_v1 }
 0x361   : >> { %v3239_v33 = vpop.eup %3238  ;;  %v1316_v36 = vmul.f32 1.442695, %v1194_v57  ;;  %v1318_v6 = vmul.f32 1.442695, %v1195_v46  ;;  %2953 = vmatprep.subr.bf16.mxu0 %v2952_v56  ;;  %1404 = vadd.xlane.f32.xlu1 %v1403_v26  ;;  %v4428_v57 = vpop.f32.mrb[16].mxu0 }
 0x362   : >> { %v3241_v59 = vpop.eup %3240  ;;  %v1132_v4 = vpop.xlane.xlu1 %1131 }
 0x363   : >> { %3250 = vpow2.f32 %v1316_v36  ;;  %v1196_v55 = vsub.f32 %v5232_v21, %v1132_v4  ;;  %v1197_v62 = vsub.f32 %v5233_v51, %v1132_v4  ;;  %v1406_v25 = vadd.f32 %v3241_v59, %v3239_v33  ;;  %v4430_v46 = vpop.f32.mrb[17].mxu0 }
 0x364   : >> { %3252 = vpow2.f32 %v1318_v6  ;;  %2955 = vmatpush1.bf16.msra.mxu0 %v2954_v2  ;;  %v4432_v26 = vpop.f32.mrb[18].mxu0 }
 0x365   : >> { %v3243_v18 = vpop.eup %3242  ;;  %v1320_v41 = vmul.f32 1.442695, %v1196_v55  ;;  %v1322_v29 = vmul.f32 1.442695, %v1197_v62  ;;  %2957 = vmatprep.subr.bf16.mxu0 %v2956_v31  ;;  %1407 = vadd.xlane.f32.xlu1 %v1406_v25 }
 0x366   : >> { %v3245_v60 = vpop.eup %3244  ;;  %v1135_v44 = vpop.xlane.xlu1 %1134  ;;  %v2970_v56 = vpack.c.bf16 %v3243_v18, %v3239_v33 }
 0x367   : >> { %3254 = vpow2.f32 %v1320_v41  ;;  %v1198_v63 = vsub.f32 %v4263_v42, %v1135_v44  ;;  %v1199_v23 = vsub.f32 %v5234_v15, %v1135_v44  ;;  %v1409_v58 = vadd.f32 %v3245_v60, %v3243_v18  ;;  %v4434_v33 = vpop.f32.mrb[19].mxu0  ;;  %v5235_v15 = vld [vmem:[#allocation48_spill] sm:$0xff] }
 0x368   : >> { %3256 = vpow2.f32 %v1322_v29  ;;  %2959 = vmatpush1.bf16.msra.mxu0 %v2958_v11  ;;  %v2968_v12 = vpack.c.bf16 %v3245_v60, %v3241_v59  ;;  %v4436_v36 = vpop.f32.mrb[20].mxu0 }
 0x369   : >> { %v3247_v39 = vpop.eup %3246  ;;  %v1324_v2 = vmul.f32 1.442695, %v1198_v63  ;;  %v1326_v45 = vmul.f32 1.442695, %v1199_v23  ;;  %2961 = vmatprep.subr.bf16.mxu0 %v2960_v0  ;;  %1410 = vadd.xlane.f32.xlu1 %v1409_v58  ;;  %v4438_v59 = vpop.f32.mrb[21].mxu0  ;;  %v5236_v23 = vld [vmem:[#allocation44_spill] sm:$0xff] }
 0x36a   : >> { %v3249_v5 = vpop.eup %3248  ;;  %v4440_v4 = vpop.f32.mrb[22].mxu0  ;;  %v5237_v58 = vld [vmem:[#allocation46_spill] sm:$0xff] }
 0x36b   : >> { %3258 = vpow2.f32 %v1324_v2  ;;  %v1412_v31 = vadd.f32 %v3249_v5, %v3247_v39  ;;  %v4442_v55 = vpop.f32.mrb[23].mxu0 }
 0x36c   : >> { %3260 = vpow2.f32 %v1326_v45  ;;  %2963 = vmatpush1.bf16.msra.mxu0 %v2962_v16  ;;  %v4444_v51 = vpop.f32.mrb[24].mxu0 }
 0x36d   : >> { %v3251_v42 = vpop.eup %3250  ;;  %2965 = vmatprep.subr.bf16.mxu0 %v2964_v28  ;;  %1413 = vadd.xlane.f32.xlu1 %v1412_v31  ;;  %v4446_v25 = vpop.f32.mrb[25].mxu0 }
 0x36e   : >> { %v3253_v61 = vpop.eup %3252  ;;  %v2974_v8 = vpack.c.bf16 %v3251_v42, %v3247_v39  ;;  %v5239_v39 = vld [vmem:[#allocation54_spill] sm:$0xff]  ;;  %v693_v2 = vpop.f32.mrb[26].mxu0 }
 0x36f   : >> { %v1415_v53 = vadd.f32 %v3253_v61, %v3251_v42  ;;  %v2972_v11 = vpack.c.bf16 %v3253_v61, %v3249_v5  ;;  %v695_v45 = vpop.f32.mrb[27].mxu0  ;;  %v5240_v5 = vld [vmem:[#allocation49_spill] sm:$0xff]  ;;  %v5241_v61 = vld [vmem:[#allocation50_spill] sm:$0xff] }
 0x370   : >> { %2967 = vmatpush1.bf16.msra.mxu0 %v2966_v52  ;;  %v699_v31 = vpop.f32.mrb[28].mxu0 }
 0x371   : >> { %v3255_v35 = vpop.eup %3254  ;;  %2969 = vmatprep.subr.bf16.mxu0 %v2968_v12  ;;  %1416 = vadd.xlane.f32.xlu1 %v1415_v53  ;;  %v5238_v12 = vld [vmem:[#allocation52_spill] sm:$0xff]  ;;  %v701_v42 = vpop.f32.mrb[29].mxu0 }
 0x372   : >> { %v3257_v3 = vpop.eup %3256 }
 0x373   : >> { %v1418_v20 = vadd.f32 %v3257_v3, %v3255_v35 }
 0x374   : >> { %2971 = vmatpush1.bf16.msra.mxu0 %v2970_v56 }
 0x375   : >> { %v3259_v27 = vpop.eup %3258  ;;  %2973 = vmatprep.subr.bf16.mxu0 %v2972_v11  ;;  %1419 = vadd.xlane.f32.xlu1 %v1418_v20  ;;  %v5242_v11 = vld [vmem:[#allocation51_spill] sm:$0xff]  ;;  %v5245_v20 = vld [vmem:[#allocation53_spill] sm:$0xff] }
 0x376   : >> { %v3261_v9 = vpop.eup %3260  ;;  %v2978_v34 = vpack.c.bf16 %v3259_v27, %v3255_v35  ;;  %v5243_v35 = vld [vmem:[#allocation45_spill] sm:$0xff] }
 0x377   : >> { %v1421_v37 = vadd.f32 %v3261_v9, %v3259_v27  ;;  %v2976_v16 = vpack.c.bf16 %v3261_v9, %v3257_v3  ;;  %v5244_v3 = vld [vmem:[#allocation47_spill] sm:$0xff] }
 0x378   : >> { %2975 = vmatpush1.bf16.msra.mxu0 %v2974_v8  ;;  %v705_v8 = vpop.f32.mrb[30].mxu0  ;;  %v5246_v27 = vld [vmem:[#allocation55_spill] sm:$0xff] }
 0x379   : >> { %2977 = vmatprep.subr.bf16.mxu0 %v2976_v16  ;;  %1422 = vadd.xlane.f32.xlu1 %v1421_v37  ;;  %v707_v53 = vpop.f32.mrb[31].mxu0  ;;  %v3565_v37 = vmov 1966171168  }
 0x37a   : >> { %v1645_v16 = vunpack.c.l.s4 %v3565_v37  ;;  %v5255_v37 = vld [vmem:[#allocation64_spill] sm:$0xff] }
 0x37c   : >> { %2979 = vmatpush1.bf16.msra.mxu0 %v2978_v34 }
 0x38a   : >> { %v1330_v0 = vpop.xlane.xlu0 %1329 }
 0x38b   : >> { %1424 = vxpose.xlu0.b32.start [1/16] (narrow) %v1330_v0, 8  ;;  %v1647_v0 = vlaneseq }
 0x38d   : >> { %vm4467_vm5 = vcmp.lt.s32.totalorder %v1647_v0, 256 }
 0x38e   : >> { %v1333_v38 = vpop.xlane.xlu0 %1332 }
 0x38f   : >> { %1425 = vxpose.xlu0.b32.cont [2/16] (narrow) %v1333_v38, 8 }
 0x392   : >> { %v1336_v54 = vpop.xlane.xlu0 %1335 }
 0x393   : >> { %1426 = vxpose.xlu0.b32.cont [3/16] (narrow) %v1336_v54, 8 }
 0x397   : >> { %v1339_v10 = vpop.xlane.xlu0 %1338 }
 0x398   : >> { %1427 = vxpose.xlu0.b32.cont [4/16] (narrow) %v1339_v10, 8  ;;  %v1646_v10 = vunpack.c.0.s8 %v1645_v16  ;;  %v5256_v16 = vld [vmem:[#allocation65_spill] sm:$0xff] }
 0x39b   : >> { %v1342_v17 = vpop.xlane.xlu0 %1341 }
 0x39c   : >> { %1428 = vxpose.xlu0.b32.cont [5/16] (narrow) %v1342_v17, 8  ;;  %v1648_v17 = vshrl.u32 %v1647_v0, 7  ;;  %v5257_v0 = vld [vmem:[#allocation66_spill] sm:$0xff] }
 0x39f   : >> { %v1345_v22 = vpop.xlane.xlu0 %1344 }
 0x3a0   : >> { %1429 = vxpose.xlu0.b32.cont [6/16] (narrow) %v1345_v22, 8 }
 0x3a3   : >> { %v1348_v1 = vpop.xlane.xlu0 %1347 }
 0x3a4   : >> { %1430 = vxpose.xlu0.b32.cont [7/16] (narrow) %v1348_v1, 8 }
 0x3a7   : >> { %v1351_v24 = vpop.xlane.xlu0 %1350 }
 0x3a8   : >> { %1431 = vxpose.xlu0.b32.cont [8/16] (narrow) %v1351_v24, 8 }
 0x3ab   : >> { %v1354_v7 = vpop.xlane.xlu0 %1353 }
 0x3ac   : >> { %1432 = vxpose.xlu0.b32.cont [9/16] (narrow) %v1354_v7, 8  ;;  %v4460_v7 = vsub.s32 %v1646_v10, %v1648_v17 }
 0x3ae   : >> { %5247 = vst [vmem:[#allocation76_spill] sm:$0xff] %v4460_v7 }
 0x3af   : >> { %v1357_v40 = vpop.xlane.xlu0 %1356 }
 0x3b0   : >> { %1433 = vxpose.xlu0.b32.cont [10/16] (narrow) %v1357_v40, 8 }
 0x3ca   : >> { %v1378_v19 = vpop.xlane.xlu1 %1377 }
 0x3cb   : >> { %1456 = vxpose.xlu1.b32.start [1/16] (narrow) %v1378_v19, 8 }
 0x3ce   : >> { %v1381_v49 = vpop.xlane.xlu1 %1380 }
 0x3cf   : >> { %1457 = vxpose.xlu1.b32.cont [2/16] (narrow) %v1381_v49, 8 }
 0x3d2   : >> { %v1384_v48 = vpop.xlane.xlu1 %1383 }
 0x3d3   : >> { %1458 = vxpose.xlu1.b32.cont [3/16] (narrow) %v1384_v48, 8  ;;  %v5248_v48 = vmov 0 }
 0x3d4   : >> { %v1360_v43 = vpop.xlane.xlu0 %1359  ;;  %v5249_v48 = vsel %vm4467_vm5, 4294967295, %v5248_v48 }
 0x3d5   : >> { %1434 = vxpose.xlu0.b32.cont [11/16] (narrow) %v1360_v43, 8  ;;  %5250 = vst [vmem:[#allocation77_spill] sm:$0xff] %v5249_v48 }
 0x3d6   : >> { %v1387_v30 = vpop.xlane.xlu1 %1386 }
 0x3d7   : >> { %1459 = vxpose.xlu1.b32.cont [4/16] (narrow) %v1387_v30, 8 }
 0x3d9   : >> { %v1363_v13 = vpop.xlane.xlu0 %1362 }
 0x3da   : >> { %1435 = vxpose.xlu0.b32.cont [12/16] (narrow) %v1363_v13, 8  ;;  %v1390_v32 = vpop.xlane.xlu1 %1389 }
 0x3db   : >> { %1460 = vxpose.xlu1.b32.cont [5/16] (narrow) %v1390_v32, 8 }
 0x3dd   : >> { %v1366_v50 = vpop.xlane.xlu0 %1365 }
 0x3de   : >> { %1436 = vxpose.xlu0.b32.cont [13/16] (narrow) %v1366_v50, 8  ;;  %v1393_v52 = vpop.xlane.xlu1 %1392 }
 0x3df   : >> { %1461 = vxpose.xlu1.b32.cont [6/16] (narrow) %v1393_v52, 8  ;;  %v5251_v52 = vld [vmem:[#allocation60_spill] sm:$0xff] }
 0x3e1   : >> { %v1369_v47 = vpop.xlane.xlu0 %1368 }
 0x3e2   : >> { %1437 = vxpose.xlu0.b32.cont [14/16] (narrow) %v1369_v47, 8  ;;  %v1396_v14 = vpop.xlane.xlu1 %1395 }
 0x3e3   : >> { %1462 = vxpose.xlu1.b32.cont [7/16] (narrow) %v1396_v14, 8 }
 0x3e5   : >> { %v1372_v28 = vpop.xlane.xlu0 %1371 }
 0x3e6   : >> { %1438 = vxpose.xlu0.b32.cont [15/16] (narrow) %v1372_v28, 8  ;;  %v1399_v6 = vpop.xlane.xlu1 %1398 }
 0x3e7   : >> { %1463 = vxpose.xlu1.b32.cont [8/16] (narrow) %v1399_v6, 8 }
 0x3e9   : >> { %v1375_v21 = vpop.xlane.xlu0 %1374 }
 0x3ea   : >> { %1439 = vxpose.xlu0.b32.end [16/16] (narrow) %v1375_v21, 8  ;;  %v1402_v62 = vpop.xlane.xlu1 %1401 }
 0x3eb   : >> { %1464 = vxpose.xlu1.b32.cont [9/16] (narrow) %v1402_v62, 8 }
 0x3ee   : >> { %v1405_v18 = vpop.xlane.xlu1 %1404 }
 0x3ef   : >> { %1465 = vxpose.xlu1.b32.cont [10/16] (narrow) %v1405_v18, 8 }
 0x3f2   : >> { %v1408_v41 = vpop.xlane.xlu1 %1407 }
 0x3f3   : >> { %1466 = vxpose.xlu1.b32.cont [11/16] (narrow) %v1408_v41, 8 }
 0x3f6   : >> { %v1411_v29 = vpop.xlane.xlu1 %1410 }
 0x3f7   : >> { %1467 = vxpose.xlu1.b32.cont [12/16] (narrow) %v1411_v29, 8 }
 0x3fa   : >> { %v1414_v60 = vpop.xlane.xlu1 %1413 }
 0x3fb   : >> { %1468 = vxpose.xlu1.b32.cont [13/16] (narrow) %v1414_v60, 8 }
 0x3fe   : >> { %v1417_v44 = vpop.xlane.xlu1 %1416 }
 0x3ff   : >> { %1469 = vxpose.xlu1.b32.cont [14/16] (narrow) %v1417_v44, 8 }
 0x402   : >> { %v1420_v56 = vpop.xlane.xlu1 %1419 }
 0x403   : >> { %1470 = vxpose.xlu1.b32.cont [15/16] (narrow) %v1420_v56, 8 }
 0x406   : >> { %v1423_v63 = vpop.xlane.xlu1 %1422 }
 0x407   : >> { %1471 = vxpose.xlu1.b32.end [16/16] (narrow) %v1423_v63, 8 }
 0x413   : >> { %411 = vperm.xlu0 %3132, %v5235_v15  }
 0x417   : >> { %391 = vperm.xlu0 %3132, %v5236_v23  }
 0x41b   : >> { %401 = vperm.xlu0 %3132, %v5237_v58  }
 0x41f   : >> { %431 = vperm.xlu0 %3132, %v5238_v12  }
 0x423   : >> { %441 = vperm.xlu0 %3132, %v5239_v39  }
 0x425   : >> { %416 = vperm.xlu1 %3133, %v5240_v5  }
 0x429   : >> { %421 = vperm.xlu1 %3133, %v5241_v61  }
 0x42d   : >> { %426 = vperm.xlu1 %3133, %v5242_v11   ;;  %v5252_v11 = vld [vmem:[#allocation61_spill] sm:$0xff] }
 0x42e   : >> { %v1440_v9 = vpop.trf.xlu0 }
 0x42f   : >> { %3262 = vrcp.f32 %v1440_v9 }
 0x431   : >> { %396 = vperm.xlu1 %3133, %v5243_v35   ;;  %v5253_v35 = vld [vmem:[#allocation62_spill] sm:$0xff] }
 0x435   : >> { %406 = vperm.xlu1 %3133, %v5244_v3  }
 0x439   : >> { %436 = vperm.xlu1 %3133, %v5245_v20   ;;  %v3263_v38 = vpop.eup %3262  ;;  %v5254_v20 = vld [vmem:[#allocation63_spill] sm:$0xff] }
 0x43a   : >> { %v1634_v54 = vmul.f32 %v3263_v38, %v1440_v9 }
 0x43c   : >> { %v1636_v24 = vmul.f32 0.00390625, %v1634_v54  ;;  %v5258_v54 = vld [vmem:[#allocation67_spill] sm:$0xff] }
 0x43d   : >> { %446 = vperm.xlu1 %3133, %v5246_v27  }
 0x44b   : >> { %v1472_v34 = vpop.trf.xlu1 }
 0x44c   : >> { %3264 = vrcp.f32 %v1472_v34 }
 0x456   : >> { %v3265_v22 = vpop.eup %3264 }
 0x457   : >> { %v1635_v1 = vmul.f32 %v3265_v22, %v1472_v34  ;;  %1556 = vmatprep.mubr.f32.mxu0 %v3265_v22 }
 0x458   : >> { %1557 = vmatmul.mubr.f32.vlgmr.msra.gmra.mrb[32].mxu0 %v3263_v38 }
 0x459   : >> { %v1637_v40 = vmul.f32 0.00390625, %v1635_v1 }
 0x45b   : >> { %v1643_v19 = vcombine.low %v1636_v24, %v1637_v40  ;;  %v5259_v40 = vmov 0  }
 0x45d   : >> { %v1650_v49 = vrot.slane %v1643_v19, %v4460_v7 }
 0x45f   : >> { %v1657_v43 = vrot.slane %v1650_v49, %v4460_v7 }
 0x461   : >> { %1665 = vst.msk [vmem:[%s1660_s12] sm:$0x3] %vm4467_vm5, %v1657_v43  ;;  %s4906_s12 = scalar_lea.hbm (%p338_p11), %s5069_s4, %s2904_s17 }
 0x492   : >> { %v412_v30 = vpop.permute.xlu0 %411 }
 0x493   : >> { %v688_v28 = vadd.f32 %v4444_v51, %v412_v30  ;;  %v690_v6 = vadd.f32 %v4446_v25, %v412_v30 }
 0x496   : >> { %v392_v13 = vpop.permute.xlu0 %391 }
 0x497   : >> { %v664_v12 = vadd.f32 %v4428_v57, %v392_v13  ;;  %v666_v51 = vadd.f32 %v4430_v46, %v392_v13 }
 0x49a   : >> { %v402_v32 = vpop.permute.xlu0 %401 }
 0x49e   : >> { %v432_v50 = vpop.permute.xlu0 %431 }
 0x49f   : >> { %v712_v47 = vadd.f32 %v5251_v52, %v432_v50 }
 0x4a2   : >> { %v442_v9 = vpop.permute.xlu0 %441 }
 0x4a4   : >> { %v417_v14 = vpop.permute.xlu1 %416 }
 0x4a5   : >> { %v694_v21 = vadd.f32 %v693_v2, %v417_v14  ;;  %v696_v62 = vadd.f32 %v695_v45, %v417_v14 }
 0x4a7   : >> { %v1666_v18 = vpack.c.bf16 %v694_v21, %v688_v28  ;;  %v1667_v41 = vpack.c.bf16 %v696_v62, %v690_v6 }
 0x4a8   : >> { %v422_v29 = vpop.permute.xlu1 %421 }
 0x4a9   : >> { %1690 = vxpose.xlu1.c.b16.start [1/2] (short) %v1667_v41, 128  ;;  %1674 = vxpose.xlu0.c.b16.start [1/2] (short) %v1666_v18, 128  ;;  %v700_v44 = vadd.f32 %v699_v31, %v422_v29  ;;  %v702_v56 = vadd.f32 %v701_v42, %v422_v29  ;;  %v676_v31 = vadd.f32 %v4436_v36, %v402_v32 }
 0x4aa   : >> { %v678_v42 = vadd.f32 %v4438_v59, %v402_v32 }
 0x4ac   : >> { %v427_v60 = vpop.permute.xlu1 %426 }
 0x4ad   : >> { %v706_v63 = vadd.f32 %v705_v8, %v427_v60  ;;  %v708_v15 = vadd.f32 %v707_v53, %v427_v60 }
 0x4af   : >> { %v1668_v23 = vpack.c.bf16 %v706_v63, %v700_v44  ;;  %v1669_v58 = vpack.c.bf16 %v708_v15, %v702_v56 }
 0x4b0   : >> { %v397_v39 = vpop.permute.xlu1 %396 }
 0x4b1   : >> { %v670_v25 = vadd.f32 %v4432_v26, %v397_v39  ;;  %v672_v2 = vadd.f32 %v4434_v33, %v397_v39  ;;  %1691 = vxpose.xlu1.c.b16.end [2/2] (short) %v1669_v58, 128  ;;  %1675 = vxpose.xlu0.c.b16.end [2/2] (short) %v1668_v23, 128  ;;  %v714_v33 = vadd.f32 %v5252_v11, %v432_v50 }
 0x4b3   : >> { %v2980_v45 = vpack.c.bf16 %v672_v2, %v666_v51  ;;  %v2982_v5 = vpack.c.bf16 %v670_v25, %v664_v12 }
 0x4b4   : >> { %v407_v61 = vpop.permute.xlu1 %406 }
 0x4b5   : >> { %v682_v8 = vadd.f32 %v4440_v4, %v407_v61  ;;  %v684_v57 = vadd.f32 %v4442_v55, %v407_v61  ;;  %2981 = vmatprep.subr.bf16.mxu0 %v2980_v45  ;;  %v724_v4 = vadd.f32 %v5255_v37, %v442_v9  ;;  %v726_v55 = vadd.f32 %v5256_v16, %v442_v9 }
 0x4b6   : >> { %2983 = vmatpush1.bf16.xpose.msra.mxu0 %v2982_v5 }
 0x4b7   : >> { %v2984_v46 = vpack.c.bf16 %v684_v57, %v678_v42  ;;  %v2986_v53 = vpack.c.bf16 %v682_v8, %v676_v31 }
 0x4b8   : >> { %v437_v26 = vpop.permute.xlu1 %436 }
 0x4b9   : >> { %v718_v3 = vadd.f32 %v5253_v35, %v437_v26  ;;  %v720_v27 = vadd.f32 %v5254_v20, %v437_v26  ;;  %2985 = vmatprep.subr.bf16.mxu0 %v2984_v46 }
 0x4bb   : >> { %v1670_v36 = vpack.c.bf16 %v718_v3, %v712_v47  ;;  %v1671_v34 = vpack.c.bf16 %v720_v27, %v714_v33 }
 0x4bc   : >> { %v447_v59 = vpop.permute.xlu1 %446 }
 0x4bd   : >> { %v730_v38 = vadd.f32 %v5257_v0, %v447_v59  ;;  %v732_v10 = vadd.f32 %v5258_v54, %v447_v59 }
 0x4be   : >> { %2987 = vmatpush1.bf16.xpose.msra.mxu0 %v2986_v53 }
 0x4bf   : >> { %v1672_v17 = vpack.c.bf16 %v730_v38, %v724_v4  ;;  %v1673_v22 = vpack.c.bf16 %v732_v10, %v726_v55  ;;  %1754 = vmatprep.subr.bf16.mxu0 %v1671_v34 }
 0x513   : >> { %v1682_v19 = vpop.trf.xlu0  ;;  %v1698_v47 = vpop.trf.xlu1 }
 0x517   : >> { %v1683_v49 = vpop.trf.xlu0  ;;  %v1699_v14 = vpop.trf.xlu1 }
 0x51b   : >> { %v1684_v43 = vpop.trf.xlu0  ;;  %v1700_v28 = vpop.trf.xlu1 }
 0x51f   : >> { %v1685_v30 = vpop.trf.xlu0  ;;  %v1701_v6 = vpop.trf.xlu1 }
 0x523   : >> { %v1686_v13 = vpop.trf.xlu0  ;;  %v1702_v21 = vpop.trf.xlu1 }
 0x527   : >> { %v1687_v32 = vpop.trf.xlu0  ;;  %v1703_v62 = vpop.trf.xlu1 }
 0x52b   : >> { %v1558_v1 = vpop.f32.mrb[32].mxu0  ;;  %v1688_v50 = vpop.trf.xlu0 }
 0x52c   : >> { %v1560_v24 = vpop.f32.mrb[33].mxu0  ;;  %v1704_v18 = vpop.trf.xlu1 }
 0x52d   : >> { %1627 = vmatprep.mubr.f32.mxu0 %v1560_v24 }
 0x52e   : >> { %1628 = vmatmul.mubr.f32.vlgmr.msra.gmra.mrb[34].mxu0 %v1558_v1 }
 0x52f   : >> { %1755 = vmatpush1.bf16.msra.mxu0 %v1670_v36  ;;  %1786 = vmatprep.mubr.bf16.mxu0 %v5259_v40  ;;  %v1689_v52 = vpop.trf.xlu0 }
 0x530   : >> { %1756 = vmatprep.subr.bf16.mxu0 %v1673_v22  ;;  %v1705_v41 = vpop.trf.xlu1 }
 0x533   : >> { %1757 = vmatpush1.bf16.msra.mxu0 %v1672_v17 }
 0x536   : >> { %2870 = vmatmul.mubr.msk.bf16.vlgmr.msra.gmra.mrb[36].mxu0 %vm798_vm4, %v1682_v19 }
 0x537   : >> { %1796 = vmatprep.mubr.bf16.mxu0 %v5259_v40 }
 0x53e   : >> { %2871 = vmatmul.mubr.msk.bf16.gmra.mrb[40].mxu0 %vm798_vm4, %v1683_v49 }
 0x53f   : >> { %1806 = vmatprep.mubr.bf16.mxu0 %v5259_v40 }
 0x546   : >> { %2872 = vmatmul.mubr.msk.bf16.gmra.mrb[44].mxu0 %vm798_vm4, %v1684_v43 }
 0x547   : >> { %1816 = vmatprep.mubr.bf16.mxu0 %v5259_v40 }
 0x54e   : >> { %2873 = vmatmul.mubr.msk.bf16.gmra.mrb[48].mxu0 %vm798_vm4, %v1685_v30 }
 0x54f   : >> { %1826 = vmatprep.mubr.bf16.mxu0 %v5259_v40 }
 0x556   : >> { %2874 = vmatmul.mubr.msk.bf16.gmra.mrb[52].mxu0 %vm798_vm4, %v1686_v13 }
 0x557   : >> { %1836 = vmatprep.mubr.bf16.mxu0 %v5259_v40 }
 0x55e   : >> { %2875 = vmatmul.mubr.msk.bf16.gmra.mrb[56].mxu0 %vm798_vm4, %v1687_v32 }
 0x55f   : >> { %1846 = vmatprep.mubr.bf16.mxu0 %v5259_v40 }
 0x566   : >> { %2876 = vmatmul.mubr.msk.bf16.gmra.mrb[60].mxu0 %vm798_vm4, %v1688_v50 }
 0x567   : >> { %1856 = vmatprep.mubr.bf16.mxu0 %v5259_v40 }
 0x56e   : >> { %2877 = vmatmul.mubr.msk.bf16.gmra.mrb[64].mxu0 %vm798_vm4, %v1689_v52 }
 0x56f   : >> { %1866 = vmatprep.mubr.bf16.mxu0 %v5259_v40 }
 0x576   : >> { %2878 = vmatmul.mubr.msk.bf16.gmra.mrb[68].mxu0 %vm798_vm4, %v1698_v47 }
 0x577   : >> { %1876 = vmatprep.mubr.bf16.mxu0 %v5259_v40 }
 0x57e   : >> { %2879 = vmatmul.mubr.msk.bf16.gmra.mrb[72].mxu0 %vm798_vm4, %v1699_v14 }
 0x57f   : >> { %1886 = vmatprep.mubr.bf16.mxu0 %v5259_v40 }
 0x586   : >> { %2880 = vmatmul.mubr.msk.bf16.gmra.mrb[76].mxu0 %vm798_vm4, %v1700_v28 }
 0x587   : >> { %1896 = vmatprep.mubr.bf16.mxu0 %v5259_v40 }
 0x58e   : >> { %2881 = vmatmul.mubr.msk.bf16.gmra.mrb[80].mxu0 %vm798_vm4, %v1701_v6 }
 0x58f   : >> { %1906 = vmatprep.mubr.bf16.mxu0 %v5259_v40 }
 0x596   : >> { %2882 = vmatmul.mubr.msk.bf16.gmra.mrb[84].mxu0 %vm798_vm4, %v1702_v21 }
 0x597   : >> { %1916 = vmatprep.mubr.bf16.mxu0 %v5259_v40 }
 0x59e   : >> { %2883 = vmatmul.mubr.msk.bf16.gmra.mrb[88].mxu0 %vm798_vm4, %v1703_v62 }
 0x59f   : >> { %1926 = vmatprep.mubr.bf16.mxu0 %v5259_v40 }
 0x5a6   : >> { %2884 = vmatmul.mubr.msk.bf16.gmra.mrb[92].mxu0 %vm798_vm4, %v1704_v18 }
 0x5a7   : >> { %1936 = vmatprep.mubr.bf16.mxu0 %v5259_v40 }
 0x5ae   : >> { %2885 = vmatmul.mubr.msk.bf16.gmra.mrb[96].mxu0 %vm798_vm4, %v1705_v41 }
 0x601   : >> { %v1629_v29 = vpop.f32.mrb[34].mxu0 }
 0x602   : >> { %v1633_v60 = vmul.f32 0.00390625, %v1629_v29  ;;  %v1631_v44 = vpop.f32.mrb[35].mxu0 }
 0x604   : >> { %1640 = vst.msk [vmem:[%s1638_s13] sm:$0x1] %vm1639_vm6, %v1633_v60  ;;  %s2612_s13 = sshll.u32 (%p338_p11), %s3916_s26, 4  ;;  %s3404_s26 = scalar_lea.vmem (%p338_p11), %s3403_s11, 64  ;;  %s4909_s13 = int_to_ptr.vmem [resolvable:$true] %s2612_s13 }
 0x605   : > { %s3398_s0 = scalar_lea.vmem (%p338_p11), %s4909_s13, 32  ;;  %p3405_p1 = scmp.lt.s32.totalorder (%p338_p11), %s4909_s13, %s3403_s11 }
 0x606   : > { %p3399_p12 = scmp.ne.s32.totalorder (%p338_p11), %s4909_s13, %s3398_s0  ;;  %p3406_p2 = scmp.lt.s32.totalorder (%p338_p11), %s3404_s26, %s3398_s0 }
 0x608   : > { %p3400_p13 = pnand (%p338_p11), %p3399_p12, %p3649_p5  ;;  %p3407_p3 = por (%p338_p11), %p3406_p2, %p3405_p1 }
 0x609   : >> { %v4527_v56 = vpop.f32.mrb[36].mxu0 }
 0x60a   : >> { %v4529_v63 = vpop.f32.mrb[37].mxu0  ;;  %p3401_p0 = pneg (%p338_p11), %p3400_p13 }
 0x60b   : >> { %v1947_v15 = vmax.f32 %v4527_v56, %v4529_v63  ;;  %v4533_v23 = vpop.f32.mrb[38].mxu0 }
 0x60c   : >> { %v4535_v58 = vpop.f32.mrb[39].mxu0  ;;  %p3408_p4 = pnand (%p338_p11), %p3407_p3, %p3401_p0 }
 0x60d   : >> { %v1950_v12 = vmax.f32 %v4533_v23, %v4535_v58  ;;  %1948 = vmax.xlane.f32.xlu1 %v1947_v15 }
 0x60f   : >> { %1951 = vmax.xlane.f32.xlu0 %v1950_v12 }
 0x611   : >> { %v4539_v39 = vpop.f32.mrb[40].mxu0 }
 0x612   : >> { %v4541_v51 = vpop.f32.mrb[41].mxu0 }
 0x613   : >> { %v1953_v25 = vmax.f32 %v4539_v39, %v4541_v51  ;;  %v4545_v2 = vpop.f32.mrb[42].mxu0 }
 0x614   : >> { %v4547_v45 = vpop.f32.mrb[43].mxu0 }
 0x615   : >> { %v1956_v5 = vmax.f32 %v4545_v2, %v4547_v45  ;;  %1954 = vmax.xlane.f32.xlu0 %v1953_v25 }
 0x619   : >> { %1957 = vmax.xlane.f32.xlu0 %v1956_v5  ;;  %v4551_v61 = vpop.f32.mrb[44].mxu0 }
 0x61a   : >> { %v4553_v31 = vpop.f32.mrb[45].mxu0 }
 0x61b   : >> { %v1959_v42 = vmax.f32 %v4551_v61, %v4553_v31  ;;  %v4557_v8 = vpop.f32.mrb[46].mxu0 }
 0x61c   : >> { %v4559_v57 = vpop.f32.mrb[47].mxu0 }
 0x61d   : >> { %v1962_v46 = vmax.f32 %v4557_v8, %v4559_v57  ;;  %1960 = vmax.xlane.f32.xlu0 %v1959_v42 }
 0x621   : >> { %1963 = vmax.xlane.f32.xlu0 %v1962_v46  ;;  %v4563_v53 = vpop.f32.mrb[48].mxu0 }
 0x622   : >> { %v4565_v26 = vpop.f32.mrb[49].mxu0 }
 0x623   : >> { %v1965_v11 = vmax.f32 %v4563_v53, %v4565_v26  ;;  %v4569_v33 = vpop.f32.mrb[50].mxu0 }
 0x624   : >> { %v4571_v35 = vpop.f32.mrb[51].mxu0 }
 0x625   : >> { %v1968_v3 = vmax.f32 %v4569_v33, %v4571_v35  ;;  %1966 = vmax.xlane.f32.xlu0 %v1965_v11 }
 0x629   : >> { %1969 = vmax.xlane.f32.xlu0 %v1968_v3  ;;  %v4575_v20 = vpop.f32.mrb[52].mxu0 }
 0x62a   : >> { %v4577_v27 = vpop.f32.mrb[53].mxu0 }
 0x62b   : >> { %v1971_v9 = vmax.f32 %v4575_v20, %v4577_v27  ;;  %v4581_v36 = vpop.f32.mrb[54].mxu0 }
 0x62c   : >> { %v4583_v34 = vpop.f32.mrb[55].mxu0 }
 0x62d   : >> { %v1974_v59 = vmax.f32 %v4581_v36, %v4583_v34  ;;  %1972 = vmax.xlane.f32.xlu0 %v1971_v9 }
 0x631   : >> { %1975 = vmax.xlane.f32.xlu0 %v1974_v59  ;;  %v4587_v37 = vpop.f32.mrb[56].mxu0 }
 0x632   : >> { %v4589_v4 = vpop.f32.mrb[57].mxu0 }
 0x633   : >> { %v1977_v16 = vmax.f32 %v4587_v37, %v4589_v4  ;;  %v4593_v55 = vpop.f32.mrb[58].mxu0 }
 0x634   : >> { %v4595_v0 = vpop.f32.mrb[59].mxu0 }
 0x635   : >> { %v1980_v38 = vmax.f32 %v4593_v55, %v4595_v0 }
 0x639   : >> { %v4599_v54 = vpop.f32.mrb[60].mxu0 }
 0x63a   : >> { %v4601_v10 = vpop.f32.mrb[61].mxu0 }
 0x63b   : >> { %v1983_v17 = vmax.f32 %v4599_v54, %v4601_v10  ;;  %v4605_v22 = vpop.f32.mrb[62].mxu0 }
 0x63c   : >> { %v4607_v1 = vpop.f32.mrb[63].mxu0 }
 0x63d   : >> { %v1986_v24 = vmax.f32 %v4605_v22, %v4607_v1 }
 0x641   : >> { %v4611_v40 = vpop.f32.mrb[64].mxu0 }
 0x642   : >> { %v4613_v19 = vpop.f32.mrb[65].mxu0 }
 0x643   : >> { %v1989_v49 = vmax.f32 %v4611_v40, %v4613_v19  ;;  %v4617_v43 = vpop.f32.mrb[66].mxu0 }
 0x644   : >> { %v4619_v30 = vpop.f32.mrb[67].mxu0 }
 0x645   : >> { %v1992_v13 = vmax.f32 %v4617_v43, %v4619_v30 }
 0x649   : >> { %v4623_v32 = vpop.f32.mrb[68].mxu0 }
 0x64a   : >> { %v4625_v50 = vpop.f32.mrb[69].mxu0 }
 0x64b   : >> { %v1995_v52 = vmax.f32 %v4623_v32, %v4625_v50  ;;  %v4629_v47 = vpop.f32.mrb[70].mxu0 }
 0x64c   : >> { %v4631_v14 = vpop.f32.mrb[71].mxu0 }
 0x64d   : >> { %v1998_v28 = vmax.f32 %v4629_v47, %v4631_v14  ;;  %1996 = vmax.xlane.f32.xlu0 %v1995_v52 }
 0x651   : >> { %1999 = vmax.xlane.f32.xlu0 %v1998_v28  ;;  %v4635_v6 = vpop.f32.mrb[72].mxu0 }
 0x652   : >> { %v4637_v21 = vpop.f32.mrb[73].mxu0 }
 0x653   : >> { %v2001_v62 = vmax.f32 %v4635_v6, %v4637_v21  ;;  %v4641_v18 = vpop.f32.mrb[74].mxu0 }
 0x654   : >> { %v4643_v41 = vpop.f32.mrb[75].mxu0 }
 0x655   : >> { %v2004_v29 = vmax.f32 %v4641_v18, %v4643_v41  ;;  %1978 = vmax.xlane.f32.xlu0 %v1977_v16  ;;  %2002 = vmax.xlane.f32.xlu1 %v2001_v62 }
 0x659   : >> { %1981 = vmax.xlane.f32.xlu0 %v1980_v38  ;;  %2005 = vmax.xlane.f32.xlu1 %v2004_v29  ;;  %v4647_v60 = vpop.f32.mrb[76].mxu0 }
 0x65a   : >> { %v4649_v44 = vpop.f32.mrb[77].mxu0 }
 0x65b   : >> { %v2007_v15 = vmax.f32 %v4647_v60, %v4649_v44  ;;  %v4653_v12 = vpop.f32.mrb[78].mxu0 }
 0x65c   : >> { %v4655_v25 = vpop.f32.mrb[79].mxu0 }
 0x65d   : >> { %v2010_v5 = vmax.f32 %v4653_v12, %v4655_v25  ;;  %1984 = vmax.xlane.f32.xlu0 %v1983_v17  ;;  %2008 = vmax.xlane.f32.xlu1 %v2007_v15 }
 0x661   : >> { %1987 = vmax.xlane.f32.xlu0 %v1986_v24  ;;  %2011 = vmax.xlane.f32.xlu1 %v2010_v5  ;;  %v4659_v42 = vpop.f32.mrb[80].mxu0 }
 0x662   : >> { %v4661_v46 = vpop.f32.mrb[81].mxu0 }
 0x663   : >> { %v2013_v11 = vmax.f32 %v4659_v42, %v4661_v46  ;;  %v4665_v3 = vpop.f32.mrb[82].mxu0 }
 0x664   : >> { %v4667_v9 = vpop.f32.mrb[83].mxu0 }
 0x665   : >> { %v2016_v59 = vmax.f32 %v4665_v3, %v4667_v9  ;;  %1990 = vmax.xlane.f32.xlu0 %v1989_v49  ;;  %2014 = vmax.xlane.f32.xlu1 %v2013_v11 }
 0x669   : >> { %1993 = vmax.xlane.f32.xlu0 %v1992_v13  ;;  %2017 = vmax.xlane.f32.xlu1 %v2016_v59  ;;  %v4671_v16 = vpop.f32.mrb[84].mxu0 }
 0x66a   : >> { %v4673_v38 = vpop.f32.mrb[85].mxu0 }
 0x66b   : >> { %v2019_v17 = vmax.f32 %v4671_v16, %v4673_v38  ;;  %v4677_v24 = vpop.f32.mrb[86].mxu0 }
 0x66c   : >> { %5260 = vst [vmem:[#allocation78_spill] sm:$0xff] %v4677_v24  ;;  %v4679_v52 = vpop.f32.mrb[87].mxu0 }
 0x66d   : >> { %5261 = vst [vmem:[#allocation79_spill] sm:$0xff] %v4679_v52  ;;  %v2022_v28 = vmax.f32 %v4677_v24, %v4679_v52  ;;  %2020 = vmax.xlane.f32.xlu1 %v2019_v17 }
 0x671   : >> { %2023 = vmax.xlane.f32.xlu1 %v2022_v28  ;;  %v4683_v49 = vpop.f32.mrb[88].mxu0 }
 0x672   : >> { %5262 = vst [vmem:[#allocation80_spill] sm:$0xff] %v4683_v49  ;;  %v4685_v13 = vpop.f32.mrb[89].mxu0 }
 0x673   : >> { %5263 = vst [vmem:[#allocation81_spill] sm:$0xff] %v4685_v13  ;;  %v2025_v62 = vmax.f32 %v4683_v49, %v4685_v13  ;;  %v4689_v29 = vpop.f32.mrb[90].mxu0 }
 0x674   : >> { %5264 = vst [vmem:[#allocation82_spill] sm:$0xff] %v4689_v29  ;;  %v4691_v15 = vpop.f32.mrb[91].mxu0 }
 0x675   : >> { %5265 = vst [vmem:[#allocation83_spill] sm:$0xff] %v4691_v15  ;;  %v2028_v5 = vmax.f32 %v4689_v29, %v4691_v15  ;;  %2026 = vmax.xlane.f32.xlu1 %v2025_v62 }
 0x679   : >> { %2029 = vmax.xlane.f32.xlu1 %v2028_v5  ;;  %v4695_v11 = vpop.f32.mrb[92].mxu0 }
 0x67a   : >> { %5266 = vst [vmem:[#allocation84_spill] sm:$0xff] %v4695_v11  ;;  %v4697_v59 = vpop.f32.mrb[93].mxu0 }
 0x67b   : >> { %5267 = vst [vmem:[#allocation85_spill] sm:$0xff] %v4697_v59  ;;  %v2031_v17 = vmax.f32 %v4695_v11, %v4697_v59  ;;  %v4701_v28 = vpop.f32.mrb[94].mxu0 }
 0x67c   : >> { %5268 = vst [vmem:[#allocation86_spill] sm:$0xff] %v4701_v28  ;;  %v4703_v48 = vpop.f32.mrb[95].mxu0 }
 0x67d   : >> { %5269 = vst [vmem:[#allocation87_spill] sm:$0xff] %v4703_v48  ;;  %v2034_v7 = vmax.f32 %v4701_v28, %v4703_v48  ;;  %2032 = vmax.xlane.f32.xlu1 %v2031_v17 }
 0x681   : >> { %2035 = vmax.xlane.f32.xlu1 %v2034_v7  ;;  %v4707_v13 = vpop.f32.mrb[96].mxu0 }
 0x682   : >> { %5270 = vst [vmem:[#allocation88_spill] sm:$0xff] %v4707_v13  ;;  %v4709_v62 = vpop.f32.mrb[97].mxu0 }
 0x683   : >> { %5271 = vst [vmem:[#allocation60_spill] sm:$0xff] %v4709_v62  ;;  %v2037_v5 = vmax.f32 %v4707_v13, %v4709_v62  ;;  %v4713_v15 = vpop.f32.mrb[98].mxu0 }
 0x684   : >> { %v4715_v29 = vpop.f32.mrb[99].mxu0 }
 0x685   : >> { %5272 = vst [vmem:[#allocation61_spill] sm:$0xff] %v4715_v29  ;;  %v2040_v59 = vmax.f32 %v4713_v15, %v4715_v29  ;;  %2038 = vmax.xlane.f32.xlu1 %v2037_v5 }
 0x689   : >> { %2041 = vmax.xlane.f32.xlu1 %v2040_v59 }
 0x69a   : >> { %v1949_v11 = vpop.xlane.xlu1 %1948 }
 0x69b   : >> { %v2043_v17 = vsub.f32 %v4527_v56, %v1949_v11  ;;  %v2044_v7 = vsub.f32 %v4529_v63, %v1949_v11 }
 0x69c   : >> { %v1952_v48 = vpop.xlane.xlu0 %1951 }
 0x69d   : >> { %v2107_v28 = vmul.f32 1.442695, %v2043_v17  ;;  %v2109_v49 = vmul.f32 1.442695, %v2044_v7  ;;  %v2045_v52 = vsub.f32 %v4533_v23, %v1952_v48  ;;  %v2046_v62 = vsub.f32 %v4535_v58, %v1952_v48 }
 0x69f   : >> { %3266 = vpow2.f32 %v2107_v28  ;;  %v2111_v13 = vmul.f32 1.442695, %v2045_v52  ;;  %v2113_v24 = vmul.f32 1.442695, %v2046_v62 }
 0x6a0   : >> { %3268 = vpow2.f32 %v2109_v49 }
 0x6a1   : >> { %3270 = vpow2.f32 %v2111_v13 }
 0x6a2   : >> { %3272 = vpow2.f32 %v2113_v24  ;;  %v1955_v5 = vpop.xlane.xlu0 %1954 }
 0x6a3   : >> { %v2047_v59 = vsub.f32 %v4539_v39, %v1955_v5  ;;  %v2048_v56 = vsub.f32 %v4541_v51, %v1955_v5 }
 0x6a5   : >> { %v2115_v29 = vmul.f32 1.442695, %v2047_v59  ;;  %v2117_v63 = vmul.f32 1.442695, %v2048_v56 }
 0x6a6   : >> { %v1958_v11 = vpop.xlane.xlu0 %1957 }
 0x6a7   : >> { %3274 = vpow2.f32 %v2115_v29  ;;  %v2049_v17 = vsub.f32 %v4545_v2, %v1958_v11  ;;  %v2050_v23 = vsub.f32 %v4547_v45, %v1958_v11 }
 0x6a8   : >> { %3276 = vpow2.f32 %v2117_v63 }
 0x6a9   : >> { %v3267_v48 = vpop.eup %3266  ;;  %v2119_v58 = vmul.f32 1.442695, %v2049_v17  ;;  %v2121_v52 = vmul.f32 1.442695, %v2050_v23 }
 0x6aa   : >> { %v3269_v49 = vpop.eup %3268  ;;  %v1961_v13 = vpop.xlane.xlu0 %1960 }
 0x6ab   : >> { %v3271_v24 = vpop.eup %3270  ;;  %3278 = vpow2.f32 %v2119_v58  ;;  %v2051_v39 = vsub.f32 %v4551_v61, %v1961_v13  ;;  %v2052_v51 = vsub.f32 %v4553_v31, %v1961_v13  ;;  %v2235_v28 = vadd.f32 %v3269_v49, %v3267_v48 }
 0x6ac   : >> { %v3273_v62 = vpop.eup %3272  ;;  %3280 = vpow2.f32 %v2121_v52  ;;  %v2990_v29 = vpack.c.bf16 %v3271_v24, %v3267_v48 }
 0x6ad   : >> { %v2123_v7 = vmul.f32 1.442695, %v2051_v39  ;;  %v2125_v2 = vmul.f32 1.442695, %v2052_v51  ;;  %2236 = vadd.xlane.f32.xlu0 %v2235_v28  ;;  %v2988_v45 = vpack.c.bf16 %v3273_v62, %v3269_v49  ;;  %v2238_v5 = vadd.f32 %v3273_v62, %v3271_v24 }
 0x6ae   : >> { %v1964_v59 = vpop.xlane.xlu0 %1963 }
 0x6af   : >> { %3282 = vpow2.f32 %v2123_v7  ;;  %2989 = vmatprep.subr.bf16.mxu1 %v2988_v45  ;;  %v2053_v56 = vsub.f32 %v4557_v8, %v1964_v59  ;;  %v2054_v63 = vsub.f32 %v4559_v57, %v1964_v59 }
 0x6b0   : >> { %3284 = vpow2.f32 %v2125_v2  ;;  %2991 = vmatpush1.bf16.msra.mxu1 %v2990_v29 }
 0x6b1   : >> { %v3275_v61 = vpop.eup %3274  ;;  %v2127_v31 = vmul.f32 1.442695, %v2053_v56  ;;  %v2129_v11 = vmul.f32 1.442695, %v2054_v63  ;;  %2239 = vadd.xlane.f32.xlu0 %v2238_v5 }
 0x6b2   : >> { %v3277_v17 = vpop.eup %3276  ;;  %v1967_v23 = vpop.xlane.xlu0 %1966 }
 0x6b3   : >> { %3286 = vpow2.f32 %v2127_v31  ;;  %v2055_v48 = vsub.f32 %v4563_v53, %v1967_v23  ;;  %v2056_v58 = vsub.f32 %v4565_v26, %v1967_v23  ;;  %v2241_v52 = vadd.f32 %v3277_v17, %v3275_v61 }
 0x6b4   : >> { %3288 = vpow2.f32 %v2129_v11 }
 0x6b5   : >> { %v3279_v49 = vpop.eup %3278  ;;  %v2131_v13 = vmul.f32 1.442695, %v2055_v48  ;;  %v2133_v8 = vmul.f32 1.442695, %v2056_v58  ;;  %2242 = vadd.xlane.f32.xlu0 %v2241_v52 }
 0x6b6   : >> { %v3281_v57 = vpop.eup %3280  ;;  %v1970_v24 = vpop.xlane.xlu0 %1969  ;;  %v2994_v39 = vpack.c.bf16 %v3279_v49, %v3275_v61 }
 0x6b7   : >> { %3290 = vpow2.f32 %v2131_v13  ;;  %v2057_v51 = vsub.f32 %v4569_v33, %v1970_v24  ;;  %v2058_v28 = vsub.f32 %v4571_v35, %v1970_v24  ;;  %v2992_v62 = vpack.c.bf16 %v3281_v57, %v3277_v17 }
 0x6b8   : >> { %3292 = vpow2.f32 %v2133_v8  ;;  %v2244_v29 = vadd.f32 %v3281_v57, %v3279_v49 }
 0x6b9   : >> { %v3283_v53 = vpop.eup %3282  ;;  %v2135_v7 = vmul.f32 1.442695, %v2057_v51  ;;  %v2137_v26 = vmul.f32 1.442695, %v2058_v28  ;;  %2993 = vmatprep.subr.bf16.mxu1 %v2992_v62 }
 0x6ba   : >> { %v3285_v2 = vpop.eup %3284  ;;  %2245 = vadd.xlane.f32.xlu0 %v2244_v29  ;;  %2995 = vmatpush1.bf16.msra.mxu1 %v2994_v39  ;;  %v1973_v45 = vpop.xlane.xlu0 %1972 }
 0x6bb   : >> { %3294 = vpow2.f32 %v2135_v7  ;;  %v2059_v5 = vsub.f32 %v4575_v20, %v1973_v45  ;;  %v2060_v59 = vsub.f32 %v4577_v27, %v1973_v45  ;;  %v2247_v56 = vadd.f32 %v3285_v2, %v3283_v53 }
 0x6bc   : >> { %3296 = vpow2.f32 %v2137_v26 }
 0x6bd   : >> { %v3287_v33 = vpop.eup %3286  ;;  %v2139_v35 = vmul.f32 1.442695, %v2059_v5  ;;  %v2141_v63 = vmul.f32 1.442695, %v2060_v59 }
 0x6be   : >> { %v3289_v61 = vpop.eup %3288  ;;  %2248 = vadd.xlane.f32.xlu0 %v2247_v56  ;;  %v1976_v31 = vpop.xlane.xlu0 %1975  ;;  %v2998_v11 = vpack.c.bf16 %v3287_v33, %v3283_v53 }
 0x6bf   : >> { %3298 = vpow2.f32 %v2139_v35  ;;  %v2061_v17 = vsub.f32 %v4581_v36, %v1976_v31  ;;  %v2062_v23 = vsub.f32 %v4583_v34, %v1976_v31  ;;  %v2996_v48 = vpack.c.bf16 %v3289_v61, %v3285_v2 }
 0x6c0   : >> { %3300 = vpow2.f32 %v2141_v63  ;;  %v2250_v58 = vadd.f32 %v3289_v61, %v3287_v33 }
 0x6c1   : >> { %v3291_v20 = vpop.eup %3290  ;;  %v2143_v52 = vmul.f32 1.442695, %v2061_v17  ;;  %v2145_v27 = vmul.f32 1.442695, %v2062_v23  ;;  %2997 = vmatprep.subr.bf16.mxu1 %v2996_v48 }
 0x6c2   : >> { %v3293_v49 = vpop.eup %3292  ;;  %2251 = vadd.xlane.f32.xlu0 %v2250_v58  ;;  %2999 = vmatpush1.bf16.msra.mxu1 %v2998_v11 }
 0x6c3   : >> { %3302 = vpow2.f32 %v2143_v52  ;;  %v2253_v13 = vadd.f32 %v3293_v49, %v3291_v20 }
 0x6c4   : >> { %3304 = vpow2.f32 %v2145_v27 }
 0x6c5   : >> { %v3295_v8 = vpop.eup %3294 }
 0x6c6   : >> { %v3297_v57 = vpop.eup %3296  ;;  %2254 = vadd.xlane.f32.xlu0 %v2253_v13  ;;  %v3002_v24 = vpack.c.bf16 %v3295_v8, %v3291_v20 }
 0x6c7   : >> { %v3000_v36 = vpack.c.bf16 %v3297_v57, %v3293_v49  ;;  %v2256_v39 = vadd.f32 %v3297_v57, %v3295_v8 }
 0x6c9   : >> { %v3299_v34 = vpop.eup %3298  ;;  %3001 = vmatprep.subr.bf16.mxu1 %v3000_v36 }
 0x6ca   : >> { %v3301_v51 = vpop.eup %3300  ;;  %2257 = vadd.xlane.f32.xlu0 %v2256_v39  ;;  %3003 = vmatpush1.bf16.msra.mxu1 %v3002_v24 }
 0x6cb   : >> { %v2259_v28 = vadd.f32 %v3301_v51, %v3299_v34 }
 0x6cd   : >> { %v3303_v62 = vpop.eup %3302 }
 0x6ce   : >> { %v3305_v29 = vpop.eup %3304  ;;  %2260 = vadd.xlane.f32.xlu0 %v2259_v28  ;;  %v3006_v53 = vpack.c.bf16 %v3303_v62, %v3299_v34 }
 0x6cf   : >> { %v3004_v7 = vpack.c.bf16 %v3305_v29, %v3301_v51  ;;  %v2262_v26 = vadd.f32 %v3305_v29, %v3303_v62 }
 0x6d1   : >> { %3005 = vmatprep.subr.bf16.mxu1 %v3004_v7 }
 0x6d2   : >> { %2263 = vadd.xlane.f32.xlu0 %v2262_v26  ;;  %3007 = vmatpush1.bf16.msra.mxu1 %v3006_v53 }
 0x6da   : >> { %v1997_v2 = vpop.xlane.xlu0 %1996 }
 0x6db   : >> { %v2075_v45 = vsub.f32 %v4623_v32, %v1997_v2  ;;  %v2076_v5 = vsub.f32 %v4625_v50, %v1997_v2 }
 0x6dd   : >> { %v2171_v59 = vmul.f32 1.442695, %v2075_v45  ;;  %v2173_v56 = vmul.f32 1.442695, %v2076_v5 }
 0x6de   : >> { %v2000_v33 = vpop.xlane.xlu0 %1999 }
 0x6df   : >> { %3306 = vpow2.f32 %v2171_v59  ;;  %v2077_v35 = vsub.f32 %v4629_v47, %v2000_v33  ;;  %v2078_v63 = vsub.f32 %v4631_v14, %v2000_v33 }
 0x6e0   : >> { %3308 = vpow2.f32 %v2173_v56 }
 0x6e1   : >> { %v2175_v61 = vmul.f32 1.442695, %v2077_v35  ;;  %v2177_v31 = vmul.f32 1.442695, %v2078_v63 }
 0x6e2   : >> { %v2003_v11 = vpop.xlane.xlu1 %2002  ;;  %v1979_v17 = vpop.xlane.xlu0 %1978 }
 0x6e3   : >> { %3310 = vpow2.f32 %v2175_v61  ;;  %v2079_v23 = vsub.f32 %v4635_v6, %v2003_v11  ;;  %v2080_v32 = vsub.f32 %v4637_v21, %v2003_v11  ;;  %v2063_v50 = vsub.f32 %v4587_v37, %v1979_v17 }
 0x6e4   : >> { %3312 = vpow2.f32 %v2177_v31  ;;  %v2064_v48 = vsub.f32 %v4589_v4, %v1979_v17 }
 0x6e5   : >> { %v2179_v58 = vmul.f32 1.442695, %v2079_v23  ;;  %v2181_v20 = vmul.f32 1.442695, %v2080_v32  ;;  %v2147_v47 = vmul.f32 1.442695, %v2063_v50 }
 0x6e6   : >> { %v2149_v52 = vmul.f32 1.442695, %v2064_v48  ;;  %v2006_v14 = vpop.xlane.xlu1 %2005  ;;  %v1982_v27 = vpop.xlane.xlu0 %1981 }
 0x6e7   : >> { %3314 = vpow2.f32 %v2179_v58  ;;  %v2081_v49 = vsub.f32 %v4641_v18, %v2006_v14  ;;  %v2082_v13 = vsub.f32 %v4643_v41, %v2006_v14  ;;  %v2065_v6 = vsub.f32 %v4593_v55, %v1982_v27 }
 0x6e8   : >> { %3316 = vpow2.f32 %v2181_v20  ;;  %v2066_v21 = vsub.f32 %v4595_v0, %v1982_v27 }
 0x6e9   : >> { %v4751_v37 = vpop.eup %3306  ;;  %3318 = vpow2.f32 %v2147_v47  ;;  %v2183_v4 = vmul.f32 1.442695, %v2081_v49  ;;  %v2185_v8 = vmul.f32 1.442695, %v2082_v13  ;;  %v2151_v57 = vmul.f32 1.442695, %v2065_v6 }
 0x6ea   : >> { %v4753_v24 = vpop.eup %3308  ;;  %3320 = vpow2.f32 %v2149_v52  ;;  %v2153_v36 = vmul.f32 1.442695, %v2066_v21  ;;  %v2009_v39 = vpop.xlane.xlu1 %2008 }
 0x6eb   : >> { %v1985_v34 = vpop.xlane.xlu0 %1984  ;;  %3322 = vpow2.f32 %v2183_v4  ;;  %v2083_v18 = vsub.f32 %v4647_v60, %v2009_v39  ;;  %v2084_v55 = vsub.f32 %v4649_v44, %v2009_v39  ;;  %v2283_v51 = vadd.f32 %v4753_v24, %v4751_v37 }
 0x6ec   : >> { %v2067_v41 = vsub.f32 %v4599_v54, %v1985_v34  ;;  %3324 = vpow2.f32 %v2185_v8  ;;  %v2068_v0 = vsub.f32 %v4601_v10, %v1985_v34 }
 0x6ed   : >> { %v4761_v28 = vpop.eup %3310  ;;  %3326 = vpow2.f32 %v2151_v57  ;;  %v2187_v62 = vmul.f32 1.442695, %v2083_v18  ;;  %v2189_v29 = vmul.f32 1.442695, %v2084_v55  ;;  %2284 = vadd.xlane.f32.xlu1 %v2283_v51 }
 0x6ee   : >> { %v2155_v53 = vmul.f32 1.442695, %v2067_v41  ;;  %v4763_v7 = vpop.eup %3312  ;;  %3328 = vpow2.f32 %v2153_v36  ;;  %v2157_v60 = vmul.f32 1.442695, %v2068_v0  ;;  %v2012_v44 = vpop.xlane.xlu1 %2011  ;;  %v3022_v54 = vpack.c.bf16 %v4761_v28, %v4751_v37 }
 0x6ef   : >> { %v1988_v26 = vpop.xlane.xlu0 %1987  ;;  %3330 = vpow2.f32 %v2187_v62  ;;  %v2085_v10 = vsub.f32 %v4653_v12, %v2012_v44  ;;  %v2086_v2 = vsub.f32 %v4655_v25, %v2012_v44  ;;  %v2286_v59 = vadd.f32 %v4763_v7, %v4761_v28 }
 0x6f0   : >> { %v2069_v45 = vsub.f32 %v4605_v22, %v1988_v26  ;;  %3332 = vpow2.f32 %v2189_v29  ;;  %v2070_v5 = vsub.f32 %v4607_v1, %v1988_v26  ;;  %v3020_v56 = vpack.c.bf16 %v4763_v7, %v4753_v24 }
 0x6f1   : >> { %v4775_v33 = vpop.eup %3314  ;;  %3334 = vpow2.f32 %v2155_v53  ;;  %v2191_v35 = vmul.f32 1.442695, %v2085_v10  ;;  %v2193_v63 = vmul.f32 1.442695, %v2086_v2  ;;  %2287 = vadd.xlane.f32.xlu1 %v2286_v59  ;;  %v5273_v59 = vld [vmem:[#allocation78_spill] sm:$0xff] }
 0x6f2   : >> { %v2159_v61 = vmul.f32 1.442695, %v2069_v45  ;;  %v4777_v12 = vpop.eup %3316  ;;  %3336 = vpow2.f32 %v2157_v60  ;;  %v2161_v25 = vmul.f32 1.442695, %v2070_v5  ;;  %v2015_v22 = vpop.xlane.xlu1 %2014 }
 0x6f3   : >> { %v1991_v31 = vpop.xlane.xlu0 %1990  ;;  %v3319_v1 = vpop.eup %3318  ;;  %3338 = vpow2.f32 %v2191_v35  ;;  %v2087_v11 = vsub.f32 %v4659_v42, %v2015_v22  ;;  %v2088_v17 = vsub.f32 %v4661_v46, %v2015_v22  ;;  %v2289_v48 = vadd.f32 %v4777_v12, %v4775_v33 }
 0x6f4   : >> { %v2071_v23 = vsub.f32 %v4611_v40, %v1991_v31  ;;  %v3321_v32 = vpop.eup %3320  ;;  %3340 = vpow2.f32 %v2193_v63  ;;  %v2072_v50 = vsub.f32 %v4613_v19, %v1991_v31  ;;  %v5274_v63 = vld [vmem:[#allocation79_spill] sm:$0xff] }
 0x6f5   : >> { %v4785_v58 = vpop.eup %3322  ;;  %3342 = vpow2.f32 %v2159_v61  ;;  %v2195_v20 = vmul.f32 1.442695, %v2087_v11  ;;  %v2197_v47 = vmul.f32 1.442695, %v2088_v17  ;;  %2290 = vadd.xlane.f32.xlu1 %v2289_v48  ;;  %v2265_v46 = vadd.f32 %v3321_v32, %v3319_v1 }
 0x6f6   : >> { %v2163_v52 = vmul.f32 1.442695, %v2071_v23  ;;  %v4787_v14 = vpop.eup %3324  ;;  %3344 = vpow2.f32 %v2161_v25  ;;  %v2165_v42 = vmul.f32 1.442695, %v2072_v50  ;;  %v2018_v40 = vpop.xlane.xlu1 %2017  ;;  %v3026_v19 = vpack.c.bf16 %v4785_v58, %v4775_v33 }
 0x6f7   : >> { %v1994_v27 = vpop.xlane.xlu0 %1993  ;;  %v3327_v49 = vpop.eup %3326  ;;  %3346 = vpow2.f32 %v2195_v20  ;;  %v2089_v13 = vsub.f32 %v4665_v3, %v2018_v40  ;;  %v2090_v6 = vsub.f32 %v4667_v9, %v2018_v40  ;;  %2266 = vadd.xlane.f32.xlu0 %v2265_v46  ;;  %v2292_v57 = vadd.f32 %v4787_v14, %v4785_v58  ;;  %v5276_v46 = vld [vmem:[#allocation81_spill] sm:$0xff] }
 0x6f8   : >> { %v2073_v21 = vsub.f32 %v4617_v43, %v1994_v27  ;;  %v3329_v4 = vpop.eup %3328  ;;  %3348 = vpow2.f32 %v2197_v47  ;;  %v2074_v8 = vsub.f32 %v4619_v30, %v1994_v27  ;;  %v3010_v36 = vpack.c.bf16 %v3327_v49, %v3319_v1 }
 0x6f9   : >> { %v4797_v39 = vpop.eup %3330  ;;  %3350 = vpow2.f32 %v2163_v52  ;;  %v2199_v34 = vmul.f32 1.442695, %v2089_v13  ;;  %v2201_v18 = vmul.f32 1.442695, %v2090_v6  ;;  %2293 = vadd.xlane.f32.xlu1 %v2292_v57  ;;  %v3008_v43 = vpack.c.bf16 %v3329_v4, %v3321_v32  ;;  %v5275_v52 = vld [vmem:[#allocation80_spill] sm:$0xff] }
 0x6fa   : >> { %v2167_v55 = vmul.f32 1.442695, %v2073_v21  ;;  %v4799_v3 = vpop.eup %3332  ;;  %3352 = vpow2.f32 %v2165_v42  ;;  %v2169_v9 = vmul.f32 1.442695, %v2074_v8  ;;  %v2268_v41 = vadd.f32 %v3329_v4, %v3327_v49  ;;  %v2021_v0 = vpop.xlane.xlu1 %2020 }
 0x6fb   : >> { %v3335_v51 = vpop.eup %3334  ;;  %3354 = vpow2.f32 %v2199_v34  ;;  %v2091_v30 = vsub.f32 %v4671_v16, %v2021_v0  ;;  %v2092_v62 = vsub.f32 %v4673_v38, %v2021_v0  ;;  %v2295_v29 = vadd.f32 %v4799_v3, %v4797_v39  ;;  %3009 = vmatprep.subr.bf16.mxu1 %v3008_v43 }
 0x6fc   : >> { %v3337_v53 = vpop.eup %3336  ;;  %3356 = vpow2.f32 %v2201_v18  ;;  %2269 = vadd.xlane.f32.xlu0 %v2268_v41  ;;  %v3024_v60 = vpack.c.bf16 %v4787_v14, %v4777_v12  ;;  %3011 = vmatpush1.bf16.msra.mxu1 %v3010_v36  ;;  %v5277_v18 = vld [vmem:[#allocation82_spill] sm:$0xff] }
 0x6fd   : >> { %v4807_v44 = vpop.eup %3338  ;;  %3358 = vpow2.f32 %v2167_v55  ;;  %v2203_v26 = vmul.f32 1.442695, %v2091_v30  ;;  %v2205_v10 = vmul.f32 1.442695, %v2092_v62  ;;  %v2271_v2 = vadd.f32 %v3337_v53, %v3335_v51  ;;  %2296 = vadd.xlane.f32.xlu1 %v2295_v29 }
 0x6fe   : >> { %v4809_v16 = vpop.eup %3340  ;;  %3360 = vpow2.f32 %v2169_v9  ;;  %v2024_v38 = vpop.xlane.xlu1 %2023  ;;  %v3030_v45 = vpack.c.bf16 %v4807_v44, %v4797_v39  ;;  %v5278_v9 = vld [vmem:[#allocation83_spill] sm:$0xff] }
 0x6ff   : >> { %v3343_v5 = vpop.eup %3342  ;;  %3362 = vpow2.f32 %v2203_v26  ;;  %v2093_v35 = vsub.f32 %v5273_v59, %v2024_v38  ;;  %v2094_v61 = vsub.f32 %v5274_v63, %v2024_v38  ;;  %v2298_v25 = vadd.f32 %v4809_v16, %v4807_v44 }
 0x700   : >> { %v3345_v22 = vpop.eup %3344  ;;  %3364 = vpow2.f32 %v2205_v10  ;;  %2272 = vadd.xlane.f32.xlu0 %v2271_v2  ;;  %v3014_v31 = vpack.c.bf16 %v3343_v5, %v3335_v51  ;;  %v3028_v1 = vpack.c.bf16 %v4809_v16, %v4799_v3 }
 0x701   : >> { %v4819_v11 = vpop.eup %3346  ;;  %v2207_v17 = vmul.f32 1.442695, %v2093_v35  ;;  %v2209_v23 = vmul.f32 1.442695, %v2094_v61  ;;  %v3012_v32 = vpack.c.bf16 %v3345_v22, %v3337_v53  ;;  %v2274_v50 = vadd.f32 %v3345_v22, %v3343_v5  ;;  %2299 = vadd.xlane.f32.xlu1 %v2298_v25  ;;  %v5279_v5 = vld [vmem:[#allocation84_spill] sm:$0xff]  ;;  %v5280_v35 = vld [vmem:[#allocation85_spill] sm:$0xff] }
 0x702   : >> { %v4821_v48 = vpop.eup %3348  ;;  %v2027_v20 = vpop.xlane.xlu1 %2026 }
 0x703   : >> { %v3351_v47 = vpop.eup %3350  ;;  %3366 = vpow2.f32 %v2207_v17  ;;  %3013 = vmatprep.subr.bf16.mxu1 %v3012_v32  ;;  %v2095_v42 = vsub.f32 %v5275_v52, %v2027_v20  ;;  %v2096_v40 = vsub.f32 %v5276_v46, %v2027_v20  ;;  %v2301_v27 = vadd.f32 %v4821_v48, %v4819_v11  ;;  %v5282_v20 = vld [vmem:[#allocation87_spill] sm:$0xff] }
 0x704   : >> { %v3353_v49 = vpop.eup %3352  ;;  %3368 = vpow2.f32 %v2209_v23  ;;  %2275 = vadd.xlane.f32.xlu0 %v2274_v50  ;;  %3015 = vmatpush1.bf16.msra.mxu1 %v3014_v31  ;;  %v5281_v50 = vld [vmem:[#allocation86_spill] sm:$0xff] }
 0x705   : >> { %v4827_v13 = vpop.eup %3354  ;;  %v2211_v6 = vmul.f32 1.442695, %v2095_v42  ;;  %v2213_v21 = vmul.f32 1.442695, %v2096_v40  ;;  %v2277_v4 = vadd.f32 %v3353_v49, %v3351_v47  ;;  %2302 = vadd.xlane.f32.xlu1 %v2301_v27  ;;  %v5283_v27 = vld [vmem:[#allocation88_spill] sm:$0xff] }
 0x706   : >> { %v4829_v8 = vpop.eup %3356  ;;  %v2030_v57 = vpop.xlane.xlu1 %2029  ;;  %v3034_v36 = vpack.c.bf16 %v4827_v13, %v4819_v11 }
 0x707   : >> { %v3359_v34 = vpop.eup %3358  ;;  %3370 = vpow2.f32 %v2211_v6  ;;  %v2097_v55 = vsub.f32 %v5277_v18, %v2030_v57  ;;  %v2098_v43 = vsub.f32 %v5278_v9, %v2030_v57  ;;  %v2304_v41 = vadd.f32 %v4829_v8, %v4827_v13  ;;  %v5284_v6 = vld [vmem:[#allocation60_spill] sm:$0xff]  ;;  %v5285_v57 = vld [vmem:[#allocation61_spill] sm:$0xff] }
 0x708   : >> { %v3361_v0 = vpop.eup %3360  ;;  %3372 = vpow2.f32 %v2213_v21  ;;  %2278 = vadd.xlane.f32.xlu0 %v2277_v4  ;;  %v3018_v51 = vpack.c.bf16 %v3359_v34, %v3351_v47  ;;  %v3032_v30 = vpack.c.bf16 %v4829_v8, %v4821_v48 }
 0x709   : >> { %v4839_v62 = vpop.eup %3362  ;;  %v2215_v29 = vmul.f32 1.442695, %v2097_v55  ;;  %v2217_v53 = vmul.f32 1.442695, %v2098_v43  ;;  %v3016_v26 = vpack.c.bf16 %v3361_v0, %v3353_v49  ;;  %v2280_v10 = vadd.f32 %v3361_v0, %v3359_v34  ;;  %2305 = vadd.xlane.f32.xlu1 %v2304_v41 }
 0x70a   : >> { %v4841_v2 = vpop.eup %3364  ;;  %v2033_v38 = vpop.xlane.xlu1 %2032 }
 0x70b   : >> { %3374 = vpow2.f32 %v2215_v29  ;;  %3017 = vmatprep.subr.bf16.mxu1 %v3016_v26  ;;  %v2099_v59 = vsub.f32 %v5279_v5, %v2033_v38  ;;  %v2100_v63 = vsub.f32 %v5280_v35, %v2033_v38  ;;  %v2307_v61 = vadd.f32 %v4841_v2, %v4839_v62 }
 0x70c   : >> { %3376 = vpow2.f32 %v2217_v53  ;;  %2281 = vadd.xlane.f32.xlu0 %v2280_v10  ;;  %3019 = vmatpush1.bf16.msra.mxu1 %v3018_v51 }
 0x70d   : >> { %v3367_v25 = vpop.eup %3366  ;;  %v2219_v22 = vmul.f32 1.442695, %v2099_v59  ;;  %v2221_v31 = vmul.f32 1.442695, %v2100_v63  ;;  %3021 = vmatprep.subr.bf16.mxu1 %v3020_v56  ;;  %2308 = vadd.xlane.f32.xlu1 %v2307_v61 }
 0x70e   : >> { %v3369_v17 = vpop.eup %3368  ;;  %v2036_v23 = vpop.xlane.xlu1 %2035  ;;  %v3038_v32 = vpack.c.bf16 %v3367_v25, %v4839_v62 }
 0x70f   : >> { %3378 = vpow2.f32 %v2219_v22  ;;  %v2101_v48 = vsub.f32 %v5281_v50, %v2036_v23  ;;  %v2102_v47 = vsub.f32 %v5282_v20, %v2036_v23  ;;  %v2310_v52 = vadd.f32 %v3369_v17, %v3367_v25 }
 0x710   : >> { %3380 = vpow2.f32 %v2221_v31  ;;  %3023 = vmatpush1.bf16.msra.mxu1 %v3022_v54  ;;  %v3036_v42 = vpack.c.bf16 %v3369_v17, %v4841_v2 }
 0x711   : >> { %v3371_v24 = vpop.eup %3370  ;;  %v2223_v7 = vmul.f32 1.442695, %v2101_v48  ;;  %v2225_v56 = vmul.f32 1.442695, %v2102_v47  ;;  %3025 = vmatprep.subr.bf16.mxu1 %v3024_v60  ;;  %2311 = vadd.xlane.f32.xlu1 %v2310_v52 }
 0x712   : >> { %v3373_v46 = vpop.eup %3372  ;;  %v2039_v40 = vpop.xlane.xlu1 %2038 }
 0x713   : >> { %3382 = vpow2.f32 %v2223_v7  ;;  %v2103_v49 = vsub.f32 %v5283_v27, %v2039_v40  ;;  %v2104_v21 = vsub.f32 %v5284_v6, %v2039_v40  ;;  %v2313_v4 = vadd.f32 %v3373_v46, %v3371_v24  ;;  %v5286_v6 = vld [vmem:[#allocation56_spill] sm:$0xff] }
 0x714   : >> { %3384 = vpow2.f32 %v2225_v56  ;;  %3027 = vmatpush1.bf16.msra.mxu1 %v3026_v19 }
 0x715   : >> { %v3375_v37 = vpop.eup %3374  ;;  %v2227_v28 = vmul.f32 1.442695, %v2103_v49  ;;  %v2229_v54 = vmul.f32 1.442695, %v2104_v21  ;;  %3029 = vmatprep.subr.bf16.mxu1 %v3028_v1  ;;  %2314 = vadd.xlane.f32.xlu1 %v2313_v4  ;;  %v5287_v21 = vld [vmem:[#allocation57_spill] sm:$0xff]  ;;  %v5288_v4 = vld [vmem:[#allocation58_spill] sm:$0xff] }
 0x716   : >> { %v3377_v12 = vpop.eup %3376  ;;  %v2042_v14 = vpop.xlane.xlu1 %2041  ;;  %v3042_v60 = vpack.c.bf16 %v3375_v37, %v3371_v24 }
 0x717   : >> { %3386 = vpow2.f32 %v2227_v28  ;;  %v2105_v8 = vsub.f32 %v4713_v15, %v2042_v14  ;;  %v2106_v34 = vsub.f32 %v5285_v57, %v2042_v14  ;;  %v2316_v18 = vadd.f32 %v3377_v12, %v3375_v37  ;;  %v5289_v37 = vld [vmem:[#allocation59_spill] sm:$0xff] }
 0x718   : >> { %3388 = vpow2.f32 %v2229_v54  ;;  %3031 = vmatpush1.bf16.msra.mxu1 %v3030_v45  ;;  %v3040_v33 = vpack.c.bf16 %v3377_v12, %v3373_v46 }
 0x719   : >> { %v3379_v58 = vpop.eup %3378  ;;  %v2231_v19 = vmul.f32 1.442695, %v2105_v8  ;;  %v2233_v3 = vmul.f32 1.442695, %v2106_v34  ;;  %3033 = vmatprep.subr.bf16.mxu1 %v3032_v30  ;;  %2317 = vadd.xlane.f32.xlu1 %v2316_v18 }
 0x71a   : >> { %v3381_v16 = vpop.eup %3380 }
 0x71b   : >> { %3390 = vpow2.f32 %v2231_v19  ;;  %v2319_v1 = vadd.f32 %v3381_v16, %v3379_v58 }
 0x71c   : >> { %3392 = vpow2.f32 %v2233_v3  ;;  %3035 = vmatpush1.bf16.msra.mxu1 %v3034_v36 }
 0x71d   : >> { %v3383_v15 = vpop.eup %3382  ;;  %3037 = vmatprep.subr.bf16.mxu1 %v3036_v42  ;;  %2320 = vadd.xlane.f32.xlu1 %v2319_v1 }
 0x71e   : >> { %v3385_v55 = vpop.eup %3384  ;;  %v3046_v39 = vpack.c.bf16 %v3383_v15, %v3379_v58 }
 0x71f   : >> { %v2322_v44 = vadd.f32 %v3385_v55, %v3383_v15  ;;  %v3044_v45 = vpack.c.bf16 %v3385_v55, %v3381_v16  ;;  %v5292_v15 = vld [vmem:[#allocation68_spill] sm:$0xff] }
 0x720   : >> { %3039 = vmatpush1.bf16.msra.mxu1 %v3038_v32 }
 0x721   : >> { %v3387_v9 = vpop.eup %3386  ;;  %3041 = vmatprep.subr.bf16.mxu1 %v3040_v33  ;;  %2323 = vadd.xlane.f32.xlu1 %v2322_v44  ;;  %v5290_v33 = vld [vmem:[#allocation76_spill] sm:$0xff] }
 0x722   : >> { %v3389_v43 = vpop.eup %3388 }
 0x723   : >> { %v2325_v41 = vadd.f32 %v3389_v43, %v3387_v9 }
 0x724   : >> { %3043 = vmatpush1.bf16.msra.mxu1 %v3042_v60 }
 0x725   : >> { %v3391_v0 = vpop.eup %3390  ;;  %3045 = vmatprep.subr.bf16.mxu1 %v3044_v45  ;;  %2326 = vadd.xlane.f32.xlu1 %v2325_v41  ;;  %v5294_v45 = vld [vmem:[#allocation70_spill] sm:$0xff] }
 0x726   : >> { %v3393_v51 = vpop.eup %3392  ;;  %v3050_v11 = vpack.c.bf16 %v3391_v0, %v3387_v9 }
 0x727   : >> { %v2328_v13 = vadd.f32 %v3393_v51, %v3391_v0  ;;  %v3048_v36 = vpack.c.bf16 %v3393_v51, %v3389_v43  ;;  %v5295_v43 = vld [vmem:[#allocation71_spill] sm:$0xff] }
 0x728   : >> { %3047 = vmatpush1.bf16.msra.mxu1 %v3046_v39  ;;  %v5293_v39 = vld [vmem:[#allocation69_spill] sm:$0xff] }
 0x729   : >> { %3049 = vmatprep.subr.bf16.mxu1 %v3048_v36  ;;  %2329 = vadd.xlane.f32.xlu1 %v2328_v13  ;;  %v5296_v36 = vld [vmem:[#allocation72_spill] sm:$0xff] }
 0x72c   : >> { %3051 = vmatpush1.bf16.msra.mxu1 %v3050_v11 }
 0x73a   : >> { %v2237_v30 = vpop.xlane.xlu0 %2236 }
 0x73b   : >> { %2331 = vxpose.xlu0.b32.start [1/16] (narrow) %v2237_v30, 8 }
 0x73e   : >> { %v2240_v62 = vpop.xlane.xlu0 %2239 }
 0x73f   : >> { %2332 = vxpose.xlu0.b32.cont [2/16] (narrow) %v2240_v62, 8  ;;  %v5297_v62 = vld [vmem:[#allocation73_spill] sm:$0xff] }
 0x742   : >> { %v2243_v29 = vpop.xlane.xlu0 %2242 }
 0x743   : >> { %2333 = vxpose.xlu0.b32.cont [3/16] (narrow) %v2243_v29, 8 }
 0x747   : >> { %v2246_v53 = vpop.xlane.xlu0 %2245 }
 0x748   : >> { %2334 = vxpose.xlu0.b32.cont [4/16] (narrow) %v2246_v53, 8  ;;  %v5298_v53 = vld [vmem:[#allocation74_spill] sm:$0xff] }
 0x74b   : >> { %v2249_v26 = vpop.xlane.xlu0 %2248 }
 0x74c   : >> { %2335 = vxpose.xlu0.b32.cont [5/16] (narrow) %v2249_v26, 8 }
 0x74f   : >> { %v2252_v10 = vpop.xlane.xlu0 %2251 }
 0x750   : >> { %2336 = vxpose.xlu0.b32.cont [6/16] (narrow) %v2252_v10, 8  ;;  %v5299_v10 = vld [vmem:[#allocation75_spill] sm:$0xff] }
 0x753   : >> { %v2255_v2 = vpop.xlane.xlu0 %2254 }
 0x754   : >> { %2337 = vxpose.xlu0.b32.cont [7/16] (narrow) %v2255_v2, 8 }
 0x757   : >> { %v2258_v38 = vpop.xlane.xlu0 %2257 }
 0x758   : >> { %2338 = vxpose.xlu0.b32.cont [8/16] (narrow) %v2258_v38, 8 }
 0x75b   : >> { %v2261_v5 = vpop.xlane.xlu0 %2260 }
 0x75c   : >> { %2339 = vxpose.xlu0.b32.cont [9/16] (narrow) %v2261_v5, 8 }
 0x75f   : >> { %v2264_v59 = vpop.xlane.xlu0 %2263 }
 0x760   : >> { %2340 = vxpose.xlu0.b32.cont [10/16] (narrow) %v2264_v59, 8 }
 0x77a   : >> { %v2285_v35 = vpop.xlane.xlu1 %2284 }
 0x77b   : >> { %2363 = vxpose.xlu1.b32.start [1/16] (narrow) %v2285_v35, 8 }
 0x77e   : >> { %v2288_v63 = vpop.xlane.xlu1 %2287 }
 0x77f   : >> { %2364 = vxpose.xlu1.b32.cont [2/16] (narrow) %v2288_v63, 8 }
 0x782   : >> { %v2291_v61 = vpop.xlane.xlu1 %2290 }
 0x783   : >> { %2365 = vxpose.xlu1.b32.cont [3/16] (narrow) %v2291_v61, 8 }
 0x784   : >> { %v2267_v25 = vpop.xlane.xlu0 %2266 }
 0x785   : >> { %2341 = vxpose.xlu0.b32.cont [11/16] (narrow) %v2267_v25, 8 }
 0x786   : >> { %v2294_v22 = vpop.xlane.xlu1 %2293 }
 0x787   : >> { %2366 = vxpose.xlu1.b32.cont [4/16] (narrow) %v2294_v22, 8 }
 0x789   : >> { %v2270_v31 = vpop.xlane.xlu0 %2269 }
 0x78a   : >> { %2342 = vxpose.xlu0.b32.cont [12/16] (narrow) %v2270_v31, 8  ;;  %v2297_v17 = vpop.xlane.xlu1 %2296 }
 0x78b   : >> { %2367 = vxpose.xlu1.b32.cont [5/16] (narrow) %v2297_v17, 8 }
 0x78d   : >> { %v2273_v23 = vpop.xlane.xlu0 %2272 }
 0x78e   : >> { %2343 = vxpose.xlu0.b32.cont [13/16] (narrow) %v2273_v23, 8  ;;  %v2300_v32 = vpop.xlane.xlu1 %2299 }
 0x78f   : >> { %2368 = vxpose.xlu1.b32.cont [6/16] (narrow) %v2300_v32, 8 }
 0x791   : >> { %v2276_v50 = vpop.xlane.xlu0 %2275 }
 0x792   : >> { %2344 = vxpose.xlu0.b32.cont [14/16] (narrow) %v2276_v50, 8  ;;  %v2303_v48 = vpop.xlane.xlu1 %2302 }
 0x793   : >> { %2369 = vxpose.xlu1.b32.cont [7/16] (narrow) %v2303_v48, 8 }
 0x795   : >> { %v2279_v20 = vpop.xlane.xlu0 %2278 }
 0x796   : >> { %2345 = vxpose.xlu0.b32.cont [15/16] (narrow) %v2279_v20, 8  ;;  %v2306_v47 = vpop.xlane.xlu1 %2305 }
 0x797   : >> { %2370 = vxpose.xlu1.b32.cont [8/16] (narrow) %v2306_v47, 8 }
 0x799   : >> { %v2282_v52 = vpop.xlane.xlu0 %2281 }
 0x79a   : >> { %2346 = vxpose.xlu0.b32.end [16/16] (narrow) %v2282_v52, 8  ;;  %v2309_v42 = vpop.xlane.xlu1 %2308 }
 0x79b   : >> { %2371 = vxpose.xlu1.b32.cont [9/16] (narrow) %v2309_v42, 8 }
 0x79e   : >> { %v2312_v24 = vpop.xlane.xlu1 %2311 }
 0x79f   : >> { %2372 = vxpose.xlu1.b32.cont [10/16] (narrow) %v2312_v24, 8 }
 0x7a2   : >> { %v2315_v7 = vpop.xlane.xlu1 %2314 }
 0x7a3   : >> { %2373 = vxpose.xlu1.b32.cont [11/16] (narrow) %v2315_v7, 8 }
 0x7a6   : >> { %v2318_v56 = vpop.xlane.xlu1 %2317 }
 0x7a7   : >> { %2374 = vxpose.xlu1.b32.cont [12/16] (narrow) %v2318_v56, 8 }
 0x7aa   : >> { %v2321_v46 = vpop.xlane.xlu1 %2320 }
 0x7ab   : >> { %2375 = vxpose.xlu1.b32.cont [13/16] (narrow) %v2321_v46, 8 }
 0x7ae   : >> { %v2324_v40 = vpop.xlane.xlu1 %2323 }
 0x7af   : >> { %2376 = vxpose.xlu1.b32.cont [14/16] (narrow) %v2324_v40, 8 }
 0x7b2   : >> { %v2327_v27 = vpop.xlane.xlu1 %2326 }
 0x7b3   : >> { %2377 = vxpose.xlu1.b32.cont [15/16] (narrow) %v2327_v27, 8 }
 0x7b6   : >> { %v2330_v49 = vpop.xlane.xlu1 %2329 }
 0x7b7   : >> { %2378 = vxpose.xlu1.b32.end [16/16] (narrow) %v2330_v49, 8 }
 0x7c3   : >> { %451 = vperm.xlu0 %3132, %v5286_v6  }
 0x7d5   : >> { %456 = vperm.xlu1 %3133, %v5287_v21  }
 0x7d9   : >> { %461 = vperm.xlu1 %3133, %v5288_v4  }
 0x7dd   : >> { %466 = vperm.xlu1 %3133, %v5289_v37  }
 0x7de   : >> { %v2347_v28 = vpop.trf.xlu0 }
 0x7df   : >> { %3394 = vrcp.f32 %v2347_v28 }
 0x7e9   : >> { %v3395_v12 = vpop.eup %3394 }
 0x7ea   : >> { %v2541_v14 = vmul.f32 %v3395_v12, %v2347_v28 }
 0x7ec   : >> { %v2543_v57 = vmul.f32 0.00390625, %v2541_v14 }
 0x7fb   : >> { %v2379_v54 = vpop.trf.xlu1 }
 0x7fc   : >> { %3396 = vrcp.f32 %v2379_v54 }
 0x806   : >> { %v3397_v60 = vpop.eup %3396 }
 0x807   : >> { %v2542_v8 = vmul.f32 %v3397_v60, %v2379_v54  ;;  %2463 = vmatprep.mubr.f32.mxu1 %v3397_v60 }
 0x808   : >> { %2464 = vmatmul.mubr.f32.vlgmr.msra.gmra.mrb[80].mxu1 %v3395_v12 }
 0x809   : >> { %v2544_v34 = vmul.f32 0.00390625, %v2542_v8 }
 0x80b   : >> { %v2549_v18 = vcombine.low %v2543_v57, %v2544_v34 }
 0x80d   : >> { %v2556_v58 = vrot.slane %v2549_v18, %v5290_v33 }
 0x80f   : >> { %v2563_v19 = vrot.slane %v2556_v58, %v5290_v33 }
 0x811   : >> { %2566 = vst.msk [vmem:[%s2565_s14] sm:$0x3] %vm4467_vm5, %v2563_v19 }
 0x842   : >> { %v452_v16 = vpop.permute.xlu0 %451 }
 0x843   : >> { %v736_v55 = vadd.f32 %v5292_v15, %v452_v16  ;;  %v738_v44 = vadd.f32 %v5293_v39, %v452_v16 }
 0x854   : >> { %v457_v1 = vpop.permute.xlu1 %456 }
 0x855   : >> { %v742_v9 = vadd.f32 %v5294_v45, %v457_v1  ;;  %v744_v41 = vadd.f32 %v5295_v43, %v457_v1 }
 0x857   : >> { %v3052_v0 = vpack.c.bf16 %v744_v41, %v738_v44  ;;  %v3054_v51 = vpack.c.bf16 %v742_v9, %v736_v55 }
 0x858   : >> { %v462_v11 = vpop.permute.xlu1 %461 }
 0x859   : >> { %3053 = vmatprep.subr.bf16.mxu1 %v3052_v0  ;;  %v748_v30 = vadd.f32 %v5296_v36, %v462_v11  ;;  %v750_v29 = vadd.f32 %v5297_v62, %v462_v11 }
 0x85a   : >> { %3055 = vmatpush1.bf16.xpose.msra.mxu1 %v3054_v51 }
 0x85c   : >> { %v467_v13 = vpop.permute.xlu1 %466 }
 0x85d   : >> { %v754_v26 = vadd.f32 %v5298_v53, %v467_v13  ;;  %v756_v2 = vadd.f32 %v5299_v10, %v467_v13 }
 0x85f   : >> { %v3056_v38 = vpack.c.bf16 %v756_v2, %v750_v29  ;;  %v3058_v5 = vpack.c.bf16 %v754_v26, %v748_v30 }
 0x861   : >> { %3057 = vmatprep.subr.bf16.mxu1 %v3056_v38 }
 0x862   : >> { %3059 = vmatpush1.bf16.xpose.msra.mxu1 %v3058_v5 }
 0x8db   : >> { %v2465_v59 = vpop.f32.mrb[80].mxu1 }
 0x8dc   : >> { %v2467_v35 = vpop.f32.mrb[81].mxu1 }
 0x8dd   : >> { %2534 = vmatprep.mubr.f32.mxu1 %v2467_v35 }
 0x8de   : >> { %2535 = vmatmul.mubr.f32.vlgmr.msra.gmra.mrb[82].mxu1 %v2465_v59 }
 0x9ae   : > { %340 = sbr.rel (!%p338_p11) target bundleno = 54 (0x36), region = 128 }
 0x9b1   : >> { %v2536_v63 = vpop.f32.mrb[82].mxu1 }
 0x9b2   : >> { %v2540_v61 = vmul.f32 0.00390625, %v2536_v63  ;;  %v2538_v25 = vpop.f32.mrb[83].mxu1 }
 0x9b4   : >> { %2546 = vst.msk [vmem:[%s2545_s15] sm:$0x1] %vm1639_vm6, %v2540_v61 }
 0x9b5   : > { %3411 = shalt.err (!%p3408_p4)
}
 0x9b6   : > { %s3412_s28 = scalar_lea.hbm %s4906_s12, 32  ;;  %s3416_s15 = scalar_lea.hbm %s5069_s4, 64 }
 0x9b7   : > { %p3413_p7 = scmp.ne.s32.totalorder %s4906_s12, %s3412_s28  ;;  %p3417_p10 = scmp.lt.u32.totalorder %s4906_s12, %s5069_s4 }
 0x9b8   : > { %p3418_p11 = scmp.lt.u32.totalorder %s3416_s15, %s3412_s28  ;;  %p3420_p13 = scmp.lt.u32.totalorder %s3412_s28, %s4906_s12 }
 0x9b9   : > { %p3414_p8 = pnand %p3413_p7, %p3649_p5 }
 0x9ba   : > { %p3419_p12 = por %p3418_p11, %p3417_p10 }
 0x9bb   : > { %p3415_p9 = pneg %p3414_p8 }
 0x9bc   : > { %p3421_p0 = por %p3420_p13, %p3419_p12 }
 0x9be   : > { %p3422_p1 = pnand %p3421_p0, %p3415_p9 }
 0x9c0   : > { %3425 = shalt.err (!%p3422_p1)
}
 0x9c1   : > { %s3567_s0 = smov 16   ;;  %s3568_s26 = smov 1  }
 0x9c2   : > { %3063 = dma.vmem_to_hbm [thread:$0]  (%p3649_p5), %s4909_s13, 32, %s4906_s12, %s4916_s29, %s3567_s0, %s3567_s0, %s3568_s26  }
 0x9c3   : > { %s2596_s28 = sshll.u32 %s3912_s16, 4  ;;  %s5105_s17 = sshll.u32 %s3630_s25, 6  ;;  %s4945_s28 = int_to_ptr.vmem [resolvable:$true] %s2596_s28 }
 0x9c4   : > { %s4952_s18 = scalar_lea.hbm %s5070_s5, %s5105_s17  ;;  %s3426_s1 = scalar_lea.vmem %s4945_s28, 32 }
 0x9c5   : > { %p3427_p2 = scmp.ne.s32.totalorder %s4945_s28, %s3426_s1  ;;  %s3569_s12 = smov [#allocation2]  }
 0x9c6   : > { %s3430_s16 = sshll.u32 %s3569_s12, 4  ;;  %s3431_s16 = int_to_ptr.vmem [resolvable:$false] %s3430_s16 }
 0x9c7   : > { %p3428_p3 = pnand %p3427_p2, %p3649_p5  ;;  %s3432_s13 = scalar_lea.vmem %s3431_s16, 64 }
 0x9c8   : > { %p3433_p7 = scmp.lt.s32.totalorder %s4945_s28, %s3431_s16  ;;  %p3434_p8 = scmp.lt.s32.totalorder %s3432_s13, %s3426_s1 }
 0x9c9   : > { %p3429_p4 = pneg %p3428_p3 }
 0x9ca   : > { %p3435_p9 = por %p3434_p8, %p3433_p7 }
 0x9cc   : > { %p3436_p10 = pnand %p3435_p9, %p3429_p4 }
 0x9ce   : > { %3439 = shalt.err (!%p3436_p10)
}
 0x9cf   : > { %s3440_s14 = scalar_lea.hbm %s4914_s20, 32  ;;  %s3444_s12 = scalar_lea.hbm %s5068_s3, 64 }
 0x9d0   : > { %p3441_p11 = scmp.ne.s32.totalorder %s4914_s20, %s3440_s14  ;;  %p3445_p0 = scmp.lt.u32.totalorder %s4914_s20, %s5068_s3 }
 0x9d1   : > { %p3446_p1 = scmp.lt.u32.totalorder %s3444_s12, %s3440_s14  ;;  %p3448_p3 = scmp.lt.u32.totalorder %s3440_s14, %s4914_s20 }
 0x9d2   : > { %p3442_p12 = pnand %p3441_p11, %p3649_p5 }
 0x9d3   : > { %p3447_p2 = por %p3446_p1, %p3445_p0 }
 0x9d4   : > { %p3443_p13 = pneg %p3442_p12 }
 0x9d5   : > { %p3449_p4 = por %p3448_p3, %p3447_p2 }
 0x9d7   : > { %p3450_p7 = pnand %p3449_p4, %p3443_p13 }
 0x9d9   : > { %3453 = shalt.err (!%p3450_p7)
}
 0x9da   : > { %s5300_s1 = scalar_lea.sflag [#allocation3], %s3660_s9  ;;  %s2629_s17 = sshll.u32 %s3920_s19, 4  ;;  %s4982_s17 = int_to_ptr.vmem [resolvable:$true] %s2629_s17 }
 0x9db   : > { %3062 = dma.vmem_to_hbm [thread:$0]  (%p3649_p5), %s4945_s28, 32, %s4914_s20, %s5300_s1, %s3567_s0, %s3567_s0, %s3568_s26  }
 0x9dc   : > { %s3454_s11 = scalar_lea.vmem %s4982_s17, 64  ;;  %s3570_s13 = smov [#allocation6]  }
 0x9dd   : > { %p3455_p8 = scmp.ne.s32.totalorder %s4982_s17, %s3454_s11  ;;  %s3458_s14 = sshll.u32 %s3570_s13, 4  ;;  %s3459_s14 = int_to_ptr.vmem [resolvable:$false] %s3458_s14 }
 0x9de   : > { %s3460_s15 = scalar_lea.vmem %s3459_s14, 128  ;;  %p3461_p11 = scmp.lt.s32.totalorder %s4982_s17, %s3459_s14 }
 0x9df   : > { %p3456_p9 = pnand %p3455_p8, %p3649_p5  ;;  %p3462_p12 = scmp.lt.s32.totalorder %s3460_s15, %s3454_s11 }
 0x9e1   : > { %p3457_p10 = pneg %p3456_p9  ;;  %p3463_p13 = por %p3462_p12, %p3461_p11 }
 0x9e3   : > { %p3464_p0 = pnand %p3463_p13, %p3457_p10 }
 0x9e5   : > { %3467 = shalt.err (!%p3464_p0)
}
 0x9e6   : > { %s3468_s19 = scalar_lea.hbm %s4952_s18, 64  ;;  %s3472_s26 = scalar_lea.hbm %s5070_s5, 128 }
 0x9e7   : > { %p3469_p1 = scmp.ne.s32.totalorder %s4952_s18, %s3468_s19  ;;  %p3473_p4 = scmp.lt.u32.totalorder %s4952_s18, %s5070_s5 }
 0x9e8   : > { %p3474_p7 = scmp.lt.u32.totalorder %s3472_s26, %s3468_s19  ;;  %p3476_p9 = scmp.lt.u32.totalorder %s3468_s19, %s4952_s18 }
 0x9e9   : > { %p3470_p2 = pnand %p3469_p1, %p3649_p5 }
 0x9ea   : > { %p3475_p8 = por %p3474_p7, %p3473_p4 }
 0x9eb   : > { %p3471_p3 = pneg %p3470_p2 }
 0x9ec   : > { %p3477_p10 = por %p3476_p9, %p3475_p8 }
 0x9ee   : > { %p3478_p11 = pnand %p3477_p10, %p3471_p3 }
 0x9f0   : > { %3481 = shalt.err (!%p3478_p11)
}
 0x9f1   : > { %s3571_s16 = smov 32   ;;  %s3572_s1 = smov 2  }
 0x9f2   : > { %3064 = dma.vmem_to_hbm [thread:$0]  (%p3649_p5), %s4982_s17, 64, %s4952_s18, %s4916_s29, %s3571_s16, %s3571_s16, %s3572_s1  }
 0x9f3   : > { %s5301_s11 = sshll.u32 %s3630_s25, 6  ;;  %s2646_s19 = sshll.u32 %s3924_s10, 4  ;;  %s5017_s19 = int_to_ptr.vmem [resolvable:$true] %s2646_s19 }
 0x9f4   : > { %s5014_s15 = scalar_lea.hbm %s5071_s6, %s5301_s11  ;;  %s2583_s20 = scalar_lea.sflag [#allocation8], %s3660_s9 }
 0x9f5   : > { %s3482_s0 = scalar_lea.vmem %s5017_s19, 64  ;;  %s3573_s26 = smov [#allocation7]  }
 0x9f6   : > { %p3483_p12 = scmp.ne.s32.totalorder %s5017_s19, %s3482_s0  ;;  %s3486_s29 = sshll.u32 %s3573_s26, 4  ;;  %s3487_s29 = int_to_ptr.vmem [resolvable:$false] %s3486_s29 }
 0x9f7   : > { %s3488_s25 = scalar_lea.vmem %s3487_s29, 128  ;;  %p3489_p1 = scmp.lt.s32.totalorder %s5017_s19, %s3487_s29 }
 0x9f8   : > { %p3484_p13 = pnand %p3483_p12, %p3649_p5  ;;  %p3490_p2 = scmp.lt.s32.totalorder %s3488_s25, %s3482_s0 }
 0x9fa   : > { %p3485_p0 = pneg %p3484_p13  ;;  %p3491_p3 = por %p3490_p2, %p3489_p1 }
 0x9fc   : > { %p3492_p4 = pnand %p3491_p3, %p3485_p0 }
 0x9fe   : > { %3495 = shalt.err (!%p3492_p4)
}
 0x9ff   : > { %s3496_s10 = scalar_lea.hbm %s5014_s15, 64  ;;  %s3500_s28 = scalar_lea.hbm %s5071_s6, 128 }
 0xa00   : > { %p3497_p7 = scmp.ne.s32.totalorder %s5014_s15, %s3496_s10  ;;  %p3501_p10 = scmp.lt.u32.totalorder %s5014_s15, %s5071_s6 }
 0xa01   : > { %p3502_p11 = scmp.lt.u32.totalorder %s3500_s28, %s3496_s10  ;;  %p3504_p13 = scmp.lt.u32.totalorder %s3496_s10, %s5014_s15 }
 0xa02   : > { %p3498_p8 = pnand %p3497_p7, %p3649_p5 }
 0xa03   : > { %p3503_p12 = por %p3502_p11, %p3501_p10 }
 0xa04   : > { %p3499_p9 = pneg %p3498_p8 }
 0xa05   : > { %p3505_p0 = por %p3504_p13, %p3503_p12 }
 0xa07   : > { %p3506_p1 = pnand %p3505_p0, %p3499_p9 }
 0xa09   : > { %3509 = shalt.err (!%p3506_p1)
}
 0xa0a   : > { %3065 = dma.vmem_to_hbm [thread:$0]  (%p3649_p5), %s5017_s19, 64, %s5014_s15, %s2583_s20, %s3571_s16, %s3571_s16, %s3572_s1  }
 0xa0b PF: > { %p3083_p2 = scmp.ge.s32.totalorder %s3556_s24, 2  ;;  %s2661_s13 = sand.u32 1, %s3544_s21  }
 0xa0c   : > { %s2662_s14 = scalar_lea.sflag [#allocation3], %s2661_s13 }
 0xa0d   : > { %p3071_p3 = pnand %p3083_p2, %p3653_p6 }
 0xa0f   : > { %3531 = dma.done.wait (!%p3071_p3), %s2662_s14, 32  }
 0xa10   : > { %3533 = vsyncadd (!%p3071_p3), %s2662_s14, 4294967264  ;;  %s5302_s7 = sadd.s32 4294967294, %s3556_s24  }
 0xa11   : > { %s2670_s0 = sand.u32 1, %s5302_s7  }
 0xa12   : > { %s2671_s26 = scalar_lea.sflag [#allocation5], %s2670_s0 }
 0xa13   : > { %3535 = dma.done.wait (!%p3071_p3), %s2671_s26, 96  }
 0xa14   : > { %3537 = vsyncadd (!%p3071_p3), %s2671_s26, 4294967200  ;;  %s2689_s9 = scalar_lea.sflag [#allocation8], %s2661_s13 }
 0xa15   : > { %3539 = dma.done.wait (!%p3071_p3), %s2689_s9, 64  }
 0xa16   : > { %3541 = vsyncadd (!%p3071_p3), %s2689_s9, 4294967232  ;;  %p23_p5 = scmp.ge.s32.totalorder %s3634_s27, 4   ;;  %s5303_s21 = smov %s3548_s22 }
 0xa17   : > { %s5304_s22 = smov %s3552_s23  ;;  %s5305_s23 = smov %s3647_s30 }
 0xa18   : > { %s5306_s24 = smov %s3634_s27  ;;  %25 = sbr.rel (!%p23_p5) target bundleno = 10 (0xa), region = 139 }
 0xa1f   :  { %2694 = vsyncpa [#allocation3], 1 }
 0xa20   :  { %2696 = vsyncpa [#allocation3 + $0x1], 1 }
 0xa21   :  { %2697 = vsyncpa [#allocation5], 1 }
 0xa22   :  { %2699 = vsyncpa [#allocation5 + $0x1], 1 }
 0xa23   :  { %2700 = vsyncpa [#allocation8], 1 }
 0xa24   :  { %2702 = vsyncpa [#allocation8 + $0x1], 1 }

</bundles_post_ra>
